<compile_context>
chip_gen: v6e
topology: v6e:2x2x1
jax: 0.10.0
libtpu: 0.0.40
codegen_flags: <defaults>
</compile_context>

<pallas_src>
import functools

import jax
import jax.numpy as jnp
from jax.experimental import pallas as pl
from jax.experimental.pallas import tpu as pltpu


def context_sinr_kernel(x_ref, c_ref,
                        win_ref, bin_ref,
                        wl_ref, bl_ref,
                        wemb_ref, bemb_ref,
                        wcls_ref, bcls_ref,
                        out_ref,
                        h_ref):
    """Grid axis 0 tiles the (padded) classifier output dimension."""
    f32 = jnp.float32

    # ---- Encoder head: run once, keep the (B, H) activations in VMEM scratch.
    @pl.when(pl.program_id(0) == 0)
    def _encode():
        x = x_ref[...]
        c = c_ref[...]

        # inp_l + ReLU
        h = jnp.maximum(
            jnp.dot(x, win_ref[...], preferred_element_type=f32) + bin_ref[...],
            0.0)

        # Context residual layers (Dropout is identity at inference).
        n_layers = wl_ref.shape[0]
        for l in range(n_layers):  # static unroll, small L
            b1 = jnp.maximum(
                jnp.dot(h, wl_ref[l, 0], preferred_element_type=f32)
                + bl_ref[l, 0], 0.0)
            b2 = jnp.maximum(
                jnp.dot(b1, wl_ref[l, 1], preferred_element_type=f32)
                + bl_ref[l, 1], 0.0)
            ctx = (jnp.dot(c, wemb_ref[l], preferred_element_type=f32)
                   + bemb_ref[l])
            h = h + b2 + ctx

        # Store in the classifier matmul dtype once (no per-step cast).
        h_ref[...] = h.astype(h_ref.dtype)

    # ---- Classifier tile: the only per-grid-step work (streams wcls tiles).
    out_ref[...] = (jnp.dot(h_ref[...], wcls_ref[...],
                            preferred_element_type=f32)
                    + bcls_ref[...]).astype(out_ref.dtype)


def _replicated_spec(shape):
    """Whole-array block, same block for every grid step (fetched once)."""
    n = len(shape)
    return pl.BlockSpec(shape, lambda i, _n=n: (0,) * _n)


def prepare_classifier(wcls, bcls, *, tile_n=2048,
                       classifier_dtype=jnp.bfloat16):
    """One-time pad/cast of the big classifier weight (keep off the hot path)."""
    assert tile_n % 128 == 0, "tile_n must be lane-aligned"
    H, n_classes = wcls.shape
    n_tiles = pl.cdiv(n_classes, tile_n)
    n_pad = n_tiles * tile_n  # 10040 -> 10240 (= 80 * 128): lane-dense tiles
    wcls_p = jnp.pad(wcls, ((0, 0), (0, n_pad - n_classes))).astype(classifier_dtype)
    bcls_p = jnp.pad(bcls, ((0, 0), (0, n_pad - n_classes))).astype(jnp.float32)
    return wcls_p, bcls_p


@functools.partial(jax.jit, static_argnames=("tile_n", "n_classes"))
def _context_sinr_padded(x, c, win, bin_, wl, bl, wemb, bemb,
                         wcls_p, bcls_p, *, tile_n, n_classes):
    B = x.shape[0]
    H, n_pad = wcls_p.shape
    n_tiles = n_pad // tile_n

    small_ops = (x, c, win, bin_, wl, bl, wemb, bemb)
    in_specs = [_replicated_spec(op.shape) for op in small_ops]
    in_specs += [
        pl.BlockSpec((H, tile_n), lambda i: (0, i)),   # wcls tile
        pl.BlockSpec((1, tile_n), lambda i: (0, i)),   # bcls tile
    ]
    out_specs = pl.BlockSpec((B, tile_n), lambda i: (0, i))

    out_padded = pl.pallas_call(
        context_sinr_kernel,
        out_shape=jax.ShapeDtypeStruct((B, n_pad), jnp.float32),
        grid=(n_tiles,),
        in_specs=in_specs,
        out_specs=out_specs,
        scratch_shapes=[pltpu.VMEM((B, H), wcls_p.dtype)],
        compiler_params=pltpu.CompilerParams(
            # Scratch h carries state across tiles -> sequential ("arbitrary").
            dimension_semantics=("arbitrary",),
            # ~9 MB of live buffers worst case; 32 MiB leaves ample headroom
            # even on v7x's smaller VMEM.
            vmem_limit_bytes=32 * 1024 * 1024),
    )(*small_ops, wcls_p, bcls_p)

    return out_padded[:, :n_classes]


def context_sinr_forward(x, c, params, *, tile_n=2048,
                         classifier_dtype=jnp.bfloat16):
    """Convenience wrapper: pad/cast classifier + run the fused kernel."""
    win, bin_, wl, bl, wemb, bemb, wcls, bcls = params
    n_classes = wcls.shape[1]
    wcls_p, bcls_p = prepare_classifier(wcls, bcls, tile_n=tile_n,
                                        classifier_dtype=classifier_dtype)
    return _context_sinr_padded(x, c, win, bin_, wl, bl, wemb, bemb,
                                wcls_p, bcls_p,
                                tile_n=tile_n, n_classes=n_classes)


def context_sinr_reference(x, c, params, *, classifier_dtype=None):
    """Pure-JAX reference for correctness checking."""
    win, bin_, wl, bl, wemb, bemb, wcls, bcls = params
    h = jnp.maximum(x @ win + bin_, 0.0)
    for l in range(wl.shape[0]):
        b1 = jnp.maximum(h @ wl[l, 0] + bl[l, 0], 0.0)
        b2 = jnp.maximum(b1 @ wl[l, 1] + bl[l, 1], 0.0)
        h = h + b2 + (c @ wemb[l] + bemb[l])
    if classifier_dtype is not None:
        logits = jnp.dot(h.astype(classifier_dtype), wcls.astype(classifier_dtype),
                         preferred_element_type=jnp.float32) + bcls
    else:
        logits = h @ wcls + bcls
    return logits


def init_params(key, *, input_len=4, hidden=256, layers=4, n_classes=10040):
    """Deterministic synthetic parameters (shapes match the torch module)."""
    ks = jax.random.split(key, 8)
    s = 0.02
    win = jax.random.normal(ks[0], (input_len, hidden), jnp.float32) * s
    bin_ = jax.random.normal(ks[1], (1, hidden), jnp.float32) * s
    wl = jax.random.normal(ks[2], (layers, 2, hidden, hidden), jnp.float32) * s
    bl = jax.random.normal(ks[3], (layers, 2, 1, hidden), jnp.float32) * s
    wemb = jax.random.normal(ks[4], (layers, 256, hidden), jnp.float32) * s
    bemb = jax.random.normal(ks[5], (layers, 1, hidden), jnp.float32) * s
    wcls = jax.random.normal(ks[6], (hidden, n_classes), jnp.float32) * s
    bcls = jax.random.normal(ks[7], (1, n_classes), jnp.float32) * s
    return win, bin_, wl, bl, wemb, bemb, wcls, bcls


if __name__ == "__main__":
    # Module defaults: input_len=4, hidden_dim=256, layers=4, 10040 classes.
    # B=8 keeps rows sublane-aligned; larger batches amortize the weight DMA.
    B, INPUT_LEN, HIDDEN, LAYERS, NCLS = 8, 4, 256, 4, 10040

    key = jax.random.PRNGKey(0)
    kx, kc, kp = jax.random.split(key, 3)

    x = jax.random.normal(kx, (B, INPUT_LEN), jnp.float32)
    c = jax.random.normal(kc, (B, 256), jnp.float32)   # 256-d context vector
    params = init_params(kp, input_len=INPUT_LEN, hidden=HIDDEN,
                         layers=LAYERS, n_classes=NCLS)

    out = jax.block_until_ready(context_sinr_forward(x, c, params))

    ref_bf16 = jax.block_until_ready(
        context_sinr_reference(x, c, params, classifier_dtype=jnp.bfloat16))
    ref_f32 = jax.block_until_ready(context_sinr_reference(x, c, params))

    assert out.shape == (B, NCLS), out.shape
    # Tight check vs. a reference using the same bf16 classifier weights.
    assert jnp.allclose(out, ref_bf16, atol=1e-3, rtol=1e-3), \
        "mismatch vs bf16-matched JAX reference"
    # Loose check vs. the exact f32 module semantics (covers bf16 quantization).
    assert jnp.allclose(out, ref_f32, atol=3e-2, rtol=3e-2), \
        "mismatch vs f32 JAX reference"
    print("KERNEL_OK")
</pallas_src>

<mosaic_0001>
module attributes {stable_mosaic.version = 11 : i64} {
  func.func @context_sinr_kernel(%arg0: i32, %arg1: memref<8x4xf32, #tpu.memory_space<vmem>>, %arg2: memref<8x256xf32, #tpu.memory_space<vmem>>, %arg3: memref<4x256xf32, #tpu.memory_space<vmem>>, %arg4: memref<1x256xf32, #tpu.memory_space<vmem>>, %arg5: memref<4x2x256x256xf32, #tpu.memory_space<vmem>>, %arg6: memref<4x2x1x256xf32, #tpu.memory_space<vmem>>, %arg7: memref<4x256x256xf32, #tpu.memory_space<vmem>>, %arg8: memref<4x1x256xf32, #tpu.memory_space<vmem>>, %arg9: memref<256x2048xbf16, #tpu.memory_space<vmem>>, %arg10: memref<1x2048xf32, #tpu.memory_space<vmem>>, %arg11: memref<8x2048xf32, #tpu.memory_space<vmem>>, %arg12: memref<8x256xbf16, #tpu.memory_space<vmem>>) attributes {dimension_semantics = [#tpu.dimension_semantics<arbitrary>], iteration_bounds = array<i64: 5>, scalar_prefetch = 0 : i64, scratch_operands = 1 : i64, tpu.core_type = #tpu.core_type<tc>, window_params = [{pipeline_mode = #tpu.pipeline_mode<synchronous>, transform_indices = @transform_0, window_bounds = array<i64: 8, 4>}, {pipeline_mode = #tpu.pipeline_mode<synchronous>, transform_indices = @transform_1, window_bounds = array<i64: 8, 256>}, {pipeline_mode = #tpu.pipeline_mode<synchronous>, transform_indices = @transform_2, window_bounds = array<i64: 4, 256>}, {pipeline_mode = #tpu.pipeline_mode<synchronous>, transform_indices = @transform_3, window_bounds = array<i64: 1, 256>}, {pipeline_mode = #tpu.pipeline_mode<synchronous>, transform_indices = @transform_4, window_bounds = array<i64: 4, 2, 256, 256>}, {pipeline_mode = #tpu.pipeline_mode<synchronous>, transform_indices = @transform_5, window_bounds = array<i64: 4, 2, 1, 256>}, {pipeline_mode = #tpu.pipeline_mode<synchronous>, transform_indices = @transform_6, window_bounds = array<i64: 4, 256, 256>}, {pipeline_mode = #tpu.pipeline_mode<synchronous>, transform_indices = @transform_7, window_bounds = array<i64: 4, 1, 256>}, {transform_indices = @transform_8, window_bounds = array<i64: 256, 2048>}, {transform_indices = @transform_9, window_bounds = array<i64: 1, 2048>}, {transform_indices = @transform_10, window_bounds = array<i64: 8, 2048>}]} {
    %c0_i32 = arith.constant 0 : i32
    %0 = arith.cmpi eq, %arg0, %c0_i32 : i32
    %1 = arith.extui %0 : i1 to i32
    %c0_i32_0 = arith.constant 0 : i32
    %2 = arith.cmpi ne, %1, %c0_i32_0 : i32
    scf.if %2 {
      %c0_8 = arith.constant 0 : index
      %c0_9 = arith.constant 0 : index
      %10 = vector.load %arg1[%c0_8, %c0_9] : memref<8x4xf32, #tpu.memory_space<vmem>>, vector<8x4xf32>
      %c0_10 = arith.constant 0 : index
      %c0_11 = arith.constant 0 : index
      %11 = vector.load %arg2[%c0_10, %c0_11] : memref<8x256xf32, #tpu.memory_space<vmem>>, vector<8x256xf32>
      %c0_12 = arith.constant 0 : index
      %c0_13 = arith.constant 0 : index
      %12 = vector.load %arg3[%c0_12, %c0_13] : memref<4x256xf32, #tpu.memory_space<vmem>>, vector<4x256xf32>
      %cst_14 = arith.constant dense<0.000000e+00> : vector<8x256xf32>
      %13 = tpu.matmul %10, %12, %cst_14 {dimension_numbers = #tpu.dot_dimension_numbers<[1], [0], [0], [1], [0, 0, 1, 1], [], []>} : vector<8x4xf32>, vector<4x256xf32>, vector<8x256xf32> -> vector<8x256xf32>
      %c0_15 = arith.constant 0 : index
      %c0_16 = arith.constant 0 : index
      %14 = vector.load %arg4[%c0_15, %c0_16] : memref<1x256xf32, #tpu.memory_space<vmem>>, vector<1x256xf32>
      %15 = vector.broadcast %14 : vector<1x256xf32> to vector<8x256xf32>
      %16 = arith.addf %13, %15 : vector<8x256xf32>
      %cst_17 = arith.constant 0.000000e+00 : f32
      %17 = vector.broadcast %cst_17 : f32 to vector<8x256xf32>
      %18 = arith.maximumf %16, %17 : vector<8x256xf32>
      %c0_18 = arith.constant 0 : index
      %c0_19 = arith.constant 0 : index
      %c0_20 = arith.constant 0 : index
      %c0_21 = arith.constant 0 : index
      %19 = vector.load %arg5[%c0_18, %c0_19, %c0_20, %c0_21] : memref<4x2x256x256xf32, #tpu.memory_space<vmem>>, vector<1x1x256x256xf32>
      %20 = vector.shape_cast %19 : vector<1x1x256x256xf32> to vector<256x256xf32>
      %cst_22 = arith.constant dense<0.000000e+00> : vector<8x256xf32>
      %21 = tpu.matmul %18, %20, %cst_22 {dimension_numbers = #tpu.dot_dimension_numbers<[1], [0], [0], [1], [0, 0, 1, 1], [], []>} : vector<8x256xf32>, vector<256x256xf32>, vector<8x256xf32> -> vector<8x256xf32>
      %c0_23 = arith.constant 0 : index
      %c0_24 = arith.constant 0 : index
      %c0_25 = arith.constant 0 : index
      %c0_26 = arith.constant 0 : index
      %22 = vector.load %arg6[%c0_23, %c0_24, %c0_25, %c0_26] : memref<4x2x1x256xf32, #tpu.memory_space<vmem>>, vector<1x1x1x256xf32>
      %23 = vector.shape_cast %22 : vector<1x1x1x256xf32> to vector<1x256xf32>
      %24 = vector.broadcast %23 : vector<1x256xf32> to vector<8x256xf32>
      %25 = arith.addf %21, %24 : vector<8x256xf32>
      %cst_27 = arith.constant 0.000000e+00 : f32
      %26 = vector.broadcast %cst_27 : f32 to vector<8x256xf32>
      %27 = arith.maximumf %25, %26 : vector<8x256xf32>
      %c0_28 = arith.constant 0 : index
      %c1 = arith.constant 1 : index
      %c0_29 = arith.constant 0 : index
      %c0_30 = arith.constant 0 : index
      %28 = vector.load %arg5[%c0_28, %c1, %c0_29, %c0_30] : memref<4x2x256x256xf32, #tpu.memory_space<vmem>>, vector<1x1x256x256xf32>
      %29 = vector.shape_cast %28 : vector<1x1x256x256xf32> to vector<256x256xf32>
      %cst_31 = arith.constant dense<0.000000e+00> : vector<8x256xf32>
      %30 = tpu.matmul %27, %29, %cst_31 {dimension_numbers = #tpu.dot_dimension_numbers<[1], [0], [0], [1], [0, 0, 1, 1], [], []>} : vector<8x256xf32>, vector<256x256xf32>, vector<8x256xf32> -> vector<8x256xf32>
      %c0_32 = arith.constant 0 : index
      %c1_33 = arith.constant 1 : index
      %c0_34 = arith.constant 0 : index
      %c0_35 = arith.constant 0 : index
      %31 = vector.load %arg6[%c0_32, %c1_33, %c0_34, %c0_35] : memref<4x2x1x256xf32, #tpu.memory_space<vmem>>, vector<1x1x1x256xf32>
      %32 = vector.shape_cast %31 : vector<1x1x1x256xf32> to vector<1x256xf32>
      %33 = vector.broadcast %32 : vector<1x256xf32> to vector<8x256xf32>
      %34 = arith.addf %30, %33 : vector<8x256xf32>
      %cst_36 = arith.constant 0.000000e+00 : f32
      %35 = vector.broadcast %cst_36 : f32 to vector<8x256xf32>
      %36 = arith.maximumf %34, %35 : vector<8x256xf32>
      %c0_37 = arith.constant 0 : index
      %c0_38 = arith.constant 0 : index
      %c0_39 = arith.constant 0 : index
      %37 = vector.load %arg7[%c0_37, %c0_38, %c0_39] : memref<4x256x256xf32, #tpu.memory_space<vmem>>, vector<1x256x256xf32>
      %38 = vector.shape_cast %37 : vector<1x256x256xf32> to vector<256x256xf32>
      %cst_40 = arith.constant dense<0.000000e+00> : vector<8x256xf32>
      %39 = tpu.matmul %11, %38, %cst_40 {dimension_numbers = #tpu.dot_dimension_numbers<[1], [0], [0], [1], [0, 0, 1, 1], [], []>} : vector<8x256xf32>, vector<256x256xf32>, vector<8x256xf32> -> vector<8x256xf32>
      %c0_41 = arith.constant 0 : index
      %c0_42 = arith.constant 0 : index
      %c0_43 = arith.constant 0 : index
      %40 = vector.load %arg8[%c0_41, %c0_42, %c0_43] : memref<4x1x256xf32, #tpu.memory_space<vmem>>, vector<1x1x256xf32>
      %41 = vector.shape_cast %40 : vector<1x1x256xf32> to vector<1x256xf32>
      %42 = vector.broadcast %41 : vector<1x256xf32> to vector<8x256xf32>
      %43 = arith.addf %39, %42 : vector<8x256xf32>
      %44 = arith.addf %18, %36 : vector<8x256xf32>
      %45 = arith.addf %44, %43 : vector<8x256xf32>
      %c1_44 = arith.constant 1 : index
      %c0_45 = arith.constant 0 : index
      %c0_46 = arith.constant 0 : index
      %c0_47 = arith.constant 0 : index
      %46 = vector.load %arg5[%c1_44, %c0_45, %c0_46, %c0_47] : memref<4x2x256x256xf32, #tpu.memory_space<vmem>>, vector<1x1x256x256xf32>
      %47 = vector.shape_cast %46 : vector<1x1x256x256xf32> to vector<256x256xf32>
      %cst_48 = arith.constant dense<0.000000e+00> : vector<8x256xf32>
      %48 = tpu.matmul %45, %47, %cst_48 {dimension_numbers = #tpu.dot_dimension_numbers<[1], [0], [0], [1], [0, 0, 1, 1], [], []>} : vector<8x256xf32>, vector<256x256xf32>, vector<8x256xf32> -> vector<8x256xf32>
      %c1_49 = arith.constant 1 : index
      %c0_50 = arith.constant 0 : index
      %c0_51 = arith.constant 0 : index
      %c0_52 = arith.constant 0 : index
      %49 = vector.load %arg6[%c1_49, %c0_50, %c0_51, %c0_52] : memref<4x2x1x256xf32, #tpu.memory_space<vmem>>, vector<1x1x1x256xf32>
      %50 = vector.shape_cast %49 : vector<1x1x1x256xf32> to vector<1x256xf32>
      %51 = vector.broadcast %50 : vector<1x256xf32> to vector<8x256xf32>
      %52 = arith.addf %48, %51 : vector<8x256xf32>
      %cst_53 = arith.constant 0.000000e+00 : f32
      %53 = vector.broadcast %cst_53 : f32 to vector<8x256xf32>
      %54 = arith.maximumf %52, %53 : vector<8x256xf32>
      %c1_54 = arith.constant 1 : index
      %c1_55 = arith.constant 1 : index
      %c0_56 = arith.constant 0 : index
      %c0_57 = arith.constant 0 : index
      %55 = vector.load %arg5[%c1_54, %c1_55, %c0_56, %c0_57] : memref<4x2x256x256xf32, #tpu.memory_space<vmem>>, vector<1x1x256x256xf32>
      %56 = vector.shape_cast %55 : vector<1x1x256x256xf32> to vector<256x256xf32>
      %cst_58 = arith.constant dense<0.000000e+00> : vector<8x256xf32>
      %57 = tpu.matmul %54, %56, %cst_58 {dimension_numbers = #tpu.dot_dimension_numbers<[1], [0], [0], [1], [0, 0, 1, 1], [], []>} : vector<8x256xf32>, vector<256x256xf32>, vector<8x256xf32> -> vector<8x256xf32>
      %c1_59 = arith.constant 1 : index
      %c1_60 = arith.constant 1 : index
      %c0_61 = arith.constant 0 : index
      %c0_62 = arith.constant 0 : index
      %58 = vector.load %arg6[%c1_59, %c1_60, %c0_61, %c0_62] : memref<4x2x1x256xf32, #tpu.memory_space<vmem>>, vector<1x1x1x256xf32>
      %59 = vector.shape_cast %58 : vector<1x1x1x256xf32> to vector<1x256xf32>
      %60 = vector.broadcast %59 : vector<1x256xf32> to vector<8x256xf32>
      %61 = arith.addf %57, %60 : vector<8x256xf32>
      %cst_63 = arith.constant 0.000000e+00 : f32
      %62 = vector.broadcast %cst_63 : f32 to vector<8x256xf32>
      %63 = arith.maximumf %61, %62 : vector<8x256xf32>
      %c1_64 = arith.constant 1 : index
      %c0_65 = arith.constant 0 : index
      %c0_66 = arith.constant 0 : index
      %64 = vector.load %arg7[%c1_64, %c0_65, %c0_66] : memref<4x256x256xf32, #tpu.memory_space<vmem>>, vector<1x256x256xf32>
      %65 = vector.shape_cast %64 : vector<1x256x256xf32> to vector<256x256xf32>
      %cst_67 = arith.constant dense<0.000000e+00> : vector<8x256xf32>
      %66 = tpu.matmul %11, %65, %cst_67 {dimension_numbers = #tpu.dot_dimension_numbers<[1], [0], [0], [1], [0, 0, 1, 1], [], []>} : vector<8x256xf32>, vector<256x256xf32>, vector<8x256xf32> -> vector<8x256xf32>
      %c1_68 = arith.constant 1 : index
      %c0_69 = arith.constant 0 : index
      %c0_70 = arith.constant 0 : index
      %67 = vector.load %arg8[%c1_68, %c0_69, %c0_70] : memref<4x1x256xf32, #tpu.memory_space<vmem>>, vector<1x1x256xf32>
      %68 = vector.shape_cast %67 : vector<1x1x256xf32> to vector<1x256xf32>
      %69 = vector.broadcast %68 : vector<1x256xf32> to vector<8x256xf32>
      %70 = arith.addf %66, %69 : vector<8x256xf32>
      %71 = arith.addf %45, %63 : vector<8x256xf32>
      %72 = arith.addf %71, %70 : vector<8x256xf32>
      %c2 = arith.constant 2 : index
      %c0_71 = arith.constant 0 : index
      %c0_72 = arith.constant 0 : index
      %c0_73 = arith.constant 0 : index
      %73 = vector.load %arg5[%c2, %c0_71, %c0_72, %c0_73] : memref<4x2x256x256xf32, #tpu.memory_space<vmem>>, vector<1x1x256x256xf32>
      %74 = vector.shape_cast %73 : vector<1x1x256x256xf32> to vector<256x256xf32>
      %cst_74 = arith.constant dense<0.000000e+00> : vector<8x256xf32>
      %75 = tpu.matmul %72, %74, %cst_74 {dimension_numbers = #tpu.dot_dimension_numbers<[1], [0], [0], [1], [0, 0, 1, 1], [], []>} : vector<8x256xf32>, vector<256x256xf32>, vector<8x256xf32> -> vector<8x256xf32>
      %c2_75 = arith.constant 2 : index
      %c0_76 = arith.constant 0 : index
      %c0_77 = arith.constant 0 : index
      %c0_78 = arith.constant 0 : index
      %76 = vector.load %arg6[%c2_75, %c0_76, %c0_77, %c0_78] : memref<4x2x1x256xf32, #tpu.memory_space<vmem>>, vector<1x1x1x256xf32>
      %77 = vector.shape_cast %76 : vector<1x1x1x256xf32> to vector<1x256xf32>
      %78 = vector.broadcast %77 : vector<1x256xf32> to vector<8x256xf32>
      %79 = arith.addf %75, %78 : vector<8x256xf32>
      %cst_79 = arith.constant 0.000000e+00 : f32
      %80 = vector.broadcast %cst_79 : f32 to vector<8x256xf32>
      %81 = arith.maximumf %79, %80 : vector<8x256xf32>
      %c2_80 = arith.constant 2 : index
      %c1_81 = arith.constant 1 : index
      %c0_82 = arith.constant 0 : index
      %c0_83 = arith.constant 0 : index
      %82 = vector.load %arg5[%c2_80, %c1_81, %c0_82, %c0_83] : memref<4x2x256x256xf32, #tpu.memory_space<vmem>>, vector<1x1x256x256xf32>
      %83 = vector.shape_cast %82 : vector<1x1x256x256xf32> to vector<256x256xf32>
      %cst_84 = arith.constant dense<0.000000e+00> : vector<8x256xf32>
      %84 = tpu.matmul %81, %83, %cst_84 {dimension_numbers = #tpu.dot_dimension_numbers<[1], [0], [0], [1], [0, 0, 1, 1], [], []>} : vector<8x256xf32>, vector<256x256xf32>, vector<8x256xf32> -> vector<8x256xf32>
      %c2_85 = arith.constant 2 : index
      %c1_86 = arith.constant 1 : index
      %c0_87 = arith.constant 0 : index
      %c0_88 = arith.constant 0 : index
      %85 = vector.load %arg6[%c2_85, %c1_86, %c0_87, %c0_88] : memref<4x2x1x256xf32, #tpu.memory_space<vmem>>, vector<1x1x1x256xf32>
      %86 = vector.shape_cast %85 : vector<1x1x1x256xf32> to vector<1x256xf32>
      %87 = vector.broadcast %86 : vector<1x256xf32> to vector<8x256xf32>
      %88 = arith.addf %84, %87 : vector<8x256xf32>
      %cst_89 = arith.constant 0.000000e+00 : f32
      %89 = vector.broadcast %cst_89 : f32 to vector<8x256xf32>
      %90 = arith.maximumf %88, %89 : vector<8x256xf32>
      %c2_90 = arith.constant 2 : index
      %c0_91 = arith.constant 0 : index
      %c0_92 = arith.constant 0 : index
      %91 = vector.load %arg7[%c2_90, %c0_91, %c0_92] : memref<4x256x256xf32, #tpu.memory_space<vmem>>, vector<1x256x256xf32>
      %92 = vector.shape_cast %91 : vector<1x256x256xf32> to vector<256x256xf32>
      %cst_93 = arith.constant dense<0.000000e+00> : vector<8x256xf32>
      %93 = tpu.matmul %11, %92, %cst_93 {dimension_numbers = #tpu.dot_dimension_numbers<[1], [0], [0], [1], [0, 0, 1, 1], [], []>} : vector<8x256xf32>, vector<256x256xf32>, vector<8x256xf32> -> vector<8x256xf32>
      %c2_94 = arith.constant 2 : index
      %c0_95 = arith.constant 0 : index
      %c0_96 = arith.constant 0 : index
      %94 = vector.load %arg8[%c2_94, %c0_95, %c0_96] : memref<4x1x256xf32, #tpu.memory_space<vmem>>, vector<1x1x256xf32>
      %95 = vector.shape_cast %94 : vector<1x1x256xf32> to vector<1x256xf32>
      %96 = vector.broadcast %95 : vector<1x256xf32> to vector<8x256xf32>
      %97 = arith.addf %93, %96 : vector<8x256xf32>
      %98 = arith.addf %72, %90 : vector<8x256xf32>
      %99 = arith.addf %98, %97 : vector<8x256xf32>
      %c3 = arith.constant 3 : index
      %c0_97 = arith.constant 0 : index
      %c0_98 = arith.constant 0 : index
      %c0_99 = arith.constant 0 : index
      %100 = vector.load %arg5[%c3, %c0_97, %c0_98, %c0_99] : memref<4x2x256x256xf32, #tpu.memory_space<vmem>>, vector<1x1x256x256xf32>
      %101 = vector.shape_cast %100 : vector<1x1x256x256xf32> to vector<256x256xf32>
      %cst_100 = arith.constant dense<0.000000e+00> : vector<8x256xf32>
      %102 = tpu.matmul %99, %101, %cst_100 {dimension_numbers = #tpu.dot_dimension_numbers<[1], [0], [0], [1], [0, 0, 1, 1], [], []>} : vector<8x256xf32>, vector<256x256xf32>, vector<8x256xf32> -> vector<8x256xf32>
      %c3_101 = arith.constant 3 : index
      %c0_102 = arith.constant 0 : index
      %c0_103 = arith.constant 0 : index
      %c0_104 = arith.constant 0 : index
      %103 = vector.load %arg6[%c3_101, %c0_102, %c0_103, %c0_104] : memref<4x2x1x256xf32, #tpu.memory_space<vmem>>, vector<1x1x1x256xf32>
      %104 = vector.shape_cast %103 : vector<1x1x1x256xf32> to vector<1x256xf32>
      %105 = vector.broadcast %104 : vector<1x256xf32> to vector<8x256xf32>
      %106 = arith.addf %102, %105 : vector<8x256xf32>
      %cst_105 = arith.constant 0.000000e+00 : f32
      %107 = vector.broadcast %cst_105 : f32 to vector<8x256xf32>
      %108 = arith.maximumf %106, %107 : vector<8x256xf32>
      %c3_106 = arith.constant 3 : index
      %c1_107 = arith.constant 1 : index
      %c0_108 = arith.constant 0 : index
      %c0_109 = arith.constant 0 : index
      %109 = vector.load %arg5[%c3_106, %c1_107, %c0_108, %c0_109] : memref<4x2x256x256xf32, #tpu.memory_space<vmem>>, vector<1x1x256x256xf32>
      %110 = vector.shape_cast %109 : vector<1x1x256x256xf32> to vector<256x256xf32>
      %cst_110 = arith.constant dense<0.000000e+00> : vector<8x256xf32>
      %111 = tpu.matmul %108, %110, %cst_110 {dimension_numbers = #tpu.dot_dimension_numbers<[1], [0], [0], [1], [0, 0, 1, 1], [], []>} : vector<8x256xf32>, vector<256x256xf32>, vector<8x256xf32> -> vector<8x256xf32>
      %c3_111 = arith.constant 3 : index
      %c1_112 = arith.constant 1 : index
      %c0_113 = arith.constant 0 : index
      %c0_114 = arith.constant 0 : index
      %112 = vector.load %arg6[%c3_111, %c1_112, %c0_113, %c0_114] : memref<4x2x1x256xf32, #tpu.memory_space<vmem>>, vector<1x1x1x256xf32>
      %113 = vector.shape_cast %112 : vector<1x1x1x256xf32> to vector<1x256xf32>
      %114 = vector.broadcast %113 : vector<1x256xf32> to vector<8x256xf32>
      %115 = arith.addf %111, %114 : vector<8x256xf32>
      %cst_115 = arith.constant 0.000000e+00 : f32
      %116 = vector.broadcast %cst_115 : f32 to vector<8x256xf32>
      %117 = arith.maximumf %115, %116 : vector<8x256xf32>
      %c3_116 = arith.constant 3 : index
      %c0_117 = arith.constant 0 : index
      %c0_118 = arith.constant 0 : index
      %118 = vector.load %arg7[%c3_116, %c0_117, %c0_118] : memref<4x256x256xf32, #tpu.memory_space<vmem>>, vector<1x256x256xf32>
      %119 = vector.shape_cast %118 : vector<1x256x256xf32> to vector<256x256xf32>
      %cst_119 = arith.constant dense<0.000000e+00> : vector<8x256xf32>
      %120 = tpu.matmul %11, %119, %cst_119 {dimension_numbers = #tpu.dot_dimension_numbers<[1], [0], [0], [1], [0, 0, 1, 1], [], []>} : vector<8x256xf32>, vector<256x256xf32>, vector<8x256xf32> -> vector<8x256xf32>
      %c3_120 = arith.constant 3 : index
      %c0_121 = arith.constant 0 : index
      %c0_122 = arith.constant 0 : index
      %121 = vector.load %arg8[%c3_120, %c0_121, %c0_122] : memref<4x1x256xf32, #tpu.memory_space<vmem>>, vector<1x1x256xf32>
      %122 = vector.shape_cast %121 : vector<1x1x256xf32> to vector<1x256xf32>
      %123 = vector.broadcast %122 : vector<1x256xf32> to vector<8x256xf32>
      %124 = arith.addf %120, %123 : vector<8x256xf32>
      %125 = arith.addf %99, %117 : vector<8x256xf32>
      %126 = arith.addf %125, %124 : vector<8x256xf32>
      %127 = arith.truncf %126 : vector<8x256xf32> to vector<8x256xbf16>
      %c0_123 = arith.constant 0 : index
      %c0_124 = arith.constant 0 : index
      %128 = vector.load %arg12[%c0_123, %c0_124] : memref<8x256xbf16, #tpu.memory_space<vmem>>, vector<8x256xbf16>
      tpu.vector_store %arg12[%c0_123, %c0_124], %127 {strides = array<i32>} : memref<8x256xbf16, #tpu.memory_space<vmem>>, vector<8x256xbf16>,
    } else {
    }
    %c0 = arith.constant 0 : index
    %c0_1 = arith.constant 0 : index
    %3 = vector.load %arg12[%c0, %c0_1] : memref<8x256xbf16, #tpu.memory_space<vmem>>, vector<8x256xbf16>
    %c0_2 = arith.constant 0 : index
    %c0_3 = arith.constant 0 : index
    %4 = vector.load %arg9[%c0_2, %c0_3] : memref<256x2048xbf16, #tpu.memory_space<vmem>>, vector<256x2048xbf16>
    %cst = arith.constant dense<0.000000e+00> : vector<8x2048xf32>
    %5 = tpu.matmul %3, %4, %cst {dimension_numbers = #tpu.dot_dimension_numbers<[1], [0], [0], [1], [0, 0, 1, 1], [], []>} : vector<8x256xbf16>, vector<256x2048xbf16>, vector<8x2048xf32> -> vector<8x2048xf32>
    %c0_4 = arith.constant 0 : index
    %c0_5 = arith.constant 0 : index
    %6 = vector.load %arg10[%c0_4, %c0_5] : memref<1x2048xf32, #tpu.memory_space<vmem>>, vector<1x2048xf32>
    %7 = vector.broadcast %6 : vector<1x2048xf32> to vector<8x2048xf32>
    %8 = arith.addf %5, %7 : vector<8x2048xf32>
    %c0_6 = arith.constant 0 : index
    %c0_7 = arith.constant 0 : index
    %9 = vector.load %arg11[%c0_6, %c0_7] : memref<8x2048xf32, #tpu.memory_space<vmem>>, vector<8x2048xf32>
    tpu.vector_store %arg11[%c0_6, %c0_7], %8 {strides = array<i32>} : memref<8x2048xf32, #tpu.memory_space<vmem>>, vector<8x2048xf32>,
    return
  }
  func.func @transform_0(%arg0: i32) -> (i32, i32) {
    %c0_i32 = arith.constant 0 : i32
    %c0_i32_0 = arith.constant 0 : i32
    %c0_i32_1 = arith.constant 0 : i32
    return %c0_i32, %c0_i32_0 : i32, i32
  }
  func.func @transform_1(%arg0: i32) -> (i32, i32) {
    %c0_i32 = arith.constant 0 : i32
    %c0_i32_0 = arith.constant 0 : i32
    %c0_i32_1 = arith.constant 0 : i32
    return %c0_i32, %c0_i32_0 : i32, i32
  }
  func.func @transform_2(%arg0: i32) -> (i32, i32) {
    %c0_i32 = arith.constant 0 : i32
    %c0_i32_0 = arith.constant 0 : i32
    %c0_i32_1 = arith.constant 0 : i32
    return %c0_i32, %c0_i32_0 : i32, i32
  }
  func.func @transform_3(%arg0: i32) -> (i32, i32) {
    %c0_i32 = arith.constant 0 : i32
    %c0_i32_0 = arith.constant 0 : i32
    %c0_i32_1 = arith.constant 0 : i32
    return %c0_i32, %c0_i32_0 : i32, i32
  }
  func.func @transform_4(%arg0: i32) -> (i32, i32, i32, i32) {
    %c0_i32 = arith.constant 0 : i32
    %c0_i32_0 = arith.constant 0 : i32
    %c0_i32_1 = arith.constant 0 : i32
    %c0_i32_2 = arith.constant 0 : i32
    %c0_i32_3 = arith.constant 0 : i32
    return %c0_i32, %c0_i32_0, %c0_i32_1, %c0_i32_2 : i32, i32, i32, i32
  }
  func.func @transform_5(%arg0: i32) -> (i32, i32, i32, i32) {
    %c0_i32 = arith.constant 0 : i32
    %c0_i32_0 = arith.constant 0 : i32
    %c0_i32_1 = arith.constant 0 : i32
    %c0_i32_2 = arith.constant 0 : i32
    %c0_i32_3 = arith.constant 0 : i32
    return %c0_i32, %c0_i32_0, %c0_i32_1, %c0_i32_2 : i32, i32, i32, i32
  }
  func.func @transform_6(%arg0: i32) -> (i32, i32, i32) {
    %c0_i32 = arith.constant 0 : i32
    %c0_i32_0 = arith.constant 0 : i32
    %c0_i32_1 = arith.constant 0 : i32
    %c0_i32_2 = arith.constant 0 : i32
    return %c0_i32, %c0_i32_0, %c0_i32_1 : i32, i32, i32
  }
  func.func @transform_7(%arg0: i32) -> (i32, i32, i32) {
    %c0_i32 = arith.constant 0 : i32
    %c0_i32_0 = arith.constant 0 : i32
    %c0_i32_1 = arith.constant 0 : i32
    %c0_i32_2 = arith.constant 0 : i32
    return %c0_i32, %c0_i32_0, %c0_i32_1 : i32, i32, i32
  }
  func.func @transform_8(%arg0: i32) -> (i32, i32) {
    %c0_i32 = arith.constant 0 : i32
    %c0_i32_0 = arith.constant 0 : i32
    return %c0_i32, %arg0 : i32, i32
  }
  func.func @transform_9(%arg0: i32) -> (i32, i32) {
    %c0_i32 = arith.constant 0 : i32
    %c0_i32_0 = arith.constant 0 : i32
    return %c0_i32, %arg0 : i32, i32
  }
  func.func @transform_10(%arg0: i32) -> (i32, i32) {
    %c0_i32 = arith.constant 0 : i32
    %c0_i32_0 = arith.constant 0 : i32
    return %c0_i32, %arg0 : i32, i32
  }
}

</mosaic_0001>

<bundles_post_ra>
// kernel: _context_sinr_padded.1
= control target key start
LH: loop header
LB: loop body
LE: loop exit
PB: predicated region body
PF: predicated region fallthrough
CT: control target
= control target key end

     0   :  { %s6002_s0 = inlined_call_operand.vmem [shape: f32[8,4], index: 0, kind: input, shape index: {}]   ;;  %s6003_s1 = inlined_call_operand.hbm [shape: f32[8,256], index: 1, kind: input, shape index: {}]   ;;  %s6004_s2 = inlined_call_operand.hbm [shape: f32[4,256], index: 2, kind: input, shape index: {}]   ;;  %s6005_s3 = inlined_call_operand.hbm [shape: f32[1,256], index: 3, kind: input, shape index: {}]   ;;  %s6006_s4 = inlined_call_operand.hbm [shape: f32[4,2,256,256], index: 4, kind: input, shape index: {}]   ;;  %s6007_s5 = inlined_call_operand.hbm [shape: f32[4,2,1,256], index: 5, kind: input, shape index: {}]   ;;  %s6008_s6 = inlined_call_operand.hbm [shape: f32[4,256,256], index: 6, kind: input, shape index: {}]   ;;  %s6009_s7 = inlined_call_operand.hbm [shape: f32[4,1,256], index: 7, kind: input, shape index: {}]   ;;  %s6010_s8 = inlined_call_operand.hbm [shape: bf16[256,10240], index: 8, kind: input, shape index: {}]   ;;  %s6011_s9 = inlined_call_operand.hbm [shape: f32[1,10240], index: 9, kind: input, shape index: {}]   ;;  %s6012_s10 = inlined_call_operand.vmem [shape: f32[8,10240], index: 10, kind: output, shape index: {}]  }
   0x1   :  { %6022 = sst [smem:[#allocation22_spill]] %s6003_s1 }
   0x2   :  { %6023 = sst [smem:[#allocation23_spill]] %s6004_s2 }
   0x3   :  { %6024 = sst [smem:[#allocation24_spill]] %s6006_s4 }
   0x4   :  { %6025 = sst [smem:[#allocation25_spill]] %s6008_s6 }
   0x5   :  { %6026 = sst [smem:[#allocation26_spill]] %s6010_s8 }
   0x6   :  { %15 = vsyncpa [#allocation4], 0 }
   0x7   :  { %16 = vsyncpa [#allocation6], 0 }
   0x8   :  { %17 = vsyncpa [#allocation9], 0 }
   0x9   :  { %18 = vsyncpa [#allocation12], 0 }
   0xa   :  { %19 = vsyncpa [#allocation15], 0 }
   0xb   :  { %21 = vsyncpa [#allocation15 + $0x1], 0  ;;  %s5358_s13 = smov 0   ;;  %s5360_s14 = smov 0  }
   0xc   :  { %s5362_s15 = smov 0   ;;  %s5364_s16 = smov 0  }
   0xd LB: > { %s5286_s17 = smov [#allocation5]   ;;  %s5379_s19 = sadd.s32 4294967295, %s5284_s16   ;;  %s5284_s16 = sphi %s5364_s16, %s6056_s16   ;;  %s5280_s15 = sphi %s5362_s15, %s6055_s15   ;;  %s5276_s14 = sphi %s5360_s14, %s6054_s14   ;;  %s5272_s13 = sphi %s5358_s13, %s6053_s13  }
   0xe   : > { %s305_s18 = sshll.u32 %s5286_s17, 4  ;;  %p4573_p0 = scmp.ge.s32.totalorder %s5284_s16, 1  ;;  %s306_s18 = int_to_ptr.vmem [resolvable:$true] %s305_s18 }
   0xf   : > { %p6014_p1 = scmp.eq.s32.totalorder %s5379_s19, 0  ;;  %p278_p2 = scmp.lt.s32.totalorder %s5284_s16, 6 }
  0x10   : > { %s5287_s21 = smov [#allocation8]   ;;  %s5288_s24 = smov [#allocation11]  }
  0x11   : > { %p5385_p4 = pnand %p4573_p0, %p278_p2  ;;  %s326_s22 = sshll.u32 %s5287_s21, 4  ;;  %s5391_s22 = int_to_ptr.vmem [resolvable:$true] %s326_s22 }
  0x12   : > { %s352_s25 = sshll.u32 %s5288_s24, 4  ;;  %s5007_s27 = scalar_lea.vmem %s306_s18, 128  ;;  %s5399_s25 = int_to_ptr.vmem [resolvable:$true] %s352_s25 }
  0x13   : > { %s6027_s20 = scalar_select %p5385_p4, 1, 0 }
  0x14   : > { %p4900_p5 = pneg %p5385_p4  ;;  %p5008_p8 = scmp.ne.s32.totalorder %s306_s18, %s5007_s27 }
  0x15   : > { %p5015_p11 = scmp.lt.s32.totalorder %s306_s18, %s306_s18  ;;  %p5016_p12 = scmp.lt.s32.totalorder %s5007_s27, %s5007_s27 }
  0x16   : > { %p5395_p6 = pnand %p4900_p5, %p6014_p1 }
  0x17   : > { %p5017_p13 = por %p5016_p12, %p5015_p11 }
  0x18   : > { %s6028_s23 = scalar_select %p5395_p6, 1, 0 }
  0x19   : > { %p5403_p7 = pneg %p5395_p6 }
  0x1b   : > { %p5010_p9 = pnand %p5008_p8, %p5403_p7 }
  0x1d   : > { %p5011_p10 = pneg %p5010_p9 }
  0x1f   : > { %p5018_p0 = pnand %p5017_p13, %p5011_p10 }
  0x21   : > { %5021 = shalt.err (!%p5018_p0)
}
  0x22   : > { %s6030_s2 = sld [smem:[#allocation23_spill]]  ;;  %s5033_s30 = scalar_lea.vmem %s5391_s22, 65536 }
  0x23   : > { %p5034_p2 = scmp.ne.s32.totalorder %s5391_s22, %s5033_s30  ;;  %p5041_p9 = scmp.lt.s32.totalorder %s5391_s22, %s5391_s22 }
  0x24   : > { %p5042_p11 = scmp.lt.s32.totalorder %s5033_s30, %s5033_s30 }
  0x25   : > { %p5036_p5 = pnand %p5034_p2, %p5403_p7 }
  0x26   : > { %p5043_p10 = por %p5042_p11, %p5041_p9 }
  0x27   : > { %p5037_p8 = pneg %p5036_p5 }
  0x28   : > { %4906 = dma.hbm_to_vmem [thread:$0]  (!%p5395_p6), %s6030_s2, 128, %s306_s18, [#allocation6]  }
  0x29   : > { %p5044_p12 = pnand %p5043_p10, %p5037_p8 }
  0x2b   : > { %5047 = shalt.err (!%p5044_p12)
}
  0x2c   : > { %s5289_s11 = smov 256   ;;  %s5290_s12 = smov 16  }
  0x2d   : > { %s6031_s4 = sld [smem:[#allocation24_spill]]  ;;  %s5059_s21 = scalar_lea.vmem %s5399_s25, 32768 }
  0x2e   : > { %p5060_p13 = scmp.ne.s32.totalorder %s5399_s25, %s5059_s21  ;;  %p5067_p5 = scmp.lt.s32.totalorder %s5399_s25, %s5399_s25 }
  0x2f   : > { %p5068_p8 = scmp.lt.s32.totalorder %s5059_s21, %s5059_s21 }
  0x30   : > { %p5062_p0 = pnand %p5060_p13, %p5403_p7 }
  0x31   : > { %p5069_p9 = por %p5068_p8, %p5067_p5 }
  0x32   : > { %p5063_p2 = pneg %p5062_p0 }
  0x33   : > { %4912 = dma.hbm_to_vmem [thread:$0]  (!%p5395_p6), %s6031_s4, 65536, %s5391_s22, [#allocation9], %s5289_s11, %s5289_s11, %s5290_s12  }
  0x34   : > { %p5070_p11 = pnand %p5069_p9, %p5063_p2 }
  0x36   : > { %5073 = shalt.err (!%p5070_p11)
}
  0x37   : > { %s6032_s6 = sld [smem:[#allocation25_spill]]  ;;  %s5439_s22 = sadd.s32 1, %s5284_s16  }
  0x38   : > { %s199_s28 = ssub.s32 %s5284_s16, %s5439_s22  ;;  %s202_s29 = sadd.s32 1, %s5280_s15 }
  0x39   : > { %p200_p10 = scmp.eq.s32.totalorder %s199_s28, 0  ;;  %p209_p12 = scmp.ne.s32.totalorder %s5280_s15, %s5276_s14 }
  0x3a   : > { %p210_p13 = scmp.eq.s32.totalorder %s5284_s16, 0  ;;  %p215_p0 = scmp.ne.s32.totalorder %s5276_s14, %s5272_s13 }
  0x3b   : > { %s5450_s30 = scalar_select %p200_p10, %s5280_s15, %s202_s29  }
  0x3c   : > { %p211_p2 = por %p210_p13, %p209_p12  ;;  %p5454_p5 = por %p6014_p1, %p215_p0 }
  0x3d   : > { %4918 = dma.hbm_to_vmem [thread:$0]  (!%p5395_p6), %s6032_s6, 32768, %s5399_s25, [#allocation12], %s5289_s11, %s5289_s11, %s5290_s12  }
  0x3e   : > { %s6033_s17 = scalar_select %p5454_p5, 1, 0 }
  0x3f   : > { %p4936_p8 = scmp.lt.s32.totalorder %s5284_s16, 5  ;;  %s379_s18 = sand.u32 1, %s5284_s16  }
  0x40   : > { %s6013_s25 = sand.u32 1, %s5280_s15   ;;  %s4865_s12 = sshll.u32 %s5284_s16, 10 }
  0x41   : > { %s4582_s11 = sshll.u32 %s6013_s25, 11  ;;  %s6034_s8 = sld [smem:[#allocation26_spill]] }
  0x42   : > { %s383_s13 = scalar_lea.vmem [#allocation14], %s4582_s11  ;;  %p5469_p9 = pnand %p4936_p8, %p211_p2 }
  0x43   : > { %s390_s28 = sshll.u32 %s383_s13, 4  ;;  %s5475_s25 = scalar_lea.sflag [#allocation15], %s379_s18  ;;  %s5473_s28 = int_to_ptr.vmem [resolvable:$true] %s390_s28 }
  0x44   : > { %s6035_s29 = scalar_select %p5469_p9, 1, 0 }
  0x45   : > { %p6019_p10 = pneg %p5469_p9 }
  0x47   : > { %s5467_s27 = scalar_lea.hbm %s6034_s8, %s4865_s12  ;;  %s5079_s21 = scalar_lea.hbm %s6034_s8, 163840 }
  0x48   : > { %s5074_s2 = scalar_lea.hbm %s5467_s27, 32768  ;;  %p5080_p0 = scmp.lt.s32.totalorder %s5467_s27, %s6034_s8 }
  0x49   : > { %p5075_p11 = scmp.ne.s32.totalorder %s5467_s27, %s5074_s2  ;;  %p5081_p2 = scmp.lt.s32.totalorder %s5079_s21, %s5074_s2 }
  0x4b   : > { %p5077_p12 = pnand %p6019_p10, %p5075_p11  ;;  %p5082_p8 = por %p5081_p2, %p5080_p0 }
  0x4d   : > { %p5078_p13 = pneg %p5077_p12 }
  0x4f   : > { %p5083_p3 = pnand %p5082_p8, %p5078_p13 }
  0x51   : > { %5086 = shalt.err (!%p5083_p3)
}
  0x52   : > { %s5087_s18 = scalar_lea.vmem %s5473_s28, 32768  ;;  %s5291_s11 = smov [#allocation14]  }
  0x53   : > { %p5088_p1 = scmp.ne.s32.totalorder %s5473_s28, %s5087_s18  ;;  %s5092_s12 = sshll.u32 %s5291_s11, 4  ;;  %s5093_s12 = int_to_ptr.vmem [resolvable:$false] %s5092_s12 }
  0x54   : > { %s5094_s4 = scalar_lea.vmem %s5093_s12, 65536  ;;  %p5095_p5 = scmp.lt.s32.totalorder %s5473_s28, %s5093_s12 }
  0x55   : > { %p5090_p11 = pnand %p5088_p1, %p6019_p10  ;;  %p5096_p4 = scmp.lt.s32.totalorder %s5094_s4, %s5087_s18 }
  0x57   : > { %p5091_p12 = pneg %p5090_p11  ;;  %p5097_p6 = por %p5096_p4, %p5095_p5 }
  0x59   : > { %p5098_p0 = pnand %p5097_p6, %p5091_p12 }
  0x5b   : > { %5101 = shalt.err (!%p5098_p0)
}
  0x5c   : > { %s5292_s2 = smov 5120   ;;  %s5293_s21 = smov 1024  }
  0x5d   : > { %s5294_s24 = smov 64   ;;  %s5295_s13 = smov [#allocation3]  }
  0x5e   : > { %4925 = dma.hbm_to_vmem [thread:$0]  (!%p5469_p9), %s5467_s27, 32768, %s5473_s28, %s5475_s25, %s5292_s2, %s5293_s21, %s5294_s24  }
  0x5f   : > { %s294_s6 = sshll.u32 %s5295_s13, 4  ;;  %s5296_s11 = smov [#allocation7]   ;;  %s295_s6 = int_to_ptr.vmem [resolvable:$true] %s294_s6 }
  0x60   : > { %s316_s8 = sshll.u32 %s5296_s11, 4  ;;  %s5113_s12 = scalar_lea.vmem %s295_s6, 256  ;;  %s317_s8 = int_to_ptr.vmem [resolvable:$true] %s316_s8 }
  0x61   : > { %p5114_p1 = scmp.ne.s32.totalorder %s295_s6, %s5113_s12  ;;  %p5121_p6 = scmp.lt.s32.totalorder %s295_s6, %s295_s6 }
  0x62   : > { %p5122_p5 = scmp.lt.s32.totalorder %s5113_s12, %s5113_s12 }
  0x63   : > { %p5116_p3 = pnand %p5114_p1, %p5403_p7 }
  0x64   : > { %p5123_p13 = por %p5122_p5, %p5121_p6 }
  0x65   : > { %p5117_p4 = pneg %p5116_p3 }
  0x67   : > { %p5124_p2 = pnand %p5123_p13, %p5117_p4 }
  0x69   : > { %5127 = shalt.err (!%p5124_p2)
}
  0x6a   : > { %p6036_p8 = scmp.ne.s32.totalorder %s6028_s23, 0  ;;  %s6037_s1 = sld [smem:[#allocation22_spill]] }
  0x6b   : > { %s5139_s27 = scalar_lea.vmem %s317_s8, 32  ;;  %p5147_p1 = scmp.lt.s32.totalorder %s317_s8, %s317_s8 }
  0x6c   : > { %p5140_p11 = scmp.ne.s32.totalorder %s317_s8, %s5139_s27  ;;  %p5148_p3 = scmp.lt.s32.totalorder %s5139_s27, %s5139_s27 }
  0x6e   : > { %p5142_p12 = pnand %p5140_p11, %p5403_p7  ;;  %p5149_p10 = por %p5148_p3, %p5147_p1 }
  0x70   : > { %4903 = dma.hbm_to_vmem [thread:$0]  (!%p6036_p8), %s6037_s1, 256, %s295_s6, [#allocation4]  }
  0x71   : > { %p5143_p0 = pneg %p5142_p12 }
  0x73   : > { %p5150_p9 = pnand %p5149_p10, %p5143_p0 }
  0x75   : > { %5153 = shalt.err (!%p5150_p9)
}
  0x76   : > { %4909 = dma.hbm_to_vmem [thread:$0]  (!%p6036_p8), %s6005_s3, 32, %s317_s8, [#allocation6]  }
  0x77   : > { %s5297_s21 = smov [#allocation10]  }
  0x78   : > { %s339_s6 = sshll.u32 %s5297_s21, 4  ;;  %s340_s6 = int_to_ptr.vmem [resolvable:$true] %s339_s6 }
  0x79   : > { %s5165_s24 = scalar_lea.vmem %s340_s6, 256  ;;  %p5173_p13 = scmp.lt.s32.totalorder %s340_s6, %s340_s6 }
  0x7a   : > { %p5166_p4 = scmp.ne.s32.totalorder %s340_s6, %s5165_s24  ;;  %p5174_p2 = scmp.lt.s32.totalorder %s5165_s24, %s5165_s24 }
  0x7c   : > { %p5168_p6 = pnand %p5166_p4, %p5403_p7  ;;  %p5175_p11 = por %p5174_p2, %p5173_p13 }
  0x7e   : > { %p5169_p5 = pneg %p5168_p6 }
  0x80   : > { %p5176_p10 = pnand %p5175_p11, %p5169_p5 }
  0x82   : > { %5179 = shalt.err (!%p5176_p10)
}
  0x83   : > { %s5298_s13 = smov 32   ;;  %s5299_s11 = smov 2  }
  0x84   : > { %4915 = dma.hbm_to_vmem [thread:$0]  (!%p6036_p8), %s6007_s5, 256, %s340_s6, [#allocation9], %s5298_s13, %s5298_s13, %s5299_s11  }
  0x85   : > { %s6038_s4 = sand.u32 1, %s5280_s15   ;;  %s5300_s27 = smov [#allocation13]  }
  0x86   : > { %s4585_s18 = sshll.u32 %s6038_s4, 4  ;;  %s365_s28 = sshll.u32 %s5300_s27, 4  ;;  %s366_s28 = int_to_ptr.vmem [resolvable:$true] %s365_s28 }
  0x87   : > { %s4866_s2 = sshll.u32 %s5284_s16, 8  ;;  %s5191_s21 = scalar_lea.vmem %s366_s28, 128 }
  0x88   : > { %p5192_p9 = scmp.ne.s32.totalorder %s366_s28, %s5191_s21  ;;  %p5199_p1 = scmp.lt.s32.totalorder %s366_s28, %s366_s28 }
  0x89   : > { %p5200_p3 = scmp.lt.s32.totalorder %s5191_s21, %s5191_s21 }
  0x8a   : > { %p5194_p12 = pnand %p5192_p9, %p5403_p7 }
  0x8b   : > { %p5201_p4 = por %p5200_p3, %p5199_p1 }
  0x8c   : > { %p5195_p0 = pneg %p5194_p12 }
  0x8e   : > { %p5202_p6 = pnand %p5201_p4, %p5195_p0 }
  0x90   : > { %5205 = shalt.err (!%p5202_p6)
}
  0x91   : > { %4921 = dma.hbm_to_vmem [thread:$0]  (!%p6036_p8), %s6009_s7, 128, %s366_s28, [#allocation12], %s5298_s13, %s5298_s13, %s5299_s11  }
  0x92   : > { %s410_s16 = scalar_lea.hbm %s6011_s9, %s4866_s2  ;;  %s404_s4 = scalar_lea.vmem [#allocation16], %s4585_s18 }
  0x93   : > { %s412_s26 = sshll.u32 %s404_s4, 4  ;;  %s5206_s27 = scalar_lea.hbm %s410_s16, 256  ;;  %s413_s26 = int_to_ptr.vmem [resolvable:$true] %s412_s26 }
  0x94   : > { %p5207_p7 = scmp.ne.s32.totalorder %s410_s16, %s5206_s27  ;;  %p6039_p5 = scmp.ne.s32.totalorder %s6035_s29, 0 }
  0x95   : > { %s5211_s1 = scalar_lea.hbm %s6011_s9, 1280  ;;  %p5212_p8 = scmp.lt.s32.totalorder %s410_s16, %s6011_s9 }
  0x96   : > { %p6040_p13 = pneg %p6039_p5  ;;  %p5213_p10 = scmp.lt.s32.totalorder %s5211_s1, %s5206_s27 }
  0x98   : > { %p5209_p2 = pnand %p5207_p7, %p6040_p13  ;;  %p5214_p9 = por %p5213_p10, %p5212_p8 }
  0x9a   : > { %p5210_p11 = pneg %p5209_p2 }
  0x9c   : > { %p5215_p12 = pnand %p5214_p9, %p5210_p11 }
  0x9e   : > { %5218 = shalt.err (!%p5215_p12)
}
  0x9f   : > { %s5219_s13 = scalar_lea.vmem %s413_s26, 256  ;;  %p6041_p1 = pmov %p6040_p13 }
  0xa0   : > { %p5220_p0 = scmp.ne.s32.totalorder %s413_s26, %s5219_s13  ;;  %s5301_s11 = smov [#allocation16]  }
  0xa1   : > { %s5224_s18 = sshll.u32 %s5301_s11, 4  ;;  %s5225_s18 = int_to_ptr.vmem [resolvable:$false] %s5224_s18 }
  0xa2   : > { %p5222_p3 = pnand %p5220_p0, %p6041_p1  ;;  %s5226_s28 = scalar_lea.vmem %s5225_s18, 512 }
  0xa3   : > { %p5227_p6 = scmp.lt.s32.totalorder %s413_s26, %s5225_s18  ;;  %p5228_p7 = scmp.lt.s32.totalorder %s5226_s28, %s5219_s13 }
  0xa4   : > { %p5223_p4 = pneg %p5222_p3 }
  0xa5   : > { %p5229_p13 = por %p5228_p7, %p5227_p6 }
  0xa7   : > { %p5230_p2 = pnand %p5229_p13, %p5223_p4 }
  0xa9   : > { %5233 = shalt.err (!%p5230_p2)
}
  0xaa   : > { %4928 = dma.hbm_to_vmem [thread:$0]  (!%p6039_p5), %s410_s16, 256, %s413_s26, %s5475_s25  }
  0xab   : > { %p6042_p11 = scmp.ne.s32.totalorder %s6027_s20, 0 }
  0xac   : > { %p6043_p8 = scmp.eq.s32.totalorder (!%p6042_p11), %s5379_s19, 0 }
  0xad   : > { %421 = sbr.rel (%p6042_p11) target bundleno = 2484 (0x9b4), region = 60 }
  0xb2   : > { %5251 = dma.done.wait (%p6043_p8), [#allocation4], 256   ;;  %p6044_p10 = pmov %p6043_p8 }
  0xb3   : > { %p6045_p9 = pmov %p6043_p8 }
  0xb4   : > { %5253 = vsyncadd (%p6044_p10), [#allocation4], 4294967040 }
  0xb5   : > { %5255 = dma.done.wait (%p6045_p9), [#allocation6], 160   ;;  %p6046_p12 = pmov %p6043_p8 }
  0xb6   : > { %p6047_p0 = pmov %p6043_p8 }
  0xb7   : > { %5257 = vsyncadd (%p6046_p12), [#allocation6], 4294967136 }
  0xb8   : > { %5259 = dma.done.wait (%p6047_p0), [#allocation9], 65792   ;;  %p6048_p5 = pmov %p6047_p0 }
  0xb9   : > { %p6049_p1 = pmov %p6047_p0 }
  0xba   : > { %5261 = vsyncadd (%p6048_p5), [#allocation9], 4294901504 }
  0xbb   : > { %5263 = dma.done.wait (%p6049_p1), [#allocation12], 32896   ;;  %p6050_p3 = pmov %p6047_p0 }
  0xbc   : > { %s451_s1 = sand.u32 1, %s5379_s19   ;;  %s453_s20 = sand.u32 1, %s5276_s14  }
  0xbd   : > { %5265 = vsyncadd (%p6050_p3), [#allocation12], 4294934400  ;;  %s4596_s25 = sshll.u32 %s453_s20, 11  ;;  %s452_s29 = scalar_lea.sflag [#allocation15], %s451_s1 }
  0xbe   : > { %s5571_s2 = scalar_lea.vmem [#allocation14], %s4596_s25  ;;  %p6051_p4 = scmp.ne.s32.totalorder %s6033_s17, 0 }
  0xc0   : > { %5267 = dma.done.wait (%p6051_p4), %s452_s29, 33024  }
  0xc1   : > { %5269 = vsyncadd (%p6051_p4), %s452_s29, 4294934272  ;;  %s5577_s8 = sshll.u32 %s453_s20, 4  ;;  %s4598_s12 = sshll.u32 %s5379_s19, 4 }
  0xc2   : > { %p509_p6 = scmp.lt.s32.totalorder %s4598_s12, 79  ;;  %s464_s21 = scalar_lea.vmem [#allocation16], %s5577_s8 }
  0xc3   : > { %p6052_p7 = scmp.ne.s32.totalorder %s5379_s19, 0 }
  0xc4   : > { %s6058_s12 = smov (!%p509_p6, %s4598_s12), 79 }
  0xc5   : > { %s4599_s16 = sshll.u32 %s6058_s12, 3  ;;  %517 = sbr.rel (%p6052_p7) target bundleno = 2025 (0x7e9), region = 100 }
  0xc6   : > { %s5583_s27 = scalar_lea.vmem %s6012_s10, %s4599_s16 }
  0xca   : > { %v521_v0 = vld [vmem:[#allocation5] sm:$0xff]  ;;  %vm540_vm0 = vcmask 1043456   ;;  %v5302_v3 = vmov 0.0   ;;  %v647_v5 = vld [vmem:[#allocation8 + $0xe8] sm:$0xff]  ;;  %v646_v6 = vld [vmem:[#allocation8 + $0xe0] sm:$0xff]  ;;  %vm536_vm1 = vcmask 31744  }
  0xcb   : > { %v649_v1 = vld [vmem:[#allocation8 + $0xf8] sm:$0xff]  ;;  %v535_v2 = vcombine.high %v521_v0, %v521_v0  ;;  %609 = vmatprep.mubr.f32.mxu0 %v5302_v3  ;;  %v648_v4 = vld [vmem:[#allocation8 + $0xf0] sm:$0xff]  ;;  %v643_v10 = vld [vmem:[#allocation8 + $0xc8] sm:$0xff] }
  0xcc   : > { %694 = vmatprep.subr.mxu1 %v649_v1  ;;  %v518_v7 = vld [vmem:[%s6002_s0] sm:$0xff]  ;;  %v644_v9 = vld [vmem:[#allocation8 + $0xd0] sm:$0xff]  ;;  %v639_v14 = vld [vmem:[#allocation8 + $0xa8] sm:$0xff] }
  0xcd   : > { %695 = vmatpush1.msra.mxu1 %v648_v4  ;;  %v645_v8 = vld [vmem:[#allocation8 + $0xd8] sm:$0xff]  ;;  %4601 = vmatprep.subr.msk.mxu0 %vm540_vm0, %v535_v2  ;;  %v642_v11 = vld [vmem:[#allocation8 + $0xc0] sm:$0xff]  ;;  %v640_v13 = vld [vmem:[#allocation8 + $0xb0] sm:$0xff] }
  0xce   : > { %696 = vmatprep.subr.mxu1 %v647_v5  ;;  %4602 = vmatpush1.msk.msra.mxu0 %vm540_vm0, %v521_v0  ;;  %v641_v12 = vld [vmem:[#allocation8 + $0xb8] sm:$0xff]  ;;  %v638_v15 = vld [vmem:[#allocation8 + $0xa0] sm:$0xff]  ;;  %v636_v17 = vld [vmem:[#allocation8 + $0x90] sm:$0xff] }
  0xcf   : > { %697 = vmatpush1.msra.mxu1 %v646_v6  ;;  %4603 = vmatmul.mubr.msk.f32.vlgmr.msra.gmra.mxu0 %vm536_vm1, %v518_v7  ;;  %v637_v16 = vld [vmem:[#allocation8 + $0x98] sm:$0xff]  ;;  %v635_v18 = vld [vmem:[#allocation8 + $0x88] sm:$0xff]  ;;  %v634_v19 = vld [vmem:[#allocation8 + $0x80] sm:$0xff] }
  0xd0   : > { %698 = vmatprep.subr.mxu1 %v645_v8  ;;  %v633_v20 = vld [vmem:[#allocation8 + $0x78] sm:$0xff]  ;;  %v632_v21 = vld [vmem:[#allocation8 + $0x70] sm:$0xff]  ;;  %v631_v22 = vld [vmem:[#allocation8 + $0x68] sm:$0xff] }
  0xd1   : > { %699 = vmatpush1.msra.mxu1 %v644_v9  ;;  %v630_v23 = vld [vmem:[#allocation8 + $0x60] sm:$0xff]  ;;  %v629_v24 = vld [vmem:[#allocation8 + $0x58] sm:$0xff]  ;;  %v628_v25 = vld [vmem:[#allocation8 + $0x50] sm:$0xff] }
  0xd2   : > { %700 = vmatprep.subr.mxu1 %v643_v10  ;;  %v627_v26 = vld [vmem:[#allocation8 + $0x48] sm:$0xff]  ;;  %v626_v27 = vld [vmem:[#allocation8 + $0x40] sm:$0xff]  ;;  %v625_v28 = vld [vmem:[#allocation8 + $0x38] sm:$0xff] }
  0xd3   : > { %701 = vmatpush1.msra.mxu1 %v642_v11  ;;  %v624_v29 = vld [vmem:[#allocation8 + $0x30] sm:$0xff]  ;;  %v623_v30 = vld [vmem:[#allocation8 + $0x28] sm:$0xff]  ;;  %v622_v31 = vld [vmem:[#allocation8 + $0x20] sm:$0xff] }
  0xd4   : > { %702 = vmatprep.subr.mxu1 %v641_v12  ;;  %v621_v32 = vld [vmem:[#allocation8 + $0x18] sm:$0xff]  ;;  %v620_v33 = vld [vmem:[#allocation8 + $0x10] sm:$0xff]  ;;  %v619_v34 = vld [vmem:[#allocation8 + $0x8] sm:$0xff] }
  0xd5   : > { %703 = vmatpush1.msra.mxu1 %v640_v13  ;;  %v618_v35 = vld [vmem:[#allocation8] sm:$0xff]  ;;  %v681_v36 = vld [vmem:[#allocation8 + $0x1f8] sm:$0xff]  ;;  %v680_v37 = vld [vmem:[#allocation8 + $0x1f0] sm:$0xff] }
  0xd6   : > { %704 = vmatprep.subr.mxu1 %v639_v14  ;;  %v679_v38 = vld [vmem:[#allocation8 + $0x1e8] sm:$0xff]  ;;  %v678_v39 = vld [vmem:[#allocation8 + $0x1e0] sm:$0xff]  ;;  %v677_v40 = vld [vmem:[#allocation8 + $0x1d8] sm:$0xff] }
  0xd7   : > { %705 = vmatpush1.msra.mxu1 %v638_v15  ;;  %v676_v41 = vld [vmem:[#allocation8 + $0x1d0] sm:$0xff]  ;;  %v675_v42 = vld [vmem:[#allocation8 + $0x1c8] sm:$0xff]  ;;  %v674_v43 = vld [vmem:[#allocation8 + $0x1c0] sm:$0xff] }
  0xd8   : > { %706 = vmatprep.subr.mxu1 %v637_v16  ;;  %v673_v44 = vld [vmem:[#allocation8 + $0x1b8] sm:$0xff]  ;;  %v672_v45 = vld [vmem:[#allocation8 + $0x1b0] sm:$0xff]  ;;  %v671_v46 = vld [vmem:[#allocation8 + $0x1a8] sm:$0xff] }
  0xd9   : > { %707 = vmatpush1.msra.mxu1 %v636_v17  ;;  %v670_v47 = vld [vmem:[#allocation8 + $0x1a0] sm:$0xff]  ;;  %v669_v48 = vld [vmem:[#allocation8 + $0x198] sm:$0xff]  ;;  %v668_v49 = vld [vmem:[#allocation8 + $0x190] sm:$0xff] }
  0xda   : > { %708 = vmatprep.subr.mxu1 %v635_v18  ;;  %v667_v50 = vld [vmem:[#allocation8 + $0x188] sm:$0xff]  ;;  %v666_v51 = vld [vmem:[#allocation8 + $0x180] sm:$0xff]  ;;  %v665_v52 = vld [vmem:[#allocation8 + $0x178] sm:$0xff] }
  0xdb   : > { %709 = vmatpush1.msra.mxu1 %v634_v19  ;;  %v664_v53 = vld [vmem:[#allocation8 + $0x170] sm:$0xff]  ;;  %v663_v54 = vld [vmem:[#allocation8 + $0x168] sm:$0xff]  ;;  %v662_v55 = vld [vmem:[#allocation8 + $0x160] sm:$0xff] }
  0xdc   : > { %710 = vmatprep.subr.mxu1 %v633_v20  ;;  %v661_v56 = vld [vmem:[#allocation8 + $0x158] sm:$0xff]  ;;  %v660_v57 = vld [vmem:[#allocation8 + $0x150] sm:$0xff]  ;;  %v659_v58 = vld [vmem:[#allocation8 + $0x148] sm:$0xff] }
  0xdd   : > { %711 = vmatpush1.msra.mxu1 %v632_v21  ;;  %v658_v59 = vld [vmem:[#allocation8 + $0x140] sm:$0xff]  ;;  %v657_v60 = vld [vmem:[#allocation8 + $0x138] sm:$0xff]  ;;  %v656_v61 = vld [vmem:[#allocation8 + $0x130] sm:$0xff] }
  0xde   : > { %712 = vmatprep.subr.mxu1 %v631_v22  ;;  %v655_v62 = vld [vmem:[#allocation8 + $0x128] sm:$0xff]  ;;  %v654_v63 = vld [vmem:[#allocation8 + $0x120] sm:$0xff]  ;;  %v653_v0 = vld [vmem:[#allocation8 + $0x118] sm:$0xff] }
  0xdf   : > { %713 = vmatpush1.msra.mxu1 %v630_v23  ;;  %v652_v1 = vld [vmem:[#allocation8 + $0x110] sm:$0xff]  ;;  %v651_v2 = vld [vmem:[#allocation8 + $0x108] sm:$0xff]  ;;  %v650_v3 = vld [vmem:[#allocation8 + $0x100] sm:$0xff] }
  0xe0   : > { %714 = vmatprep.subr.mxu1 %v629_v24  ;;  %v799_v4 = vld [vmem:[#allocation8 + $0x2f8] sm:$0xff]  ;;  %v798_v5 = vld [vmem:[#allocation8 + $0x2f0] sm:$0xff]  ;;  %v797_v6 = vld [vmem:[#allocation8 + $0x2e8] sm:$0xff] }
  0xe1   : > { %715 = vmatpush1.msra.mxu1 %v628_v25  ;;  %845 = vmatprep.subr.mxu0 %v799_v4  ;;  %v949_v7 = vld [vmem:[#allocation11 + $0xf8] sm:$0xff]  ;;  %v796_v8 = vld [vmem:[#allocation8 + $0x2e0] sm:$0xff]  ;;  %v795_v9 = vld [vmem:[#allocation8 + $0x2d8] sm:$0xff] }
  0xe2   : > { %716 = vmatprep.subr.mxu1 %v627_v26  ;;  %846 = vmatpush1.msra.mxu0 %v798_v5  ;;  %v794_v10 = vld [vmem:[#allocation8 + $0x2d0] sm:$0xff]  ;;  %v793_v11 = vld [vmem:[#allocation8 + $0x2c8] sm:$0xff]  ;;  %v792_v12 = vld [vmem:[#allocation8 + $0x2c0] sm:$0xff] }
  0xe3   : > { %717 = vmatpush1.msra.mxu1 %v626_v27  ;;  %847 = vmatprep.subr.mxu0 %v797_v6  ;;  %v791_v13 = vld [vmem:[#allocation8 + $0x2b8] sm:$0xff]  ;;  %v790_v14 = vld [vmem:[#allocation8 + $0x2b0] sm:$0xff]  ;;  %v789_v15 = vld [vmem:[#allocation8 + $0x2a8] sm:$0xff] }
  0xe4   : > { %718 = vmatprep.subr.mxu1 %v625_v28  ;;  %848 = vmatpush1.msra.mxu0 %v796_v8  ;;  %v788_v16 = vld [vmem:[#allocation8 + $0x2a0] sm:$0xff]  ;;  %v787_v17 = vld [vmem:[#allocation8 + $0x298] sm:$0xff]  ;;  %v786_v18 = vld [vmem:[#allocation8 + $0x290] sm:$0xff] }
  0xe5   : > { %719 = vmatpush1.msra.mxu1 %v624_v29  ;;  %849 = vmatprep.subr.mxu0 %v795_v9  ;;  %v785_v19 = vld [vmem:[#allocation8 + $0x288] sm:$0xff]  ;;  %v784_v20 = vld [vmem:[#allocation8 + $0x280] sm:$0xff]  ;;  %v783_v21 = vld [vmem:[#allocation8 + $0x278] sm:$0xff] }
  0xe6   : > { %720 = vmatprep.subr.mxu1 %v623_v30  ;;  %850 = vmatpush1.msra.mxu0 %v794_v10  ;;  %v782_v22 = vld [vmem:[#allocation8 + $0x270] sm:$0xff]  ;;  %v781_v23 = vld [vmem:[#allocation8 + $0x268] sm:$0xff]  ;;  %v780_v24 = vld [vmem:[#allocation8 + $0x260] sm:$0xff] }
  0xe7   : > { %721 = vmatpush1.msra.mxu1 %v622_v31  ;;  %851 = vmatprep.subr.mxu0 %v793_v11  ;;  %v779_v25 = vld [vmem:[#allocation8 + $0x258] sm:$0xff]  ;;  %v778_v26 = vld [vmem:[#allocation8 + $0x250] sm:$0xff]  ;;  %v777_v27 = vld [vmem:[#allocation8 + $0x248] sm:$0xff] }
  0xe8   : > { %722 = vmatprep.subr.mxu1 %v621_v32  ;;  %852 = vmatpush1.msra.mxu0 %v792_v12  ;;  %v776_v28 = vld [vmem:[#allocation8 + $0x240] sm:$0xff]  ;;  %v775_v29 = vld [vmem:[#allocation8 + $0x238] sm:$0xff]  ;;  %v774_v30 = vld [vmem:[#allocation8 + $0x230] sm:$0xff] }
  0xe9   : > { %723 = vmatpush1.msra.mxu1 %v620_v33  ;;  %853 = vmatprep.subr.mxu0 %v791_v13  ;;  %v773_v31 = vld [vmem:[#allocation8 + $0x228] sm:$0xff]  ;;  %v772_v32 = vld [vmem:[#allocation8 + $0x220] sm:$0xff]  ;;  %v771_v33 = vld [vmem:[#allocation8 + $0x218] sm:$0xff] }
  0xea   : > { %724 = vmatprep.subr.mxu1 %v619_v34  ;;  %854 = vmatpush1.msra.mxu0 %v790_v14  ;;  %v770_v34 = vld [vmem:[#allocation8 + $0x210] sm:$0xff]  ;;  %v948_v10 = vld [vmem:[#allocation11 + $0xf0] sm:$0xff]  ;;  %v947_v11 = vld [vmem:[#allocation11 + $0xe8] sm:$0xff] }
  0xeb   : > { %725 = vmatpush1.msra.mxu1 %v618_v35  ;;  %855 = vmatprep.subr.mxu0 %v789_v15  ;;  %v769_v35 = vld [vmem:[#allocation8 + $0x208] sm:$0xff]  ;;  %v946_v12 = vld [vmem:[#allocation11 + $0xe0] sm:$0xff]  ;;  %v944_v14 = vld [vmem:[#allocation11 + $0xd0] sm:$0xff] }
  0xec   : > { %726 = vmatprep.subr.mxu1 %v681_v36  ;;  %856 = vmatpush1.msra.mxu0 %v788_v16  ;;  %v768_v36 = vld [vmem:[#allocation8 + $0x200] sm:$0xff]  ;;  %v945_v13 = vld [vmem:[#allocation11 + $0xd8] sm:$0xff]  ;;  %v943_v15 = vld [vmem:[#allocation11 + $0xc8] sm:$0xff] }
  0xed   : > { %727 = vmatpush2.msra.mxu1 %v680_v37  ;;  %857 = vmatprep.subr.mxu0 %v787_v17  ;;  %v831_v37 = vld [vmem:[#allocation8 + $0x3f8] sm:$0xff]  ;;  %v942_v16 = vld [vmem:[#allocation11 + $0xc0] sm:$0xff]  ;;  %v941_v17 = vld [vmem:[#allocation11 + $0xb8] sm:$0xff] }
  0xee   : > { %728 = vmatprep.subr.mxu1 %v679_v38  ;;  %858 = vmatpush1.msra.mxu0 %v786_v18  ;;  %v830_v38 = vld [vmem:[#allocation8 + $0x3f0] sm:$0xff]  ;;  %v940_v18 = vld [vmem:[#allocation11 + $0xb0] sm:$0xff] }
  0xef   : > { %729 = vmatpush2.msra.mxu1 %v678_v39  ;;  %859 = vmatprep.subr.mxu0 %v785_v19  ;;  %v829_v39 = vld [vmem:[#allocation8 + $0x3e8] sm:$0xff]  ;;  %v939_v19 = vld [vmem:[#allocation11 + $0xa8] sm:$0xff] }
  0xf0   : > { %730 = vmatprep.subr.mxu1 %v677_v40  ;;  %860 = vmatpush1.msra.mxu0 %v784_v20  ;;  %v828_v40 = vld [vmem:[#allocation8 + $0x3e0] sm:$0xff]  ;;  %v938_v20 = vld [vmem:[#allocation11 + $0xa0] sm:$0xff] }
  0xf1   : > { %731 = vmatpush2.msra.mxu1 %v676_v41  ;;  %861 = vmatprep.subr.mxu0 %v783_v21  ;;  %v827_v41 = vld [vmem:[#allocation8 + $0x3d8] sm:$0xff]  ;;  %v937_v21 = vld [vmem:[#allocation11 + $0x98] sm:$0xff] }
  0xf2   : > { %732 = vmatprep.subr.mxu1 %v675_v42  ;;  %862 = vmatpush1.msra.mxu0 %v782_v22  ;;  %v826_v42 = vld [vmem:[#allocation8 + $0x3d0] sm:$0xff]  ;;  %v936_v22 = vld [vmem:[#allocation11 + $0x90] sm:$0xff] }
  0xf3   : > { %733 = vmatpush2.msra.mxu1 %v674_v43  ;;  %863 = vmatprep.subr.mxu0 %v781_v23  ;;  %v825_v43 = vld [vmem:[#allocation8 + $0x3c8] sm:$0xff]  ;;  %v935_v23 = vld [vmem:[#allocation11 + $0x88] sm:$0xff] }
  0xf4   : > { %734 = vmatprep.subr.mxu1 %v673_v44  ;;  %864 = vmatpush1.msra.mxu0 %v780_v24  ;;  %v824_v44 = vld [vmem:[#allocation8 + $0x3c0] sm:$0xff]  ;;  %v934_v24 = vld [vmem:[#allocation11 + $0x80] sm:$0xff] }
  0xf5   : > { %735 = vmatpush2.msra.mxu1 %v672_v45  ;;  %865 = vmatprep.subr.mxu0 %v779_v25  ;;  %v823_v45 = vld [vmem:[#allocation8 + $0x3b8] sm:$0xff]  ;;  %v933_v25 = vld [vmem:[#allocation11 + $0x78] sm:$0xff] }
  0xf6   : > { %736 = vmatprep.subr.mxu1 %v671_v46  ;;  %866 = vmatpush1.msra.mxu0 %v778_v26  ;;  %v822_v46 = vld [vmem:[#allocation8 + $0x3b0] sm:$0xff]  ;;  %v932_v26 = vld [vmem:[#allocation11 + $0x70] sm:$0xff] }
  0xf7   : > { %737 = vmatpush2.msra.mxu1 %v670_v47  ;;  %867 = vmatprep.subr.mxu0 %v777_v27  ;;  %v821_v47 = vld [vmem:[#allocation8 + $0x3a8] sm:$0xff]  ;;  %v931_v27 = vld [vmem:[#allocation11 + $0x68] sm:$0xff] }
  0xf8   : > { %738 = vmatprep.subr.mxu1 %v669_v48  ;;  %868 = vmatpush1.msra.mxu0 %v776_v28  ;;  %v820_v48 = vld [vmem:[#allocation8 + $0x3a0] sm:$0xff]  ;;  %v930_v28 = vld [vmem:[#allocation11 + $0x60] sm:$0xff] }
  0xf9   : > { %739 = vmatpush2.msra.mxu1 %v668_v49  ;;  %869 = vmatprep.subr.mxu0 %v775_v29  ;;  %v819_v49 = vld [vmem:[#allocation8 + $0x398] sm:$0xff]  ;;  %v929_v29 = vld [vmem:[#allocation11 + $0x58] sm:$0xff] }
  0xfa   : > { %740 = vmatprep.subr.mxu1 %v667_v50  ;;  %870 = vmatpush1.msra.mxu0 %v774_v30  ;;  %v818_v50 = vld [vmem:[#allocation8 + $0x390] sm:$0xff]  ;;  %v928_v30 = vld [vmem:[#allocation11 + $0x50] sm:$0xff] }
  0xfb   : > { %741 = vmatpush2.msra.mxu1 %v666_v51  ;;  %871 = vmatprep.subr.mxu0 %v773_v31  ;;  %v817_v51 = vld [vmem:[#allocation8 + $0x388] sm:$0xff]  ;;  %v927_v31 = vld [vmem:[#allocation11 + $0x48] sm:$0xff] }
  0xfc   : > { %742 = vmatprep.subr.mxu1 %v665_v52  ;;  %872 = vmatpush1.msra.mxu0 %v772_v32  ;;  %v816_v52 = vld [vmem:[#allocation8 + $0x380] sm:$0xff]  ;;  %v926_v32 = vld [vmem:[#allocation11 + $0x40] sm:$0xff] }
  0xfd   : > { %743 = vmatpush2.msra.mxu1 %v664_v53  ;;  %873 = vmatprep.subr.mxu0 %v771_v33  ;;  %v815_v53 = vld [vmem:[#allocation8 + $0x378] sm:$0xff]  ;;  %v925_v33 = vld [vmem:[#allocation11 + $0x38] sm:$0xff] }
  0xfe   : > { %744 = vmatprep.subr.mxu1 %v663_v54  ;;  %874 = vmatpush1.msra.mxu0 %v770_v34  ;;  %v814_v54 = vld [vmem:[#allocation8 + $0x370] sm:$0xff]  ;;  %v924_v34 = vld [vmem:[#allocation11 + $0x30] sm:$0xff] }
  0xff   : > { %745 = vmatpush2.msra.mxu1 %v662_v55  ;;  %875 = vmatprep.subr.mxu0 %v769_v35  ;;  %v813_v55 = vld [vmem:[#allocation8 + $0x368] sm:$0xff]  ;;  %v923_v35 = vld [vmem:[#allocation11 + $0x28] sm:$0xff] }
 0x100   : > { %746 = vmatprep.subr.mxu1 %v661_v56  ;;  %876 = vmatpush1.msra.mxu0 %v768_v36  ;;  %v812_v56 = vld [vmem:[#allocation8 + $0x360] sm:$0xff]  ;;  %v922_v36 = vld [vmem:[#allocation11 + $0x20] sm:$0xff] }
 0x101   : > { %747 = vmatpush2.msra.mxu1 %v660_v57  ;;  %877 = vmatprep.subr.mxu0 %v831_v37  ;;  %v811_v57 = vld [vmem:[#allocation8 + $0x358] sm:$0xff]  ;;  %v921_v37 = vld [vmem:[#allocation11 + $0x18] sm:$0xff] }
 0x102   : > { %748 = vmatprep.subr.mxu1 %v659_v58  ;;  %878 = vmatpush2.msra.mxu0 %v830_v38  ;;  %v810_v58 = vld [vmem:[#allocation8 + $0x350] sm:$0xff]  ;;  %v920_v38 = vld [vmem:[#allocation11 + $0x10] sm:$0xff] }
 0x103   : > { %749 = vmatpush2.msra.mxu1 %v658_v59  ;;  %879 = vmatprep.subr.mxu0 %v829_v39  ;;  %v809_v59 = vld [vmem:[#allocation8 + $0x348] sm:$0xff]  ;;  %v919_v39 = vld [vmem:[#allocation11 + $0x8] sm:$0xff] }
 0x104   : > { %750 = vmatprep.subr.mxu1 %v657_v60  ;;  %880 = vmatpush2.msra.mxu0 %v828_v40  ;;  %v808_v60 = vld [vmem:[#allocation8 + $0x340] sm:$0xff]  ;;  %v918_v40 = vld [vmem:[#allocation11] sm:$0xff] }
 0x105   : > { %751 = vmatpush2.msra.mxu1 %v656_v61  ;;  %881 = vmatprep.subr.mxu0 %v827_v41  ;;  %v524_v61 = vlaneseq  ;;  %v981_v41 = vld [vmem:[#allocation11 + $0x1f8] sm:$0xff] }
 0x106   : > { %752 = vmatprep.subr.mxu1 %v655_v62  ;;  %882 = vmatpush2.msra.mxu0 %v826_v42  ;;  %v980_v42 = vld [vmem:[#allocation11 + $0x1f0] sm:$0xff] }
 0x107   : > { %753 = vmatpush2.msra.mxu1 %v654_v63  ;;  %883 = vmatprep.subr.mxu0 %v825_v43  ;;  %v525_v62 = vshrl.u32 %v524_v61, 7  ;;  %v979_v43 = vld [vmem:[#allocation11 + $0x1e8] sm:$0xff]  ;;  %v961_v61 = vld [vmem:[#allocation11 + $0x158] sm:$0xff] }
 0x108   : > { %754 = vmatprep.subr.mxu1 %v653_v0  ;;  %884 = vmatpush2.msra.mxu0 %v824_v44  ;;  %v522_v0 = vld [vmem:[#allocation7] sm:$0x3]  ;;  %v978_v44 = vld [vmem:[#allocation11 + $0x1e0] sm:$0xff] }
 0x109   : > { %755 = vmatpush2.msra.mxu1 %v652_v1  ;;  %885 = vmatprep.subr.mxu0 %v823_v45  ;;  %v5593_v63 = vsub.s32 0, %v525_v62  ;;  %v5595_v1 = vsub.s32 1, %v525_v62  ;;  %v977_v45 = vld [vmem:[#allocation11 + $0x1d8] sm:$0xff]  ;;  %v960_v62 = vld [vmem:[#allocation11 + $0x150] sm:$0xff] }
 0x10a   : > { %756 = vmatprep.subr.mxu1 %v651_v2  ;;  %886 = vmatpush2.msra.mxu0 %v822_v46  ;;  %v976_v46 = vld [vmem:[#allocation11 + $0x1d0] sm:$0xff] }
 0x10b   : > { %757 = vmatpush2.msra.mxu1 %v650_v3  ;;  %887 = vmatprep.subr.mxu0 %v821_v47  ;;  %v527_v2 = vrot.slane %v522_v0, %v5593_v63  ;;  %v531_v3 = vrot.slane %v522_v0, %v5595_v1  ;;  %v975_v47 = vld [vmem:[#allocation11 + $0x1c8] sm:$0xff] }
 0x10c   : > { %994 = vmatprep.subr.mxu1 %v949_v7  ;;  %888 = vmatpush2.msra.mxu0 %v820_v48  ;;  %v974_v48 = vld [vmem:[#allocation11 + $0x1c0] sm:$0xff]  ;;  %v807_v0 = vld [vmem:[#allocation8 + $0x338] sm:$0xff] }
 0x10d   : > { %889 = vmatprep.subr.mxu0 %v819_v49  ;;  %v973_v49 = vld [vmem:[#allocation11 + $0x1b8] sm:$0xff] }
 0x10e   : > { %890 = vmatpush2.msra.mxu0 %v818_v50  ;;  %v972_v50 = vld [vmem:[#allocation11 + $0x1b0] sm:$0xff] }
 0x10f   : > { %891 = vmatprep.subr.mxu0 %v817_v51  ;;  %v971_v51 = vld [vmem:[#allocation11 + $0x1a8] sm:$0xff] }
 0x110   : > { %892 = vmatpush2.msra.mxu0 %v816_v52  ;;  %v970_v52 = vld [vmem:[#allocation11 + $0x1a0] sm:$0xff] }
 0x111   : > { %893 = vmatprep.subr.mxu0 %v815_v53  ;;  %v969_v53 = vld [vmem:[#allocation11 + $0x198] sm:$0xff] }
 0x112   : > { %894 = vmatpush2.msra.mxu0 %v814_v54  ;;  %v968_v54 = vld [vmem:[#allocation11 + $0x190] sm:$0xff] }
 0x113   : > { %895 = vmatprep.subr.mxu0 %v813_v55  ;;  %v967_v55 = vld [vmem:[#allocation11 + $0x188] sm:$0xff] }
 0x114   : > { %896 = vmatpush2.msra.mxu0 %v812_v56  ;;  %v966_v56 = vld [vmem:[#allocation11 + $0x180] sm:$0xff] }
 0x115   : > { %897 = vmatprep.subr.mxu0 %v811_v57  ;;  %v965_v57 = vld [vmem:[#allocation11 + $0x178] sm:$0xff] }
 0x116   : > { %898 = vmatpush2.msra.mxu0 %v810_v58  ;;  %v964_v58 = vld [vmem:[#allocation11 + $0x170] sm:$0xff] }
 0x117   : > { %899 = vmatprep.subr.mxu0 %v809_v59  ;;  %v963_v59 = vld [vmem:[#allocation11 + $0x168] sm:$0xff] }
 0x118   : > { %900 = vmatpush2.msra.mxu0 %v808_v60  ;;  %v962_v60 = vld [vmem:[#allocation11 + $0x160] sm:$0xff] }
 0x119   : > { %901 = vmatprep.subr.mxu0 %v807_v0  ;;  %v1072_v0 = vld [vmem:[#allocation8 + $0x410] sm:$0xff] }
 0x18f   : > { %v611_v4 = vpop.f32.mrf.mxu0 }
 0x190   : > { %v5599_v5 = vadd.f32 %v611_v4, %v527_v2  ;;  %v959_v2 = vld [vmem:[#allocation11 + $0x148] sm:$0xff]  ;;  %v958_v4 = vld [vmem:[#allocation11 + $0x140] sm:$0xff] }
 0x191   : > { %v613_v6 = vpop.f32.mrf.mxu0 }
 0x192   : > { %v5601_v7 = vadd.f32 %v613_v6, %v531_v3  ;;  %v616_v9 = vmax.f32 %v5599_v5, 0.0  ;;  %v806_v3 = vld [vmem:[#allocation8 + $0x330] sm:$0xff]  ;;  %v805_v6 = vld [vmem:[#allocation8 + $0x328] sm:$0xff]  ;;  %v1398_v5 = vld [vmem:[#allocation11 + $0x2d0] sm:$0xff] }
 0x193   : > { %902 = vmatpush2.msra.mxu0 %v806_v3  ;;  %v1070_v3 = vld [vmem:[#allocation8 + $0x400] sm:$0xff] }
 0x194   : > { %v617_v8 = vmax.f32 %v5601_v7, 0.0  ;;  %903 = vmatprep.subr.mxu0 %v805_v6  ;;  %v1132_v6 = vld [vmem:[#allocation8 + $0x5f0] sm:$0xff]  ;;  %v1397_v7 = vld [vmem:[#allocation11 + $0x2c8] sm:$0xff] }
 0x196   : > { %758 = vmatprep.mubr.f32.mxu1 %v617_v8 }
 0x197   : > { %759 = vmatmul.mubr.f32.vlgmr.msra.gmra.mxu1 %v616_v9 }
 0x198   : > { %995 = vmatpush1.msra.mxu1 %v948_v10  ;;  %v957_v10 = vld [vmem:[#allocation11 + $0x138] sm:$0xff] }
 0x199   : > { %996 = vmatprep.subr.mxu1 %v947_v11  ;;  %v804_v11 = vld [vmem:[#allocation8 + $0x320] sm:$0xff] }
 0x19a   : > { %997 = vmatpush1.msra.mxu1 %v946_v12  ;;  %v956_v12 = vld [vmem:[#allocation11 + $0x130] sm:$0xff]  ;;  %904 = vmatpush2.msra.mxu0 %v804_v11 }
 0x19b   : > { %998 = vmatprep.subr.mxu1 %v945_v13  ;;  %v803_v13 = vld [vmem:[#allocation8 + $0x318] sm:$0xff]  ;;  %v1130_v11 = vld [vmem:[#allocation8 + $0x5e0] sm:$0xff] }
 0x19c   : > { %999 = vmatpush1.msra.mxu1 %v944_v14  ;;  %v955_v14 = vld [vmem:[#allocation11 + $0x128] sm:$0xff]  ;;  %905 = vmatprep.subr.mxu0 %v803_v13  ;;  %v1128_v13 = vld [vmem:[#allocation8 + $0x5d0] sm:$0xff] }
 0x19d   : > { %1000 = vmatprep.subr.mxu1 %v943_v15  ;;  %v802_v15 = vld [vmem:[#allocation8 + $0x310] sm:$0xff] }
 0x19e   : > { %1001 = vmatpush1.msra.mxu1 %v942_v16  ;;  %v954_v16 = vld [vmem:[#allocation11 + $0x120] sm:$0xff]  ;;  %906 = vmatpush2.msra.mxu0 %v802_v15  ;;  %v1126_v15 = vld [vmem:[#allocation8 + $0x5c0] sm:$0xff] }
 0x19f   : > { %1002 = vmatprep.subr.mxu1 %v941_v17  ;;  %v801_v17 = vld [vmem:[#allocation8 + $0x308] sm:$0xff] }
 0x1a0   : > { %1003 = vmatpush1.msra.mxu1 %v940_v18  ;;  %v953_v18 = vld [vmem:[#allocation11 + $0x118] sm:$0xff]  ;;  %907 = vmatprep.subr.mxu0 %v801_v17  ;;  %v1124_v17 = vld [vmem:[#allocation8 + $0x5b0] sm:$0xff] }
 0x1a1   : > { %1004 = vmatprep.subr.mxu1 %v939_v19  ;;  %v800_v19 = vld [vmem:[#allocation8 + $0x300] sm:$0xff] }
 0x1a2   : > { %1005 = vmatpush1.msra.mxu1 %v938_v20  ;;  %v952_v20 = vld [vmem:[#allocation11 + $0x110] sm:$0xff]  ;;  %908 = vmatpush2.msra.mxu0 %v800_v19 }
 0x1a3   : > { %1006 = vmatprep.subr.mxu1 %v937_v21  ;;  %v951_v21 = vld [vmem:[#allocation11 + $0x108] sm:$0xff]  ;;  %v1122_v19 = vld [vmem:[#allocation8 + $0x5a0] sm:$0xff] }
 0x1a4   : > { %1007 = vmatpush1.msra.mxu1 %v936_v22  ;;  %v950_v22 = vld [vmem:[#allocation11 + $0x100] sm:$0xff] }
 0x1a5   : > { %1008 = vmatprep.subr.mxu1 %v935_v23  ;;  %v5609_v23 = vld [vmem:[#allocation3 + $0x8] sm:$0xff] }
 0x1a6   : > { %1009 = vmatpush1.msra.mxu1 %v934_v24  ;;  %v5611_v24 = vld [vmem:[#allocation3] sm:$0xff]  ;;  %1058 = vmatprep.mubr.f32.mxu1 %v5609_v23 }
 0x1a7   : > { %1010 = vmatprep.subr.mxu1 %v933_v25  ;;  %v1101_v25 = vld [vmem:[#allocation8 + $0x4f8] sm:$0xff] }
 0x1a8   : > { %1011 = vmatpush1.msra.mxu1 %v932_v26  ;;  %1147 = vmatprep.subr.mxu0 %v1101_v25  ;;  %v682_v26 = vld [vmem:[#allocation10] sm:$0x3] }
 0x1a9   : > { %1012 = vmatprep.subr.mxu1 %v931_v27  ;;  %v687_v27 = vrot.slane %v682_v26, %v5593_v63  ;;  %v1118_v25 = vld [vmem:[#allocation8 + $0x580] sm:$0xff] }
 0x1aa   : > { %1013 = vmatpush1.msra.mxu1 %v930_v28  ;;  %v691_v28 = vrot.slane %v682_v26, %v5595_v1  ;;  %v1117_v26 = vld [vmem:[#allocation8 + $0x578] sm:$0xff] }
 0x1ab   : > { %1014 = vmatprep.subr.mxu1 %v929_v29 }
 0x1ac   : > { %1015 = vmatpush1.msra.mxu1 %v928_v30 }
 0x1ad   : > { %1016 = vmatprep.subr.mxu1 %v927_v31 }
 0x1ae   : > { %1017 = vmatpush1.msra.mxu1 %v926_v32 }
 0x1af   : > { %1018 = vmatprep.subr.mxu1 %v925_v33 }
 0x1b0   : > { %1019 = vmatpush1.msra.mxu1 %v924_v34 }
 0x1b1   : > { %1020 = vmatprep.subr.mxu1 %v923_v35  ;;  %v1100_v35 = vld [vmem:[#allocation8 + $0x4f0] sm:$0xff] }
 0x1b2   : > { %1021 = vmatpush1.msra.mxu1 %v922_v36  ;;  %v1099_v36 = vld [vmem:[#allocation8 + $0x4e8] sm:$0xff] }
 0x1b3   : > { %1022 = vmatprep.subr.mxu1 %v921_v37  ;;  %v1098_v37 = vld [vmem:[#allocation8 + $0x4e0] sm:$0xff] }
 0x1b4   : > { %1023 = vmatpush1.msra.mxu1 %v920_v38  ;;  %v1097_v38 = vld [vmem:[#allocation8 + $0x4d8] sm:$0xff] }
 0x1b5   : > { %1024 = vmatprep.subr.mxu1 %v919_v39  ;;  %v1096_v39 = vld [vmem:[#allocation8 + $0x4d0] sm:$0xff] }
 0x1b6   : > { %1025 = vmatpush1.msra.mxu1 %v918_v40  ;;  %v1095_v40 = vld [vmem:[#allocation8 + $0x4c8] sm:$0xff] }
 0x1b7   : > { %1026 = vmatprep.subr.mxu1 %v981_v41  ;;  %v1094_v41 = vld [vmem:[#allocation8 + $0x4c0] sm:$0xff] }
 0x1b8   : > { %1027 = vmatpush2.msra.mxu1 %v980_v42  ;;  %v1093_v42 = vld [vmem:[#allocation8 + $0x4b8] sm:$0xff] }
 0x1b9   : > { %1028 = vmatprep.subr.mxu1 %v979_v43  ;;  %v1092_v43 = vld [vmem:[#allocation8 + $0x4b0] sm:$0xff] }
 0x1ba   : > { %1029 = vmatpush2.msra.mxu1 %v978_v44  ;;  %v1091_v44 = vld [vmem:[#allocation8 + $0x4a8] sm:$0xff] }
 0x1bb   : > { %1030 = vmatprep.subr.mxu1 %v977_v45  ;;  %v1090_v45 = vld [vmem:[#allocation8 + $0x4a0] sm:$0xff] }
 0x1bc   : > { %1031 = vmatpush2.msra.mxu1 %v976_v46  ;;  %v1089_v46 = vld [vmem:[#allocation8 + $0x498] sm:$0xff] }
 0x1bd   : > { %1032 = vmatprep.subr.mxu1 %v975_v47  ;;  %v1088_v47 = vld [vmem:[#allocation8 + $0x490] sm:$0xff] }
 0x1be   : > { %1033 = vmatpush2.msra.mxu1 %v974_v48  ;;  %v1087_v48 = vld [vmem:[#allocation8 + $0x488] sm:$0xff] }
 0x1bf   : > { %1034 = vmatprep.subr.mxu1 %v973_v49  ;;  %v1086_v49 = vld [vmem:[#allocation8 + $0x480] sm:$0xff] }
 0x1c0   : > { %1035 = vmatpush2.msra.mxu1 %v972_v50  ;;  %v1085_v50 = vld [vmem:[#allocation8 + $0x478] sm:$0xff] }
 0x1c1   : > { %1036 = vmatprep.subr.mxu1 %v971_v51  ;;  %v1084_v51 = vld [vmem:[#allocation8 + $0x470] sm:$0xff] }
 0x1c2   : > { %1037 = vmatpush2.msra.mxu1 %v970_v52  ;;  %v1083_v52 = vld [vmem:[#allocation8 + $0x468] sm:$0xff] }
 0x1c3   : > { %1038 = vmatprep.subr.mxu1 %v969_v53  ;;  %v1082_v53 = vld [vmem:[#allocation8 + $0x460] sm:$0xff] }
 0x1c4   : > { %1039 = vmatpush2.msra.mxu1 %v968_v54  ;;  %v1081_v54 = vld [vmem:[#allocation8 + $0x458] sm:$0xff] }
 0x1c5   : > { %1040 = vmatprep.subr.mxu1 %v967_v55  ;;  %v1080_v55 = vld [vmem:[#allocation8 + $0x450] sm:$0xff] }
 0x1c6   : > { %1041 = vmatpush2.msra.mxu1 %v966_v56  ;;  %v1079_v56 = vld [vmem:[#allocation8 + $0x448] sm:$0xff] }
 0x1c7   : > { %1042 = vmatprep.subr.mxu1 %v965_v57  ;;  %v1078_v57 = vld [vmem:[#allocation8 + $0x440] sm:$0xff] }
 0x1c8   : > { %1043 = vmatpush2.msra.mxu1 %v964_v58  ;;  %v1077_v58 = vld [vmem:[#allocation8 + $0x438] sm:$0xff] }
 0x1c9   : > { %1044 = vmatprep.subr.mxu1 %v963_v59  ;;  %v1076_v59 = vld [vmem:[#allocation8 + $0x430] sm:$0xff] }
 0x1ca   : > { %1045 = vmatpush2.msra.mxu1 %v962_v60  ;;  %v1075_v60 = vld [vmem:[#allocation8 + $0x428] sm:$0xff] }
 0x1cb   : > { %1046 = vmatprep.subr.mxu1 %v961_v61  ;;  %v1074_v61 = vld [vmem:[#allocation8 + $0x420] sm:$0xff] }
 0x1cc   : > { %1047 = vmatpush2.msra.mxu1 %v960_v62  ;;  %v1073_v62 = vld [vmem:[#allocation8 + $0x418] sm:$0xff] }
 0x1cd   : > { %1048 = vmatprep.subr.mxu1 %v959_v2  ;;  %v1071_v2 = vld [vmem:[#allocation8 + $0x408] sm:$0xff] }
 0x1ce   : > { %1049 = vmatpush2.msra.mxu1 %v958_v4  ;;  %v1133_v4 = vld [vmem:[#allocation8 + $0x5f8] sm:$0xff] }
 0x1cf   : > { %1050 = vmatprep.subr.mxu1 %v957_v10  ;;  %v1131_v10 = vld [vmem:[#allocation8 + $0x5e8] sm:$0xff] }
 0x1d0   : > { %1051 = vmatpush2.msra.mxu1 %v956_v12  ;;  %v1129_v12 = vld [vmem:[#allocation8 + $0x5d8] sm:$0xff] }
 0x1d1   : > { %1052 = vmatprep.subr.mxu1 %v955_v14  ;;  %v1127_v14 = vld [vmem:[#allocation8 + $0x5c8] sm:$0xff] }
 0x1d2   : > { %1053 = vmatpush2.msra.mxu1 %v954_v16  ;;  %v1125_v16 = vld [vmem:[#allocation8 + $0x5b8] sm:$0xff] }
 0x1d3   : > { %1054 = vmatprep.subr.mxu1 %v953_v18  ;;  %v1123_v18 = vld [vmem:[#allocation8 + $0x5a8] sm:$0xff] }
 0x1d4   : > { %1055 = vmatpush2.msra.mxu1 %v952_v20  ;;  %v1121_v20 = vld [vmem:[#allocation8 + $0x598] sm:$0xff] }
 0x1d5   : > { %1056 = vmatprep.subr.mxu1 %v951_v21  ;;  %v1120_v21 = vld [vmem:[#allocation8 + $0x590] sm:$0xff] }
 0x1d6   : > { %1057 = vmatpush2.msra.mxu1 %v950_v22  ;;  %v1119_v22 = vld [vmem:[#allocation8 + $0x588] sm:$0xff] }
 0x1d7   : > { %1059 = vmatmul.mubr.f32.vlgmr.msra.gmra.mxu1 %v5611_v24 }
 0x257   : > { %v760_v29 = vpop.f32.mrf.mxu1 }
 0x258   : > { %v761_v30 = vadd.f32 %v760_v29, %v687_v27  ;;  %v1116_v27 = vld [vmem:[#allocation8 + $0x570] sm:$0xff]  ;;  %v1114_v29 = vld [vmem:[#allocation8 + $0x560] sm:$0xff] }
 0x259   : > { %v762_v31 = vpop.f32.mrf.mxu1 }
 0x25a   : > { %v763_v32 = vadd.f32 %v762_v31, %v691_v28  ;;  %v765_v34 = vmax.f32 %v761_v30, 0.0  ;;  %v1115_v28 = vld [vmem:[#allocation8 + $0x568] sm:$0xff]  ;;  %v1113_v30 = vld [vmem:[#allocation8 + $0x558] sm:$0xff]  ;;  %v1112_v31 = vld [vmem:[#allocation8 + $0x550] sm:$0xff] }
 0x25c   : > { %v766_v33 = vmax.f32 %v763_v32, 0.0  ;;  %v1111_v32 = vld [vmem:[#allocation8 + $0x548] sm:$0xff] }
 0x25e   : > { %909 = vmatprep.mubr.f32.mxu0 %v766_v33  ;;  %v1110_v33 = vld [vmem:[#allocation8 + $0x540] sm:$0xff] }
 0x25f   : > { %910 = vmatmul.mubr.f32.vlgmr.msra.gmra.mxu0 %v765_v34  ;;  %v1109_v34 = vld [vmem:[#allocation8 + $0x538] sm:$0xff] }
 0x260   : > { %1148 = vmatpush1.msra.mxu0 %v1100_v35  ;;  %v1108_v35 = vld [vmem:[#allocation8 + $0x530] sm:$0xff] }
 0x261   : > { %1149 = vmatprep.subr.mxu0 %v1099_v36  ;;  %v1107_v36 = vld [vmem:[#allocation8 + $0x528] sm:$0xff] }
 0x262   : > { %1150 = vmatpush1.msra.mxu0 %v1098_v37  ;;  %v1106_v37 = vld [vmem:[#allocation8 + $0x520] sm:$0xff] }
 0x263   : > { %1151 = vmatprep.subr.mxu0 %v1097_v38  ;;  %v1105_v38 = vld [vmem:[#allocation8 + $0x518] sm:$0xff] }
 0x264   : > { %1152 = vmatpush1.msra.mxu0 %v1096_v39  ;;  %v1104_v39 = vld [vmem:[#allocation8 + $0x510] sm:$0xff] }
 0x265   : > { %1153 = vmatprep.subr.mxu0 %v1095_v40  ;;  %v1103_v40 = vld [vmem:[#allocation8 + $0x508] sm:$0xff] }
 0x266   : > { %1154 = vmatpush1.msra.mxu0 %v1094_v41  ;;  %v1102_v41 = vld [vmem:[#allocation8 + $0x500] sm:$0xff] }
 0x267   : > { %1155 = vmatprep.subr.mxu0 %v1093_v42  ;;  %v1252_v42 = vld [vmem:[#allocation8 + $0x6f8] sm:$0xff] }
 0x268   : > { %1156 = vmatpush1.msra.mxu0 %v1092_v43  ;;  %v1251_v43 = vld [vmem:[#allocation8 + $0x6f0] sm:$0xff]  ;;  %1298 = vmatprep.subr.mxu1 %v1252_v42  ;;  %v1261_v42 = vld [vmem:[#allocation8 + $0x740] sm:$0xff] }
 0x269   : > { %1157 = vmatprep.subr.mxu0 %v1091_v44  ;;  %v1250_v44 = vld [vmem:[#allocation8 + $0x6e8] sm:$0xff]  ;;  %1299 = vmatpush1.msra.mxu1 %v1251_v43  ;;  %v833_v43 = vld [vmem:[#allocation10 + $0x2] sm:$0x3] }
 0x26a   : > { %1158 = vmatpush1.msra.mxu0 %v1090_v45  ;;  %v1403_v45 = vld [vmem:[#allocation11 + $0x2f8] sm:$0xff]  ;;  %1300 = vmatprep.subr.mxu1 %v1250_v44  ;;  %v838_v44 = vrot.slane %v833_v43, %v5593_v63 }
 0x26b   : > { %1159 = vmatprep.subr.mxu0 %v1089_v46  ;;  %v1249_v46 = vld [vmem:[#allocation8 + $0x6e0] sm:$0xff] }
 0x26c   : > { %1160 = vmatpush1.msra.mxu0 %v1088_v47  ;;  %v1248_v47 = vld [vmem:[#allocation8 + $0x6d8] sm:$0xff]  ;;  %1301 = vmatpush1.msra.mxu1 %v1249_v46  ;;  %v982_v46 = vld [vmem:[#allocation13] sm:$0x3] }
 0x26d   : > { %1161 = vmatprep.subr.mxu0 %v1087_v48  ;;  %v1247_v48 = vld [vmem:[#allocation8 + $0x6d0] sm:$0xff]  ;;  %1302 = vmatprep.subr.mxu1 %v1248_v47 }
 0x26e   : > { %1162 = vmatpush1.msra.mxu0 %v1086_v49  ;;  %v1246_v49 = vld [vmem:[#allocation8 + $0x6c8] sm:$0xff]  ;;  %1303 = vmatpush1.msra.mxu1 %v1247_v48 }
 0x26f   : > { %1163 = vmatprep.subr.mxu0 %v1085_v50  ;;  %v1245_v50 = vld [vmem:[#allocation8 + $0x6c0] sm:$0xff]  ;;  %1304 = vmatprep.subr.mxu1 %v1246_v49 }
 0x270   : > { %1164 = vmatpush1.msra.mxu0 %v1084_v51  ;;  %v1244_v51 = vld [vmem:[#allocation8 + $0x6b8] sm:$0xff]  ;;  %1305 = vmatpush1.msra.mxu1 %v1245_v50 }
 0x271   : > { %1165 = vmatprep.subr.mxu0 %v1083_v52  ;;  %v1243_v52 = vld [vmem:[#allocation8 + $0x6b0] sm:$0xff]  ;;  %1306 = vmatprep.subr.mxu1 %v1244_v51  ;;  %v987_v51 = vrot.slane %v982_v46, %v5593_v63 }
 0x272   : > { %1166 = vmatpush1.msra.mxu0 %v1082_v53  ;;  %v1242_v53 = vld [vmem:[#allocation8 + $0x6a8] sm:$0xff]  ;;  %1307 = vmatpush1.msra.mxu1 %v1243_v52 }
 0x273   : > { %1167 = vmatprep.subr.mxu0 %v1081_v54  ;;  %v1241_v54 = vld [vmem:[#allocation8 + $0x6a0] sm:$0xff]  ;;  %1308 = vmatprep.subr.mxu1 %v1242_v53 }
 0x274   : > { %1168 = vmatpush1.msra.mxu0 %v1080_v55  ;;  %v1240_v55 = vld [vmem:[#allocation8 + $0x698] sm:$0xff]  ;;  %1309 = vmatpush1.msra.mxu1 %v1241_v54  ;;  %v991_v54 = vrot.slane %v982_v46, %v5595_v1  ;;  %v1422_v46 = vld [vmem:[#allocation11 + $0x390] sm:$0xff] }
 0x275   : > { %1169 = vmatprep.subr.mxu0 %v1079_v56  ;;  %v1239_v56 = vld [vmem:[#allocation8 + $0x690] sm:$0xff]  ;;  %1310 = vmatprep.subr.mxu1 %v1240_v55 }
 0x276   : > { %1170 = vmatpush1.msra.mxu0 %v1078_v57  ;;  %v1238_v57 = vld [vmem:[#allocation8 + $0x688] sm:$0xff]  ;;  %1311 = vmatpush1.msra.mxu1 %v1239_v56 }
 0x277   : > { %1171 = vmatprep.subr.mxu0 %v1077_v58  ;;  %v1237_v58 = vld [vmem:[#allocation8 + $0x680] sm:$0xff]  ;;  %1312 = vmatprep.subr.mxu1 %v1238_v57 }
 0x278   : > { %1172 = vmatpush1.msra.mxu0 %v1076_v59  ;;  %v1236_v59 = vld [vmem:[#allocation8 + $0x678] sm:$0xff]  ;;  %1313 = vmatpush1.msra.mxu1 %v1237_v58 }
 0x279   : > { %1173 = vmatprep.subr.mxu0 %v1075_v60  ;;  %v1235_v60 = vld [vmem:[#allocation8 + $0x670] sm:$0xff]  ;;  %1314 = vmatprep.subr.mxu1 %v1236_v59 }
 0x27a   : > { %1174 = vmatpush1.msra.mxu0 %v1074_v61  ;;  %v1234_v61 = vld [vmem:[#allocation8 + $0x668] sm:$0xff]  ;;  %1315 = vmatpush1.msra.mxu1 %v1235_v60 }
 0x27b   : > { %1175 = vmatprep.subr.mxu0 %v1073_v62  ;;  %v1233_v62 = vld [vmem:[#allocation8 + $0x660] sm:$0xff]  ;;  %1316 = vmatprep.subr.mxu1 %v1234_v61 }
 0x27c   : > { %1176 = vmatpush1.msra.mxu0 %v1072_v0  ;;  %v1232_v0 = vld [vmem:[#allocation8 + $0x658] sm:$0xff]  ;;  %1317 = vmatpush1.msra.mxu1 %v1233_v62 }
 0x27d   : > { %1177 = vmatprep.subr.mxu0 %v1071_v2  ;;  %v1231_v2 = vld [vmem:[#allocation8 + $0x650] sm:$0xff]  ;;  %1318 = vmatprep.subr.mxu1 %v1232_v0  ;;  %v1402_v0 = vld [vmem:[#allocation11 + $0x2f0] sm:$0xff] }
 0x27e   : > { %1178 = vmatpush1.msra.mxu0 %v1070_v3  ;;  %v1230_v3 = vld [vmem:[#allocation8 + $0x648] sm:$0xff]  ;;  %1319 = vmatpush1.msra.mxu1 %v1231_v2  ;;  %v1401_v2 = vld [vmem:[#allocation11 + $0x2e8] sm:$0xff] }
 0x27f   : > { %1179 = vmatprep.subr.mxu0 %v1133_v4  ;;  %v1229_v4 = vld [vmem:[#allocation8 + $0x640] sm:$0xff]  ;;  %1320 = vmatprep.subr.mxu1 %v1230_v3  ;;  %v1400_v3 = vld [vmem:[#allocation11 + $0x2e0] sm:$0xff] }
 0x280   : > { %1180 = vmatpush2.msra.mxu0 %v1132_v6  ;;  %v1228_v6 = vld [vmem:[#allocation8 + $0x638] sm:$0xff]  ;;  %1321 = vmatpush1.msra.mxu1 %v1229_v4  ;;  %v1399_v4 = vld [vmem:[#allocation11 + $0x2d8] sm:$0xff] }
 0x281   : > { %1181 = vmatprep.subr.mxu0 %v1131_v10  ;;  %v1227_v10 = vld [vmem:[#allocation8 + $0x630] sm:$0xff]  ;;  %1322 = vmatprep.subr.mxu1 %v1228_v6  ;;  %v1394_v6 = vld [vmem:[#allocation11 + $0x2b0] sm:$0xff] }
 0x282   : > { %1182 = vmatpush2.msra.mxu0 %v1130_v11  ;;  %v1226_v11 = vld [vmem:[#allocation8 + $0x628] sm:$0xff]  ;;  %1323 = vmatpush1.msra.mxu1 %v1227_v10  ;;  %v1393_v10 = vld [vmem:[#allocation11 + $0x2a8] sm:$0xff] }
 0x283   : > { %1183 = vmatprep.subr.mxu0 %v1129_v12  ;;  %v1225_v12 = vld [vmem:[#allocation8 + $0x620] sm:$0xff]  ;;  %1324 = vmatprep.subr.mxu1 %v1226_v11  ;;  %v1392_v11 = vld [vmem:[#allocation11 + $0x2a0] sm:$0xff] }
 0x284   : > { %1184 = vmatpush2.msra.mxu0 %v1128_v13  ;;  %v1224_v13 = vld [vmem:[#allocation8 + $0x618] sm:$0xff]  ;;  %1325 = vmatpush1.msra.mxu1 %v1225_v12  ;;  %v1391_v12 = vld [vmem:[#allocation11 + $0x298] sm:$0xff] }
 0x285   : > { %1185 = vmatprep.subr.mxu0 %v1127_v14  ;;  %v1223_v14 = vld [vmem:[#allocation8 + $0x610] sm:$0xff]  ;;  %1326 = vmatprep.subr.mxu1 %v1224_v13  ;;  %v1390_v13 = vld [vmem:[#allocation11 + $0x290] sm:$0xff] }
 0x286   : > { %1186 = vmatpush2.msra.mxu0 %v1126_v15  ;;  %v1222_v15 = vld [vmem:[#allocation8 + $0x608] sm:$0xff]  ;;  %1327 = vmatpush1.msra.mxu1 %v1223_v14  ;;  %v1388_v14 = vld [vmem:[#allocation11 + $0x280] sm:$0xff] }
 0x287   : > { %1187 = vmatprep.subr.mxu0 %v1125_v16  ;;  %v1221_v16 = vld [vmem:[#allocation8 + $0x600] sm:$0xff]  ;;  %1328 = vmatprep.subr.mxu1 %v1222_v15  ;;  %v1387_v15 = vld [vmem:[#allocation11 + $0x278] sm:$0xff] }
 0x288   : > { %1188 = vmatpush2.msra.mxu0 %v1124_v17  ;;  %v1284_v17 = vld [vmem:[#allocation8 + $0x7f8] sm:$0xff]  ;;  %1329 = vmatpush1.msra.mxu1 %v1221_v16  ;;  %v1386_v16 = vld [vmem:[#allocation11 + $0x270] sm:$0xff] }
 0x289   : > { %1189 = vmatprep.subr.mxu0 %v1123_v18  ;;  %v1283_v18 = vld [vmem:[#allocation8 + $0x7f0] sm:$0xff]  ;;  %1330 = vmatprep.subr.mxu1 %v1284_v17  ;;  %v1385_v17 = vld [vmem:[#allocation11 + $0x268] sm:$0xff] }
 0x28a   : > { %1190 = vmatpush2.msra.mxu0 %v1122_v19  ;;  %v1282_v19 = vld [vmem:[#allocation8 + $0x7e8] sm:$0xff]  ;;  %1331 = vmatpush2.msra.mxu1 %v1283_v18  ;;  %v1384_v18 = vld [vmem:[#allocation11 + $0x260] sm:$0xff] }
 0x28b   : > { %1191 = vmatprep.subr.mxu0 %v1121_v20  ;;  %v1281_v20 = vld [vmem:[#allocation8 + $0x7e0] sm:$0xff]  ;;  %1332 = vmatprep.subr.mxu1 %v1282_v19  ;;  %v1383_v19 = vld [vmem:[#allocation11 + $0x258] sm:$0xff] }
 0x28c   : > { %1192 = vmatpush2.msra.mxu0 %v1120_v21  ;;  %v1280_v21 = vld [vmem:[#allocation8 + $0x7d8] sm:$0xff]  ;;  %1333 = vmatpush2.msra.mxu1 %v1281_v20  ;;  %v1382_v20 = vld [vmem:[#allocation11 + $0x250] sm:$0xff] }
 0x28d   : > { %1193 = vmatprep.subr.mxu0 %v1119_v22  ;;  %v1279_v22 = vld [vmem:[#allocation8 + $0x7d0] sm:$0xff]  ;;  %1334 = vmatprep.subr.mxu1 %v1280_v21  ;;  %v1381_v21 = vld [vmem:[#allocation11 + $0x248] sm:$0xff] }
 0x28e   : > { %1194 = vmatpush2.msra.mxu0 %v1118_v25  ;;  %v1278_v25 = vld [vmem:[#allocation8 + $0x7c8] sm:$0xff]  ;;  %1335 = vmatpush2.msra.mxu1 %v1279_v22  ;;  %v1380_v22 = vld [vmem:[#allocation11 + $0x240] sm:$0xff] }
 0x28f   : > { %1195 = vmatprep.subr.mxu0 %v1117_v26  ;;  %v1277_v26 = vld [vmem:[#allocation8 + $0x7c0] sm:$0xff]  ;;  %1336 = vmatprep.subr.mxu1 %v1278_v25  ;;  %v1379_v25 = vld [vmem:[#allocation11 + $0x238] sm:$0xff] }
 0x290   : > { %1196 = vmatpush2.msra.mxu0 %v1116_v27  ;;  %v1276_v27 = vld [vmem:[#allocation8 + $0x7b8] sm:$0xff]  ;;  %1337 = vmatpush2.msra.mxu1 %v1277_v26  ;;  %v1378_v26 = vld [vmem:[#allocation11 + $0x230] sm:$0xff] }
 0x291   : > { %1197 = vmatprep.subr.mxu0 %v1115_v28  ;;  %v1275_v28 = vld [vmem:[#allocation8 + $0x7b0] sm:$0xff]  ;;  %1338 = vmatprep.subr.mxu1 %v1276_v27  ;;  %v1377_v27 = vld [vmem:[#allocation11 + $0x228] sm:$0xff] }
 0x292   : > { %1198 = vmatpush2.msra.mxu0 %v1114_v29  ;;  %v1274_v29 = vld [vmem:[#allocation8 + $0x7a8] sm:$0xff]  ;;  %1339 = vmatpush2.msra.mxu1 %v1275_v28  ;;  %v1376_v28 = vld [vmem:[#allocation11 + $0x220] sm:$0xff] }
 0x293   : > { %1199 = vmatprep.subr.mxu0 %v1113_v30  ;;  %v1273_v30 = vld [vmem:[#allocation8 + $0x7a0] sm:$0xff]  ;;  %1340 = vmatprep.subr.mxu1 %v1274_v29  ;;  %v1375_v29 = vld [vmem:[#allocation11 + $0x218] sm:$0xff] }
 0x294   : > { %1200 = vmatpush2.msra.mxu0 %v1112_v31  ;;  %v1272_v31 = vld [vmem:[#allocation8 + $0x798] sm:$0xff]  ;;  %1341 = vmatpush2.msra.mxu1 %v1273_v30  ;;  %v1374_v30 = vld [vmem:[#allocation11 + $0x210] sm:$0xff] }
 0x295   : > { %1201 = vmatprep.subr.mxu0 %v1111_v32  ;;  %v1271_v32 = vld [vmem:[#allocation8 + $0x790] sm:$0xff]  ;;  %1342 = vmatprep.subr.mxu1 %v1272_v31  ;;  %v1373_v31 = vld [vmem:[#allocation11 + $0x208] sm:$0xff] }
 0x296   : > { %1202 = vmatpush2.msra.mxu0 %v1110_v33  ;;  %v1270_v33 = vld [vmem:[#allocation8 + $0x788] sm:$0xff]  ;;  %1343 = vmatpush2.msra.mxu1 %v1271_v32  ;;  %v1372_v32 = vld [vmem:[#allocation11 + $0x200] sm:$0xff] }
 0x297   : > { %1203 = vmatprep.subr.mxu0 %v1109_v34  ;;  %v1269_v34 = vld [vmem:[#allocation8 + $0x780] sm:$0xff]  ;;  %1344 = vmatprep.subr.mxu1 %v1270_v33  ;;  %v1060_v48 = vpop.f32.mrf.mxu1  ;;  %v1435_v33 = vld [vmem:[#allocation11 + $0x3f8] sm:$0xff] }
 0x298   : > { %1204 = vmatpush2.msra.mxu0 %v1108_v35  ;;  %v1268_v35 = vld [vmem:[#allocation8 + $0x778] sm:$0xff]  ;;  %1345 = vmatpush2.msra.mxu1 %v1269_v34  ;;  %v1061_v58 = vadd.f32 %v1060_v48, %v987_v51  ;;  %v1434_v34 = vld [vmem:[#allocation11 + $0x3f0] sm:$0xff]  ;;  %v1420_v48 = vld [vmem:[#allocation11 + $0x380] sm:$0xff] }
 0x299   : > { %1205 = vmatprep.subr.mxu0 %v1107_v36  ;;  %v1267_v36 = vld [vmem:[#allocation8 + $0x770] sm:$0xff]  ;;  %1346 = vmatprep.subr.mxu1 %v1268_v35  ;;  %v1062_v55 = vpop.f32.mrf.mxu1  ;;  %v1433_v35 = vld [vmem:[#allocation11 + $0x3e8] sm:$0xff] }
 0x29a   : > { %1206 = vmatpush2.msra.mxu0 %v1106_v37  ;;  %v1266_v37 = vld [vmem:[#allocation8 + $0x768] sm:$0xff]  ;;  %1347 = vmatpush2.msra.mxu1 %v1267_v36  ;;  %v1063_v60 = vadd.f32 %v1062_v55, %v991_v54  ;;  %v1432_v36 = vld [vmem:[#allocation11 + $0x3e0] sm:$0xff]  ;;  %v1417_v51 = vld [vmem:[#allocation11 + $0x368] sm:$0xff] }
 0x29b   : > { %1207 = vmatprep.subr.mxu0 %v1105_v38  ;;  %v1265_v38 = vld [vmem:[#allocation8 + $0x760] sm:$0xff]  ;;  %1348 = vmatprep.subr.mxu1 %v1266_v37  ;;  %v1431_v37 = vld [vmem:[#allocation11 + $0x3d8] sm:$0xff]  ;;  %v1260_v55 = vld [vmem:[#allocation8 + $0x738] sm:$0xff] }
 0x29c   : > { %1208 = vmatpush2.msra.mxu0 %v1104_v39  ;;  %v1264_v39 = vld [vmem:[#allocation8 + $0x758] sm:$0xff]  ;;  %1349 = vmatpush2.msra.mxu1 %v1265_v38  ;;  %v1430_v38 = vld [vmem:[#allocation11 + $0x3d0] sm:$0xff] }
 0x29d   : > { %1209 = vmatprep.subr.mxu0 %v1103_v40  ;;  %v1263_v40 = vld [vmem:[#allocation8 + $0x750] sm:$0xff]  ;;  %1350 = vmatprep.subr.mxu1 %v1264_v39  ;;  %v1429_v39 = vld [vmem:[#allocation11 + $0x3c8] sm:$0xff]  ;;  %v1414_v54 = vld [vmem:[#allocation11 + $0x350] sm:$0xff] }
 0x29e   : > { %1210 = vmatpush2.msra.mxu0 %v1102_v41  ;;  %v1262_v41 = vld [vmem:[#allocation8 + $0x748] sm:$0xff]  ;;  %1351 = vmatpush2.msra.mxu1 %v1263_v40  ;;  %v1428_v40 = vld [vmem:[#allocation11 + $0x3c0] sm:$0xff] }
 0x29f   : > { %1449 = vmatprep.subr.mxu0 %v1403_v45  ;;  %1352 = vmatprep.subr.mxu1 %v1262_v41  ;;  %v842_v45 = vrot.slane %v833_v43, %v5595_v1  ;;  %v1427_v41 = vld [vmem:[#allocation11 + $0x3b8] sm:$0xff]  ;;  %v1425_v43 = vld [vmem:[#allocation11 + $0x3a8] sm:$0xff] }
 0x2a0   : > { %1353 = vmatpush2.msra.mxu1 %v1261_v42  ;;  %v1426_v42 = vld [vmem:[#allocation11 + $0x3b0] sm:$0xff] }
 0x2a1   : > { %1354 = vmatprep.subr.mxu1 %v1260_v55  ;;  %v1587_v55 = vld [vmem:[#allocation8 + $0x9f0] sm:$0xff] }
 0x31f   : > { %v911_v47 = vpop.f32.mrf.mxu0 }
 0x320   : > { %v912_v49 = vadd.f32 %v911_v47, %v838_v44  ;;  %v1424_v44 = vld [vmem:[#allocation11 + $0x3a0] sm:$0xff]  ;;  %v1421_v47 = vld [vmem:[#allocation11 + $0x388] sm:$0xff] }
 0x321   : > { %v913_v50 = vpop.f32.mrf.mxu0 }
 0x322   : > { %v916_v52 = vmax.f32 %v912_v49, 0.0  ;;  %v914_v53 = vadd.f32 %v913_v50, %v842_v45  ;;  %v1423_v45 = vld [vmem:[#allocation11 + $0x398] sm:$0xff]  ;;  %v1418_v50 = vld [vmem:[#allocation11 + $0x370] sm:$0xff] }
 0x323   : > { %v1419_v49 = vld [vmem:[#allocation11 + $0x378] sm:$0xff] }
 0x324   : > { %v917_v56 = vmax.f32 %v914_v53, 0.0  ;;  %v1065_v57 = vadd.f32 %v916_v52, %v616_v9  ;;  %v1395_v9 = vld [vmem:[#allocation11 + $0x2b8] sm:$0xff]  ;;  %v1416_v52 = vld [vmem:[#allocation11 + $0x360] sm:$0xff] }
 0x325   : > { %v1415_v53 = vld [vmem:[#allocation11 + $0x358] sm:$0xff] }
 0x326   : > { %v1066_v59 = vadd.f32 %v917_v56, %v617_v8  ;;  %v5627_v62 = vadd.f32 %v1065_v57, %v1061_v58  ;;  %v1396_v8 = vld [vmem:[#allocation11 + $0x2c0] sm:$0xff]  ;;  %v1413_v56 = vld [vmem:[#allocation11 + $0x348] sm:$0xff] }
 0x327   : > { %v1259_v57 = vld [vmem:[#allocation8 + $0x730] sm:$0xff] }
 0x328   : > { %v5625_v61 = vadd.f32 %v1066_v59, %v1063_v60  ;;  %v1412_v58 = vld [vmem:[#allocation11 + $0x340] sm:$0xff]  ;;  %1355 = vmatpush2.msra.mxu1 %v1259_v57  ;;  %v1258_v59 = vld [vmem:[#allocation8 + $0x728] sm:$0xff]  ;;  %v1585_v57 = vld [vmem:[#allocation8 + $0x9e0] sm:$0xff] }
 0x329   : > { %v1411_v60 = vld [vmem:[#allocation11 + $0x338] sm:$0xff]  ;;  %1356 = vmatprep.subr.mxu1 %v1258_v59  ;;  %v1583_v59 = vld [vmem:[#allocation8 + $0x9d0] sm:$0xff] }
 0x32a   : > { %1211 = vmatprep.mubr.f32.mxu0 %v5625_v61 }
 0x32b   : > { %1212 = vmatmul.mubr.f32.vlgmr.msra.gmra.mxu0 %v5627_v62 }
 0x32c   : > { %1450 = vmatpush1.msra.mxu0 %v1402_v0  ;;  %1513 = vmatprep.mubr.f32.mxu0 %v5609_v23  ;;  %v1389_v23 = vld [vmem:[#allocation11 + $0x288] sm:$0xff]  ;;  %v1257_v0 = vld [vmem:[#allocation8 + $0x720] sm:$0xff] }
 0x32d   : > { %1451 = vmatprep.subr.mxu0 %v1401_v2  ;;  %v1410_v2 = vld [vmem:[#allocation11 + $0x330] sm:$0xff]  ;;  %1357 = vmatpush2.msra.mxu1 %v1257_v0 }
 0x32e   : > { %1452 = vmatpush1.msra.mxu0 %v1400_v3  ;;  %v1256_v3 = vld [vmem:[#allocation8 + $0x718] sm:$0xff]  ;;  %v1581_v0 = vld [vmem:[#allocation8 + $0x9c0] sm:$0xff] }
 0x32f   : > { %1453 = vmatprep.subr.mxu0 %v1399_v4  ;;  %v1409_v4 = vld [vmem:[#allocation11 + $0x328] sm:$0xff]  ;;  %1358 = vmatprep.subr.mxu1 %v1256_v3  ;;  %v1579_v3 = vld [vmem:[#allocation8 + $0x9b0] sm:$0xff] }
 0x330   : > { %1454 = vmatpush1.msra.mxu0 %v1398_v5  ;;  %v1255_v5 = vld [vmem:[#allocation8 + $0x710] sm:$0xff] }
 0x331   : > { %1455 = vmatprep.subr.mxu0 %v1397_v7  ;;  %v1408_v7 = vld [vmem:[#allocation11 + $0x320] sm:$0xff]  ;;  %1359 = vmatpush2.msra.mxu1 %v1255_v5  ;;  %v1577_v5 = vld [vmem:[#allocation8 + $0x9a0] sm:$0xff] }
 0x332   : > { %1456 = vmatpush1.msra.mxu0 %v1396_v8  ;;  %v1254_v8 = vld [vmem:[#allocation8 + $0x708] sm:$0xff] }
 0x333   : > { %1457 = vmatprep.subr.mxu0 %v1395_v9  ;;  %v1407_v9 = vld [vmem:[#allocation11 + $0x318] sm:$0xff]  ;;  %1360 = vmatprep.subr.mxu1 %v1254_v8  ;;  %v1575_v8 = vld [vmem:[#allocation8 + $0x990] sm:$0xff] }
 0x334   : > { %1458 = vmatpush1.msra.mxu0 %v1394_v6  ;;  %v1253_v6 = vld [vmem:[#allocation8 + $0x700] sm:$0xff] }
 0x335   : > { %1459 = vmatprep.subr.mxu0 %v1393_v10  ;;  %v1406_v10 = vld [vmem:[#allocation11 + $0x310] sm:$0xff]  ;;  %1361 = vmatpush2.msra.mxu1 %v1253_v6 }
 0x336   : > { %1460 = vmatpush1.msra.mxu0 %v1392_v11  ;;  %v1405_v11 = vld [vmem:[#allocation11 + $0x308] sm:$0xff]  ;;  %v1573_v6 = vld [vmem:[#allocation8 + $0x980] sm:$0xff] }
 0x337   : > { %1461 = vmatprep.subr.mxu0 %v1391_v12  ;;  %v1404_v12 = vld [vmem:[#allocation11 + $0x300] sm:$0xff] }
 0x338   : > { %1462 = vmatpush1.msra.mxu0 %v1390_v13  ;;  %v1556_v13 = vld [vmem:[#allocation8 + $0x8f8] sm:$0xff] }
 0x339   : > { %1463 = vmatprep.subr.mxu0 %v1389_v23  ;;  %1602 = vmatprep.subr.mxu1 %v1556_v13  ;;  %v1135_v23 = vld [vmem:[#allocation10 + $0x4] sm:$0x3] }
 0x33a   : > { %1464 = vmatpush1.msra.mxu0 %v1388_v14  ;;  %v1140_v14 = vrot.slane %v1135_v23, %v5593_v63  ;;  %v1569_v13 = vld [vmem:[#allocation8 + $0x960] sm:$0xff] }
 0x33b   : > { %1465 = vmatprep.subr.mxu0 %v1387_v15  ;;  %v1144_v15 = vrot.slane %v1135_v23, %v5595_v1  ;;  %v1568_v23 = vld [vmem:[#allocation8 + $0x958] sm:$0xff] }
 0x33c   : > { %1466 = vmatpush1.msra.mxu0 %v1386_v16 }
 0x33d   : > { %1467 = vmatprep.subr.mxu0 %v1385_v17 }
 0x33e   : > { %1468 = vmatpush1.msra.mxu0 %v1384_v18 }
 0x33f   : > { %1469 = vmatprep.subr.mxu0 %v1383_v19 }
 0x340   : > { %1470 = vmatpush1.msra.mxu0 %v1382_v20 }
 0x341   : > { %1471 = vmatprep.subr.mxu0 %v1381_v21 }
 0x342   : > { %1472 = vmatpush1.msra.mxu0 %v1380_v22  ;;  %v1555_v22 = vld [vmem:[#allocation8 + $0x8f0] sm:$0xff] }
 0x343   : > { %1473 = vmatprep.subr.mxu0 %v1379_v25  ;;  %v1554_v25 = vld [vmem:[#allocation8 + $0x8e8] sm:$0xff] }
 0x344   : > { %1474 = vmatpush1.msra.mxu0 %v1378_v26  ;;  %v1553_v26 = vld [vmem:[#allocation8 + $0x8e0] sm:$0xff] }
 0x345   : > { %1475 = vmatprep.subr.mxu0 %v1377_v27  ;;  %v1552_v27 = vld [vmem:[#allocation8 + $0x8d8] sm:$0xff] }
 0x346   : > { %1476 = vmatpush1.msra.mxu0 %v1376_v28  ;;  %v1550_v28 = vld [vmem:[#allocation8 + $0x8c8] sm:$0xff] }
 0x347   : > { %1477 = vmatprep.subr.mxu0 %v1375_v29  ;;  %v1549_v29 = vld [vmem:[#allocation8 + $0x8c0] sm:$0xff] }
 0x348   : > { %1478 = vmatpush1.msra.mxu0 %v1374_v30  ;;  %v1548_v30 = vld [vmem:[#allocation8 + $0x8b8] sm:$0xff] }
 0x349   : > { %1479 = vmatprep.subr.mxu0 %v1373_v31  ;;  %v1547_v31 = vld [vmem:[#allocation8 + $0x8b0] sm:$0xff] }
 0x34a   : > { %1480 = vmatpush1.msra.mxu0 %v1372_v32  ;;  %v1546_v32 = vld [vmem:[#allocation8 + $0x8a8] sm:$0xff] }
 0x34b   : > { %1481 = vmatprep.subr.mxu0 %v1435_v33  ;;  %v1545_v33 = vld [vmem:[#allocation8 + $0x8a0] sm:$0xff] }
 0x34c   : > { %1482 = vmatpush2.msra.mxu0 %v1434_v34  ;;  %v1544_v34 = vld [vmem:[#allocation8 + $0x898] sm:$0xff] }
 0x34d   : > { %1483 = vmatprep.subr.mxu0 %v1433_v35  ;;  %v1543_v35 = vld [vmem:[#allocation8 + $0x890] sm:$0xff] }
 0x34e   : > { %1484 = vmatpush2.msra.mxu0 %v1432_v36  ;;  %v1542_v36 = vld [vmem:[#allocation8 + $0x888] sm:$0xff] }
 0x34f   : > { %1485 = vmatprep.subr.mxu0 %v1431_v37  ;;  %v1541_v37 = vld [vmem:[#allocation8 + $0x880] sm:$0xff] }
 0x350   : > { %1486 = vmatpush2.msra.mxu0 %v1430_v38  ;;  %v1540_v38 = vld [vmem:[#allocation8 + $0x878] sm:$0xff] }
 0x351   : > { %1487 = vmatprep.subr.mxu0 %v1429_v39  ;;  %v1539_v39 = vld [vmem:[#allocation8 + $0x870] sm:$0xff] }
 0x352   : > { %1488 = vmatpush2.msra.mxu0 %v1428_v40  ;;  %v1538_v40 = vld [vmem:[#allocation8 + $0x868] sm:$0xff] }
 0x353   : > { %1489 = vmatprep.subr.mxu0 %v1427_v41  ;;  %v1537_v41 = vld [vmem:[#allocation8 + $0x860] sm:$0xff] }
 0x354   : > { %1490 = vmatpush2.msra.mxu0 %v1426_v42  ;;  %v1536_v42 = vld [vmem:[#allocation8 + $0x858] sm:$0xff] }
 0x355   : > { %1491 = vmatprep.subr.mxu0 %v1425_v43  ;;  %v1535_v43 = vld [vmem:[#allocation8 + $0x850] sm:$0xff] }
 0x356   : > { %1492 = vmatpush2.msra.mxu0 %v1424_v44  ;;  %v1534_v44 = vld [vmem:[#allocation8 + $0x848] sm:$0xff] }
 0x357   : > { %1493 = vmatprep.subr.mxu0 %v1423_v45  ;;  %v1533_v45 = vld [vmem:[#allocation8 + $0x840] sm:$0xff] }
 0x358   : > { %1494 = vmatpush2.msra.mxu0 %v1422_v46  ;;  %v1532_v46 = vld [vmem:[#allocation8 + $0x838] sm:$0xff] }
 0x359   : > { %1495 = vmatprep.subr.mxu0 %v1421_v47  ;;  %v1531_v47 = vld [vmem:[#allocation8 + $0x830] sm:$0xff] }
 0x35a   : > { %1496 = vmatpush2.msra.mxu0 %v1420_v48  ;;  %v1530_v48 = vld [vmem:[#allocation8 + $0x828] sm:$0xff] }
 0x35b   : > { %1497 = vmatprep.subr.mxu0 %v1419_v49  ;;  %v1529_v49 = vld [vmem:[#allocation8 + $0x820] sm:$0xff] }
 0x35c   : > { %1498 = vmatpush2.msra.mxu0 %v1418_v50  ;;  %v1528_v50 = vld [vmem:[#allocation8 + $0x818] sm:$0xff] }
 0x35d   : > { %1499 = vmatprep.subr.mxu0 %v1417_v51  ;;  %v1527_v51 = vld [vmem:[#allocation8 + $0x810] sm:$0xff] }
 0x35e   : > { %1500 = vmatpush2.msra.mxu0 %v1416_v52  ;;  %v1526_v52 = vld [vmem:[#allocation8 + $0x808] sm:$0xff] }
 0x35f   : > { %1501 = vmatprep.subr.mxu0 %v1415_v53  ;;  %v1525_v53 = vld [vmem:[#allocation8 + $0x800] sm:$0xff] }
 0x360   : > { %1502 = vmatpush2.msra.mxu0 %v1414_v54  ;;  %v1588_v54 = vld [vmem:[#allocation8 + $0x9f8] sm:$0xff] }
 0x361   : > { %1503 = vmatprep.subr.mxu0 %v1413_v56  ;;  %v1586_v56 = vld [vmem:[#allocation8 + $0x9e8] sm:$0xff] }
 0x362   : > { %1504 = vmatpush2.msra.mxu0 %v1412_v58  ;;  %v1584_v58 = vld [vmem:[#allocation8 + $0x9d8] sm:$0xff] }
 0x363   : > { %1505 = vmatprep.subr.mxu0 %v1411_v60  ;;  %v1582_v60 = vld [vmem:[#allocation8 + $0x9c8] sm:$0xff] }
 0x364   : > { %1506 = vmatpush2.msra.mxu0 %v1410_v2  ;;  %v1580_v2 = vld [vmem:[#allocation8 + $0x9b8] sm:$0xff] }
 0x365   : > { %1507 = vmatprep.subr.mxu0 %v1409_v4  ;;  %v1578_v4 = vld [vmem:[#allocation8 + $0x9a8] sm:$0xff] }
 0x366   : > { %1508 = vmatpush2.msra.mxu0 %v1408_v7  ;;  %v1576_v7 = vld [vmem:[#allocation8 + $0x998] sm:$0xff] }
 0x367   : > { %1509 = vmatprep.subr.mxu0 %v1407_v9  ;;  %v1574_v9 = vld [vmem:[#allocation8 + $0x988] sm:$0xff] }
 0x368   : > { %1510 = vmatpush2.msra.mxu0 %v1406_v10  ;;  %v1572_v10 = vld [vmem:[#allocation8 + $0x978] sm:$0xff] }
 0x369   : > { %1511 = vmatprep.subr.mxu0 %v1405_v11  ;;  %v1571_v11 = vld [vmem:[#allocation8 + $0x970] sm:$0xff] }
 0x36a   : > { %1512 = vmatpush2.msra.mxu0 %v1404_v12  ;;  %v1570_v12 = vld [vmem:[#allocation8 + $0x968] sm:$0xff] }
 0x36b   : > { %1514 = vmatmul.mubr.f32.vlgmr.msra.gmra.mxu0 %v5611_v24  ;;  %v1551_v24 = vld [vmem:[#allocation8 + $0x8d0] sm:$0xff] }
 0x3eb   : > { %v1213_v16 = vpop.f32.mrf.mxu0 }
 0x3ec   : > { %v1214_v17 = vadd.f32 %v1213_v16, %v1140_v14  ;;  %v1567_v14 = vld [vmem:[#allocation8 + $0x950] sm:$0xff]  ;;  %v1565_v16 = vld [vmem:[#allocation8 + $0x940] sm:$0xff] }
 0x3ed   : > { %v1215_v18 = vpop.f32.mrf.mxu0 }
 0x3ee   : > { %v1216_v19 = vadd.f32 %v1215_v18, %v1144_v15  ;;  %v1218_v21 = vmax.f32 %v1214_v17, 0.0  ;;  %v1566_v15 = vld [vmem:[#allocation8 + $0x948] sm:$0xff]  ;;  %v1564_v17 = vld [vmem:[#allocation8 + $0x938] sm:$0xff]  ;;  %v1563_v18 = vld [vmem:[#allocation8 + $0x930] sm:$0xff] }
 0x3f0   : > { %v1219_v20 = vmax.f32 %v1216_v19, 0.0  ;;  %v1562_v19 = vld [vmem:[#allocation8 + $0x928] sm:$0xff] }
 0x3f2   : > { %1362 = vmatprep.mubr.f32.mxu1 %v1219_v20  ;;  %v1561_v20 = vld [vmem:[#allocation8 + $0x920] sm:$0xff] }
 0x3f3   : > { %1363 = vmatmul.mubr.f32.vlgmr.msra.gmra.mxu1 %v1218_v21  ;;  %v1560_v21 = vld [vmem:[#allocation8 + $0x918] sm:$0xff] }
 0x3f4   : > { %1603 = vmatpush1.msra.mxu1 %v1555_v22  ;;  %v1559_v22 = vld [vmem:[#allocation8 + $0x910] sm:$0xff] }
 0x3f5   : > { %1604 = vmatprep.subr.mxu1 %v1554_v25  ;;  %v1558_v25 = vld [vmem:[#allocation8 + $0x908] sm:$0xff] }
 0x3f6   : > { %1605 = vmatpush1.msra.mxu1 %v1553_v26  ;;  %v1557_v26 = vld [vmem:[#allocation8 + $0x900] sm:$0xff] }
 0x3f7   : > { %1606 = vmatprep.subr.mxu1 %v1552_v27  ;;  %v1707_v27 = vld [vmem:[#allocation8 + $0xaf8] sm:$0xff] }
 0x3f8   : > { %1607 = vmatpush1.msra.mxu1 %v1551_v24  ;;  %v1706_v24 = vld [vmem:[#allocation8 + $0xaf0] sm:$0xff]  ;;  %1753 = vmatprep.subr.mxu0 %v1707_v27 }
 0x3f9   : > { %1608 = vmatprep.subr.mxu1 %v1550_v28  ;;  %v1705_v28 = vld [vmem:[#allocation8 + $0xae8] sm:$0xff]  ;;  %1754 = vmatpush1.msra.mxu0 %v1706_v24  ;;  %v1437_v27 = vld [vmem:[#allocation13 + $0x2] sm:$0x3] }
 0x3fa   : > { %1609 = vmatpush1.msra.mxu1 %v1549_v29  ;;  %v1858_v29 = vld [vmem:[#allocation11 + $0x4f8] sm:$0xff]  ;;  %1755 = vmatprep.subr.mxu0 %v1705_v28 }
 0x3fb   : > { %1610 = vmatprep.subr.mxu1 %v1548_v30  ;;  %v1704_v30 = vld [vmem:[#allocation8 + $0xae0] sm:$0xff] }
 0x3fc   : > { %1611 = vmatpush1.msra.mxu1 %v1547_v31  ;;  %v1703_v31 = vld [vmem:[#allocation8 + $0xad8] sm:$0xff]  ;;  %1756 = vmatpush1.msra.mxu0 %v1704_v30 }
 0x3fd   : > { %1612 = vmatprep.subr.mxu1 %v1546_v32  ;;  %v1702_v32 = vld [vmem:[#allocation8 + $0xad0] sm:$0xff]  ;;  %1757 = vmatprep.subr.mxu0 %v1703_v31  ;;  %v1442_v31 = vrot.slane %v1437_v27, %v5593_v63 }
 0x3fe   : > { %1613 = vmatpush1.msra.mxu1 %v1545_v33  ;;  %v1701_v33 = vld [vmem:[#allocation8 + $0xac8] sm:$0xff]  ;;  %1758 = vmatpush1.msra.mxu0 %v1702_v32 }
 0x3ff   : > { %1614 = vmatprep.subr.mxu1 %v1544_v34  ;;  %v1700_v34 = vld [vmem:[#allocation8 + $0xac0] sm:$0xff]  ;;  %1759 = vmatprep.subr.mxu0 %v1701_v33 }
 0x400   : > { %1615 = vmatpush1.msra.mxu1 %v1543_v35  ;;  %v1699_v35 = vld [vmem:[#allocation8 + $0xab8] sm:$0xff]  ;;  %1760 = vmatpush1.msra.mxu0 %v1700_v34  ;;  %v1446_v34 = vrot.slane %v1437_v27, %v5595_v1  ;;  %v1877_v27 = vld [vmem:[#allocation11 + $0x590] sm:$0xff] }
 0x401   : > { %1616 = vmatprep.subr.mxu1 %v1542_v36  ;;  %v1698_v36 = vld [vmem:[#allocation8 + $0xab0] sm:$0xff]  ;;  %1761 = vmatprep.subr.mxu0 %v1699_v35 }
 0x402   : > { %1617 = vmatpush1.msra.mxu1 %v1541_v37  ;;  %v1697_v37 = vld [vmem:[#allocation8 + $0xaa8] sm:$0xff]  ;;  %1762 = vmatpush1.msra.mxu0 %v1698_v36 }
 0x403   : > { %1618 = vmatprep.subr.mxu1 %v1540_v38  ;;  %v1696_v38 = vld [vmem:[#allocation8 + $0xaa0] sm:$0xff]  ;;  %1763 = vmatprep.subr.mxu0 %v1697_v37 }
 0x404   : > { %1619 = vmatpush1.msra.mxu1 %v1539_v39  ;;  %v1695_v39 = vld [vmem:[#allocation8 + $0xa98] sm:$0xff]  ;;  %1764 = vmatpush1.msra.mxu0 %v1696_v38 }
 0x405   : > { %1620 = vmatprep.subr.mxu1 %v1538_v40  ;;  %v1694_v40 = vld [vmem:[#allocation8 + $0xa90] sm:$0xff]  ;;  %1765 = vmatprep.subr.mxu0 %v1695_v39 }
 0x406   : > { %1621 = vmatpush1.msra.mxu1 %v1537_v41  ;;  %v1693_v41 = vld [vmem:[#allocation8 + $0xa88] sm:$0xff]  ;;  %1766 = vmatpush1.msra.mxu0 %v1694_v40 }
 0x407   : > { %1622 = vmatprep.subr.mxu1 %v1536_v42  ;;  %v1692_v42 = vld [vmem:[#allocation8 + $0xa80] sm:$0xff]  ;;  %1767 = vmatprep.subr.mxu0 %v1693_v41 }
 0x408   : > { %1623 = vmatpush1.msra.mxu1 %v1535_v43  ;;  %v1691_v43 = vld [vmem:[#allocation8 + $0xa78] sm:$0xff]  ;;  %1768 = vmatpush1.msra.mxu0 %v1692_v42 }
 0x409   : > { %1624 = vmatprep.subr.mxu1 %v1534_v44  ;;  %v1690_v44 = vld [vmem:[#allocation8 + $0xa70] sm:$0xff]  ;;  %1769 = vmatprep.subr.mxu0 %v1691_v43  ;;  %v1857_v43 = vld [vmem:[#allocation11 + $0x4f0] sm:$0xff] }
 0x40a   : > { %1625 = vmatpush1.msra.mxu1 %v1533_v45  ;;  %v1689_v45 = vld [vmem:[#allocation8 + $0xa68] sm:$0xff]  ;;  %1770 = vmatpush1.msra.mxu0 %v1690_v44  ;;  %v1856_v44 = vld [vmem:[#allocation11 + $0x4e8] sm:$0xff] }
 0x40b   : > { %1626 = vmatprep.subr.mxu1 %v1532_v46  ;;  %v1688_v46 = vld [vmem:[#allocation8 + $0xa60] sm:$0xff]  ;;  %1771 = vmatprep.subr.mxu0 %v1689_v45  ;;  %v1855_v45 = vld [vmem:[#allocation11 + $0x4e0] sm:$0xff] }
 0x40c   : > { %1627 = vmatpush1.msra.mxu1 %v1531_v47  ;;  %v1687_v47 = vld [vmem:[#allocation8 + $0xa58] sm:$0xff]  ;;  %1772 = vmatpush1.msra.mxu0 %v1688_v46  ;;  %v1854_v46 = vld [vmem:[#allocation11 + $0x4d8] sm:$0xff] }
 0x40d   : > { %1628 = vmatprep.subr.mxu1 %v1530_v48  ;;  %v1686_v48 = vld [vmem:[#allocation8 + $0xa50] sm:$0xff]  ;;  %1773 = vmatprep.subr.mxu0 %v1687_v47 }
 0x40e   : > { %1629 = vmatpush1.msra.mxu1 %v1529_v49  ;;  %v1685_v49 = vld [vmem:[#allocation8 + $0xa48] sm:$0xff]  ;;  %1774 = vmatpush1.msra.mxu0 %v1686_v48  ;;  %v1851_v48 = vld [vmem:[#allocation11 + $0x4c0] sm:$0xff] }
 0x40f   : > { %1630 = vmatprep.subr.mxu1 %v1528_v50  ;;  %v1684_v50 = vld [vmem:[#allocation8 + $0xa40] sm:$0xff]  ;;  %1775 = vmatprep.subr.mxu0 %v1685_v49  ;;  %v5647_v47 = vld [vmem:[#allocation3 + $0x8] sm:$0xff] }
 0x410   : > { %1631 = vmatpush1.msra.mxu1 %v1527_v51  ;;  %v1683_v51 = vld [vmem:[#allocation8 + $0xa38] sm:$0xff]  ;;  %1776 = vmatpush1.msra.mxu0 %v1684_v50  ;;  %v1850_v49 = vld [vmem:[#allocation11 + $0x4b8] sm:$0xff]  ;;  %v1849_v50 = vld [vmem:[#allocation11 + $0x4b0] sm:$0xff] }
 0x411   : > { %1632 = vmatprep.subr.mxu1 %v1526_v52  ;;  %v1682_v52 = vld [vmem:[#allocation8 + $0xa30] sm:$0xff]  ;;  %1777 = vmatprep.subr.mxu0 %v1683_v51  ;;  %v1848_v51 = vld [vmem:[#allocation11 + $0x4a8] sm:$0xff] }
 0x412   : > { %1633 = vmatpush1.msra.mxu1 %v1525_v53  ;;  %v1681_v53 = vld [vmem:[#allocation8 + $0xa28] sm:$0xff]  ;;  %1778 = vmatpush1.msra.mxu0 %v1682_v52  ;;  %v1847_v52 = vld [vmem:[#allocation11 + $0x4a0] sm:$0xff] }
 0x413   : > { %1634 = vmatprep.subr.mxu1 %v1588_v54  ;;  %v1680_v54 = vld [vmem:[#allocation8 + $0xa20] sm:$0xff]  ;;  %1779 = vmatprep.subr.mxu0 %v1681_v53  ;;  %v1846_v53 = vld [vmem:[#allocation11 + $0x498] sm:$0xff] }
 0x414   : > { %1635 = vmatpush2.msra.mxu1 %v1587_v55  ;;  %v1679_v55 = vld [vmem:[#allocation8 + $0xa18] sm:$0xff]  ;;  %1780 = vmatpush1.msra.mxu0 %v1680_v54  ;;  %v1845_v54 = vld [vmem:[#allocation11 + $0x490] sm:$0xff] }
 0x415   : > { %1636 = vmatprep.subr.mxu1 %v1586_v56  ;;  %v1678_v56 = vld [vmem:[#allocation8 + $0xa10] sm:$0xff]  ;;  %1781 = vmatprep.subr.mxu0 %v1679_v55  ;;  %v1844_v55 = vld [vmem:[#allocation11 + $0x488] sm:$0xff] }
 0x416   : > { %1637 = vmatpush2.msra.mxu1 %v1585_v57  ;;  %v1677_v57 = vld [vmem:[#allocation8 + $0xa08] sm:$0xff]  ;;  %1782 = vmatpush1.msra.mxu0 %v1678_v56  ;;  %v1843_v56 = vld [vmem:[#allocation11 + $0x480] sm:$0xff] }
 0x417   : > { %1638 = vmatprep.subr.mxu1 %v1584_v58  ;;  %v1676_v58 = vld [vmem:[#allocation8 + $0xa00] sm:$0xff]  ;;  %1783 = vmatprep.subr.mxu0 %v1677_v57  ;;  %v1842_v57 = vld [vmem:[#allocation11 + $0x478] sm:$0xff] }
 0x418   : > { %1639 = vmatpush2.msra.mxu1 %v1583_v59  ;;  %v1739_v59 = vld [vmem:[#allocation8 + $0xbf8] sm:$0xff]  ;;  %1784 = vmatpush1.msra.mxu0 %v1676_v58  ;;  %v1841_v58 = vld [vmem:[#allocation11 + $0x470] sm:$0xff] }
 0x419   : > { %1640 = vmatprep.subr.mxu1 %v1582_v60  ;;  %v1738_v60 = vld [vmem:[#allocation8 + $0xbf0] sm:$0xff]  ;;  %1785 = vmatprep.subr.mxu0 %v1739_v59  ;;  %v1840_v59 = vld [vmem:[#allocation11 + $0x468] sm:$0xff] }
 0x41a   : > { %1641 = vmatpush2.msra.mxu1 %v1581_v0  ;;  %v1737_v0 = vld [vmem:[#allocation8 + $0xbe8] sm:$0xff]  ;;  %1786 = vmatpush2.msra.mxu0 %v1738_v60  ;;  %v1839_v60 = vld [vmem:[#allocation11 + $0x460] sm:$0xff] }
 0x41b   : > { %1642 = vmatprep.subr.mxu1 %v1580_v2  ;;  %v1736_v2 = vld [vmem:[#allocation8 + $0xbe0] sm:$0xff]  ;;  %1787 = vmatprep.subr.mxu0 %v1737_v0  ;;  %v1838_v0 = vld [vmem:[#allocation11 + $0x458] sm:$0xff] }
 0x41c   : > { %1643 = vmatpush2.msra.mxu1 %v1579_v3  ;;  %v1735_v3 = vld [vmem:[#allocation8 + $0xbd8] sm:$0xff]  ;;  %1788 = vmatpush2.msra.mxu0 %v1736_v2  ;;  %v1837_v2 = vld [vmem:[#allocation11 + $0x450] sm:$0xff] }
 0x41d   : > { %1644 = vmatprep.subr.mxu1 %v1578_v4  ;;  %v1734_v4 = vld [vmem:[#allocation8 + $0xbd0] sm:$0xff]  ;;  %1789 = vmatprep.subr.mxu0 %v1735_v3  ;;  %v1836_v3 = vld [vmem:[#allocation11 + $0x448] sm:$0xff] }
 0x41e   : > { %1645 = vmatpush2.msra.mxu1 %v1577_v5  ;;  %v1733_v5 = vld [vmem:[#allocation8 + $0xbc8] sm:$0xff]  ;;  %1790 = vmatpush2.msra.mxu0 %v1734_v4  ;;  %v1835_v4 = vld [vmem:[#allocation11 + $0x440] sm:$0xff] }
 0x41f   : > { %1646 = vmatprep.subr.mxu1 %v1576_v7  ;;  %v1732_v7 = vld [vmem:[#allocation8 + $0xbc0] sm:$0xff]  ;;  %1791 = vmatprep.subr.mxu0 %v1733_v5  ;;  %v1834_v5 = vld [vmem:[#allocation11 + $0x438] sm:$0xff] }
 0x420   : > { %1647 = vmatpush2.msra.mxu1 %v1575_v8  ;;  %v1731_v8 = vld [vmem:[#allocation8 + $0xbb8] sm:$0xff]  ;;  %1792 = vmatpush2.msra.mxu0 %v1732_v7  ;;  %v1833_v7 = vld [vmem:[#allocation11 + $0x430] sm:$0xff] }
 0x421   : > { %1648 = vmatprep.subr.mxu1 %v1574_v9  ;;  %v1730_v9 = vld [vmem:[#allocation8 + $0xbb0] sm:$0xff]  ;;  %1793 = vmatprep.subr.mxu0 %v1731_v8  ;;  %v1832_v8 = vld [vmem:[#allocation11 + $0x428] sm:$0xff] }
 0x422   : > { %1649 = vmatpush2.msra.mxu1 %v1573_v6  ;;  %v1729_v6 = vld [vmem:[#allocation8 + $0xba8] sm:$0xff]  ;;  %1794 = vmatpush2.msra.mxu0 %v1730_v9  ;;  %v1831_v9 = vld [vmem:[#allocation11 + $0x420] sm:$0xff] }
 0x423   : > { %1650 = vmatprep.subr.mxu1 %v1572_v10  ;;  %v1728_v10 = vld [vmem:[#allocation8 + $0xba0] sm:$0xff]  ;;  %1795 = vmatprep.subr.mxu0 %v1729_v6  ;;  %v1830_v6 = vld [vmem:[#allocation11 + $0x418] sm:$0xff] }
 0x424   : > { %1651 = vmatpush2.msra.mxu1 %v1571_v11  ;;  %v1727_v11 = vld [vmem:[#allocation8 + $0xb98] sm:$0xff]  ;;  %1796 = vmatpush2.msra.mxu0 %v1728_v10  ;;  %v1829_v10 = vld [vmem:[#allocation11 + $0x410] sm:$0xff] }
 0x425   : > { %1652 = vmatprep.subr.mxu1 %v1570_v12  ;;  %v1726_v12 = vld [vmem:[#allocation8 + $0xb90] sm:$0xff]  ;;  %1797 = vmatprep.subr.mxu0 %v1727_v11  ;;  %v1828_v11 = vld [vmem:[#allocation11 + $0x408] sm:$0xff] }
 0x426   : > { %1653 = vmatpush2.msra.mxu1 %v1569_v13  ;;  %v1725_v13 = vld [vmem:[#allocation8 + $0xb88] sm:$0xff]  ;;  %1798 = vmatpush2.msra.mxu0 %v1726_v12  ;;  %v1827_v12 = vld [vmem:[#allocation11 + $0x400] sm:$0xff] }
 0x427   : > { %1654 = vmatprep.subr.mxu1 %v1568_v23  ;;  %v1724_v23 = vld [vmem:[#allocation8 + $0xb80] sm:$0xff]  ;;  %1799 = vmatprep.subr.mxu0 %v1725_v13  ;;  %v1890_v13 = vld [vmem:[#allocation11 + $0x5f8] sm:$0xff] }
 0x428   : > { %1655 = vmatpush2.msra.mxu1 %v1567_v14  ;;  %v1723_v14 = vld [vmem:[#allocation8 + $0xb78] sm:$0xff]  ;;  %1800 = vmatpush2.msra.mxu0 %v1724_v23  ;;  %v1889_v23 = vld [vmem:[#allocation11 + $0x5f0] sm:$0xff] }
 0x429   : > { %1656 = vmatprep.subr.mxu1 %v1566_v15  ;;  %v1722_v15 = vld [vmem:[#allocation8 + $0xb70] sm:$0xff]  ;;  %1801 = vmatprep.subr.mxu0 %v1723_v14  ;;  %v1888_v14 = vld [vmem:[#allocation11 + $0x5e8] sm:$0xff] }
 0x42a   : > { %1657 = vmatpush2.msra.mxu1 %v1565_v16  ;;  %v1721_v16 = vld [vmem:[#allocation8 + $0xb68] sm:$0xff]  ;;  %1802 = vmatpush2.msra.mxu0 %v1722_v15  ;;  %v1887_v15 = vld [vmem:[#allocation11 + $0x5e0] sm:$0xff] }
 0x42b   : > { %1658 = vmatprep.subr.mxu1 %v1564_v17  ;;  %v1720_v17 = vld [vmem:[#allocation8 + $0xb60] sm:$0xff]  ;;  %1803 = vmatprep.subr.mxu0 %v1721_v16  ;;  %v1515_v28 = vpop.f32.mrf.mxu0  ;;  %v1886_v16 = vld [vmem:[#allocation11 + $0x5d8] sm:$0xff] }
 0x42c   : > { %1659 = vmatpush2.msra.mxu1 %v1563_v18  ;;  %v1719_v18 = vld [vmem:[#allocation8 + $0xb58] sm:$0xff]  ;;  %1804 = vmatpush2.msra.mxu0 %v1720_v17  ;;  %v1516_v38 = vadd.f32 %v1515_v28, %v1442_v31  ;;  %v1885_v17 = vld [vmem:[#allocation11 + $0x5d0] sm:$0xff]  ;;  %v1875_v28 = vld [vmem:[#allocation11 + $0x580] sm:$0xff] }
 0x42d   : > { %1660 = vmatprep.subr.mxu1 %v1562_v19  ;;  %v1718_v19 = vld [vmem:[#allocation8 + $0xb50] sm:$0xff]  ;;  %1805 = vmatprep.subr.mxu0 %v1719_v18  ;;  %v1517_v35 = vpop.f32.mrf.mxu0  ;;  %v1884_v18 = vld [vmem:[#allocation11 + $0x5c8] sm:$0xff] }
 0x42e   : > { %1661 = vmatpush2.msra.mxu1 %v1561_v20  ;;  %v1717_v20 = vld [vmem:[#allocation8 + $0xb48] sm:$0xff]  ;;  %1806 = vmatpush2.msra.mxu0 %v1718_v19  ;;  %v1518_v40 = vadd.f32 %v1517_v35, %v1446_v34  ;;  %v1883_v19 = vld [vmem:[#allocation11 + $0x5c0] sm:$0xff]  ;;  %v1872_v31 = vld [vmem:[#allocation11 + $0x568] sm:$0xff] }
 0x42f   : > { %1662 = vmatprep.subr.mxu1 %v1560_v21  ;;  %v1716_v21 = vld [vmem:[#allocation8 + $0xb40] sm:$0xff]  ;;  %1807 = vmatprep.subr.mxu0 %v1717_v20  ;;  %v1882_v20 = vld [vmem:[#allocation11 + $0x5b8] sm:$0xff]  ;;  %v1715_v35 = vld [vmem:[#allocation8 + $0xb38] sm:$0xff] }
 0x430   : > { %1663 = vmatpush2.msra.mxu1 %v1559_v22  ;;  %1808 = vmatpush2.msra.mxu0 %v1716_v21  ;;  %v1286_v22 = vld [vmem:[#allocation10 + $0x6] sm:$0x3] }
 0x431   : > { %1664 = vmatprep.subr.mxu1 %v1558_v25  ;;  %v1291_v25 = vrot.slane %v1286_v22, %v5593_v63  ;;  %v1881_v21 = vld [vmem:[#allocation11 + $0x5b0] sm:$0xff]  ;;  %1809 = vmatprep.subr.mxu0 %v1715_v35 }
 0x432   : > { %1665 = vmatpush2.msra.mxu1 %v1557_v26  ;;  %v1295_v26 = vrot.slane %v1286_v22, %v5595_v1  ;;  %v1880_v22 = vld [vmem:[#allocation11 + $0x5a8] sm:$0xff]  ;;  %v1869_v34 = vld [vmem:[#allocation11 + $0x550] sm:$0xff] }
 0x433   : > { %1904 = vmatprep.subr.mxu1 %v1858_v29  ;;  %v1980_v35 = vld [vmem:[#allocation8 + $0xc00] sm:$0xff] }
 0x4b3   : > { %v1364_v24 = vpop.f32.mrf.mxu1 }
 0x4b4   : > { %v1365_v29 = vadd.f32 %v1364_v24, %v1291_v25  ;;  %v1879_v25 = vld [vmem:[#allocation11 + $0x5a0] sm:$0xff]  ;;  %v1876_v24 = vld [vmem:[#allocation11 + $0x588] sm:$0xff] }
 0x4b5   : > { %v1366_v30 = vpop.f32.mrf.mxu1 }
 0x4b6   : > { %v1369_v32 = vmax.f32 %v1365_v29, 0.0  ;;  %v1367_v33 = vadd.f32 %v1366_v30, %v1295_v26  ;;  %v1878_v26 = vld [vmem:[#allocation11 + $0x598] sm:$0xff]  ;;  %v1873_v30 = vld [vmem:[#allocation11 + $0x570] sm:$0xff] }
 0x4b7   : > { %v1874_v29 = vld [vmem:[#allocation11 + $0x578] sm:$0xff] }
 0x4b8   : > { %v1370_v36 = vmax.f32 %v1367_v33, 0.0  ;;  %v1520_v37 = vadd.f32 %v1369_v32, %v5627_v62  ;;  %v1852_v62 = vld [vmem:[#allocation11 + $0x4c8] sm:$0xff]  ;;  %v1871_v32 = vld [vmem:[#allocation11 + $0x560] sm:$0xff]  ;;  %v1870_v33 = vld [vmem:[#allocation11 + $0x558] sm:$0xff] }
 0x4ba   : > { %v1521_v39 = vadd.f32 %v1370_v36, %v5625_v61  ;;  %v5643_v42 = vadd.f32 %v1520_v37, %v1516_v38  ;;  %v1853_v61 = vld [vmem:[#allocation11 + $0x4d0] sm:$0xff]  ;;  %v1868_v36 = vld [vmem:[#allocation11 + $0x548] sm:$0xff]  ;;  %v1714_v37 = vld [vmem:[#allocation8 + $0xb30] sm:$0xff] }
 0x4bb   : > { %v1867_v38 = vld [vmem:[#allocation11 + $0x540] sm:$0xff]  ;;  %1810 = vmatpush2.msra.mxu0 %v1714_v37 }
 0x4bc   : > { %v5641_v41 = vadd.f32 %v1521_v39, %v1518_v40  ;;  %v1713_v39 = vld [vmem:[#allocation8 + $0xb28] sm:$0xff]  ;;  %v2042_v37 = vld [vmem:[#allocation8 + $0xdf0] sm:$0xff] }
 0x4bd   : > { %v1866_v40 = vld [vmem:[#allocation11 + $0x538] sm:$0xff]  ;;  %1811 = vmatprep.subr.mxu0 %v1713_v39  ;;  %v2040_v39 = vld [vmem:[#allocation8 + $0xde0] sm:$0xff] }
 0x4be   : > { %1666 = vmatprep.mubr.f32.mxu1 %v5641_v41 }
 0x4bf   : > { %1667 = vmatmul.mubr.f32.vlgmr.msra.gmra.mxu1 %v5643_v42 }
 0x4c0   : > { %1905 = vmatpush1.msra.mxu1 %v1857_v43  ;;  %1968 = vmatprep.mubr.f32.mxu1 %v5647_v47  ;;  %v1712_v43 = vld [vmem:[#allocation8 + $0xb20] sm:$0xff] }
 0x4c1   : > { %1906 = vmatprep.subr.mxu1 %v1856_v44  ;;  %v1865_v44 = vld [vmem:[#allocation11 + $0x530] sm:$0xff]  ;;  %1812 = vmatpush2.msra.mxu0 %v1712_v43  ;;  %v2038_v43 = vld [vmem:[#allocation8 + $0xdd0] sm:$0xff] }
 0x4c2   : > { %1907 = vmatpush1.msra.mxu1 %v1855_v45  ;;  %v1711_v45 = vld [vmem:[#allocation8 + $0xb18] sm:$0xff] }
 0x4c3   : > { %1908 = vmatprep.subr.mxu1 %v1854_v46  ;;  %v1864_v46 = vld [vmem:[#allocation11 + $0x528] sm:$0xff]  ;;  %1813 = vmatprep.subr.mxu0 %v1711_v45  ;;  %v2036_v45 = vld [vmem:[#allocation8 + $0xdc0] sm:$0xff] }
 0x4c4   : > { %1909 = vmatpush1.msra.mxu1 %v1853_v61  ;;  %v1710_v61 = vld [vmem:[#allocation8 + $0xb10] sm:$0xff] }
 0x4c5   : > { %1910 = vmatprep.subr.mxu1 %v1852_v62  ;;  %v1863_v62 = vld [vmem:[#allocation11 + $0x520] sm:$0xff]  ;;  %1814 = vmatpush2.msra.mxu0 %v1710_v61 }
 0x4c6   : > { %1911 = vmatpush1.msra.mxu1 %v1851_v48  ;;  %v1709_v48 = vld [vmem:[#allocation8 + $0xb08] sm:$0xff]  ;;  %v2034_v61 = vld [vmem:[#allocation8 + $0xdb0] sm:$0xff] }
 0x4c7   : > { %1912 = vmatprep.subr.mxu1 %v1850_v49  ;;  %v1862_v49 = vld [vmem:[#allocation11 + $0x518] sm:$0xff]  ;;  %1815 = vmatprep.subr.mxu0 %v1709_v48  ;;  %v2032_v48 = vld [vmem:[#allocation8 + $0xda0] sm:$0xff] }
 0x4c8   : > { %1913 = vmatpush1.msra.mxu1 %v1849_v50  ;;  %v1708_v50 = vld [vmem:[#allocation8 + $0xb00] sm:$0xff] }
 0x4c9   : > { %1914 = vmatprep.subr.mxu1 %v1848_v51  ;;  %v1861_v51 = vld [vmem:[#allocation11 + $0x510] sm:$0xff]  ;;  %1816 = vmatpush2.msra.mxu0 %v1708_v50  ;;  %v2030_v50 = vld [vmem:[#allocation8 + $0xd90] sm:$0xff] }
 0x4ca   : > { %1915 = vmatpush1.msra.mxu1 %v1847_v52  ;;  %v1860_v52 = vld [vmem:[#allocation11 + $0x508] sm:$0xff] }
 0x4cb   : > { %1916 = vmatprep.subr.mxu1 %v1846_v53  ;;  %v1859_v53 = vld [vmem:[#allocation11 + $0x500] sm:$0xff] }
 0x4cc   : > { %1917 = vmatpush1.msra.mxu1 %v1845_v54  ;;  %v2011_v54 = vld [vmem:[#allocation8 + $0xcf8] sm:$0xff] }
 0x4cd   : > { %1918 = vmatprep.subr.mxu1 %v1844_v55  ;;  %2057 = vmatprep.subr.mxu0 %v2011_v54  ;;  %v5650_v55 = vld [vmem:[#allocation3] sm:$0xff]  ;;  %v2026_v54 = vld [vmem:[#allocation8 + $0xd70] sm:$0xff] }
 0x4ce   : > { %1919 = vmatpush1.msra.mxu1 %v1843_v56  ;;  %v1590_v56 = vld [vmem:[#allocation10 + $0x8] sm:$0x3] }
 0x4cf   : > { %1920 = vmatprep.subr.mxu1 %v1842_v57  ;;  %v1595_v57 = vrot.slane %v1590_v56, %v5593_v63 }
 0x4d0   : > { %1921 = vmatpush1.msra.mxu1 %v1841_v58  ;;  %v1599_v58 = vrot.slane %v1590_v56, %v5595_v1  ;;  %v2025_v56 = vld [vmem:[#allocation8 + $0xd68] sm:$0xff] }
 0x4d1   : > { %1922 = vmatprep.subr.mxu1 %v1840_v59 }
 0x4d2   : > { %1923 = vmatpush1.msra.mxu1 %v1839_v60 }
 0x4d3   : > { %1924 = vmatprep.subr.mxu1 %v1838_v0 }
 0x4d4   : > { %1925 = vmatpush1.msra.mxu1 %v1837_v2 }
 0x4d5   : > { %1926 = vmatprep.subr.mxu1 %v1836_v3 }
 0x4d6   : > { %1927 = vmatpush1.msra.mxu1 %v1835_v4 }
 0x4d7   : > { %1928 = vmatprep.subr.mxu1 %v1834_v5  ;;  %v2010_v5 = vld [vmem:[#allocation8 + $0xcf0] sm:$0xff] }
 0x4d8   : > { %1929 = vmatpush1.msra.mxu1 %v1833_v7  ;;  %v2009_v7 = vld [vmem:[#allocation8 + $0xce8] sm:$0xff] }
 0x4d9   : > { %1930 = vmatprep.subr.mxu1 %v1832_v8  ;;  %v2008_v8 = vld [vmem:[#allocation8 + $0xce0] sm:$0xff] }
 0x4da   : > { %1931 = vmatpush1.msra.mxu1 %v1831_v9  ;;  %v2007_v9 = vld [vmem:[#allocation8 + $0xcd8] sm:$0xff] }
 0x4db   : > { %1932 = vmatprep.subr.mxu1 %v1830_v6  ;;  %v2006_v6 = vld [vmem:[#allocation8 + $0xcd0] sm:$0xff] }
 0x4dc   : > { %1933 = vmatpush1.msra.mxu1 %v1829_v10  ;;  %v2005_v10 = vld [vmem:[#allocation8 + $0xcc8] sm:$0xff] }
 0x4dd   : > { %1934 = vmatprep.subr.mxu1 %v1828_v11  ;;  %v2004_v11 = vld [vmem:[#allocation8 + $0xcc0] sm:$0xff] }
 0x4de   : > { %1935 = vmatpush1.msra.mxu1 %v1827_v12  ;;  %v2003_v12 = vld [vmem:[#allocation8 + $0xcb8] sm:$0xff] }
 0x4df   : > { %1936 = vmatprep.subr.mxu1 %v1890_v13  ;;  %v2002_v13 = vld [vmem:[#allocation8 + $0xcb0] sm:$0xff] }
 0x4e0   : > { %1937 = vmatpush2.msra.mxu1 %v1889_v23  ;;  %v2001_v23 = vld [vmem:[#allocation8 + $0xca8] sm:$0xff] }
 0x4e1   : > { %1938 = vmatprep.subr.mxu1 %v1888_v14  ;;  %v2000_v14 = vld [vmem:[#allocation8 + $0xca0] sm:$0xff] }
 0x4e2   : > { %1939 = vmatpush2.msra.mxu1 %v1887_v15  ;;  %v1999_v15 = vld [vmem:[#allocation8 + $0xc98] sm:$0xff] }
 0x4e3   : > { %1940 = vmatprep.subr.mxu1 %v1886_v16  ;;  %v1998_v16 = vld [vmem:[#allocation8 + $0xc90] sm:$0xff] }
 0x4e4   : > { %1941 = vmatpush2.msra.mxu1 %v1885_v17  ;;  %v1997_v17 = vld [vmem:[#allocation8 + $0xc88] sm:$0xff] }
 0x4e5   : > { %1942 = vmatprep.subr.mxu1 %v1884_v18  ;;  %v1996_v18 = vld [vmem:[#allocation8 + $0xc80] sm:$0xff] }
 0x4e6   : > { %1943 = vmatpush2.msra.mxu1 %v1883_v19  ;;  %v1995_v19 = vld [vmem:[#allocation8 + $0xc78] sm:$0xff] }
 0x4e7   : > { %1944 = vmatprep.subr.mxu1 %v1882_v20  ;;  %v1994_v20 = vld [vmem:[#allocation8 + $0xc70] sm:$0xff] }
 0x4e8   : > { %1945 = vmatpush2.msra.mxu1 %v1881_v21  ;;  %v1993_v21 = vld [vmem:[#allocation8 + $0xc68] sm:$0xff] }
 0x4e9   : > { %1946 = vmatprep.subr.mxu1 %v1880_v22  ;;  %v1992_v22 = vld [vmem:[#allocation8 + $0xc60] sm:$0xff] }
 0x4ea   : > { %1947 = vmatpush2.msra.mxu1 %v1879_v25  ;;  %v1991_v25 = vld [vmem:[#allocation8 + $0xc58] sm:$0xff] }
 0x4eb   : > { %1948 = vmatprep.subr.mxu1 %v1878_v26  ;;  %v1990_v26 = vld [vmem:[#allocation8 + $0xc50] sm:$0xff] }
 0x4ec   : > { %1949 = vmatpush2.msra.mxu1 %v1877_v27  ;;  %v1989_v27 = vld [vmem:[#allocation8 + $0xc48] sm:$0xff] }
 0x4ed   : > { %1950 = vmatprep.subr.mxu1 %v1876_v24  ;;  %v1988_v24 = vld [vmem:[#allocation8 + $0xc40] sm:$0xff] }
 0x4ee   : > { %1951 = vmatpush2.msra.mxu1 %v1875_v28  ;;  %v1987_v28 = vld [vmem:[#allocation8 + $0xc38] sm:$0xff] }
 0x4ef   : > { %1952 = vmatprep.subr.mxu1 %v1874_v29  ;;  %v1986_v29 = vld [vmem:[#allocation8 + $0xc30] sm:$0xff] }
 0x4f0   : > { %1953 = vmatpush2.msra.mxu1 %v1873_v30  ;;  %v1985_v30 = vld [vmem:[#allocation8 + $0xc28] sm:$0xff] }
 0x4f1   : > { %1954 = vmatprep.subr.mxu1 %v1872_v31  ;;  %v1984_v31 = vld [vmem:[#allocation8 + $0xc20] sm:$0xff] }
 0x4f2   : > { %1955 = vmatpush2.msra.mxu1 %v1871_v32  ;;  %v1983_v32 = vld [vmem:[#allocation8 + $0xc18] sm:$0xff] }
 0x4f3   : > { %1956 = vmatprep.subr.mxu1 %v1870_v33  ;;  %v1982_v33 = vld [vmem:[#allocation8 + $0xc10] sm:$0xff] }
 0x4f4   : > { %1957 = vmatpush2.msra.mxu1 %v1869_v34  ;;  %v1981_v34 = vld [vmem:[#allocation8 + $0xc08] sm:$0xff] }
 0x4f5   : > { %1958 = vmatprep.subr.mxu1 %v1868_v36  ;;  %v2043_v36 = vld [vmem:[#allocation8 + $0xdf8] sm:$0xff] }
 0x4f6   : > { %1959 = vmatpush2.msra.mxu1 %v1867_v38  ;;  %v2041_v38 = vld [vmem:[#allocation8 + $0xde8] sm:$0xff] }
 0x4f7   : > { %1960 = vmatprep.subr.mxu1 %v1866_v40  ;;  %v2039_v40 = vld [vmem:[#allocation8 + $0xdd8] sm:$0xff] }
 0x4f8   : > { %1961 = vmatpush2.msra.mxu1 %v1865_v44  ;;  %v2037_v44 = vld [vmem:[#allocation8 + $0xdc8] sm:$0xff] }
 0x4f9   : > { %1962 = vmatprep.subr.mxu1 %v1864_v46  ;;  %v2035_v46 = vld [vmem:[#allocation8 + $0xdb8] sm:$0xff] }
 0x4fa   : > { %1963 = vmatpush2.msra.mxu1 %v1863_v62  ;;  %v2033_v62 = vld [vmem:[#allocation8 + $0xda8] sm:$0xff] }
 0x4fb   : > { %1964 = vmatprep.subr.mxu1 %v1862_v49  ;;  %v2031_v49 = vld [vmem:[#allocation8 + $0xd98] sm:$0xff] }
 0x4fc   : > { %1965 = vmatpush2.msra.mxu1 %v1861_v51  ;;  %v2029_v51 = vld [vmem:[#allocation8 + $0xd88] sm:$0xff] }
 0x4fd   : > { %1966 = vmatprep.subr.mxu1 %v1860_v52  ;;  %v2028_v52 = vld [vmem:[#allocation8 + $0xd80] sm:$0xff] }
 0x4fe   : > { %1967 = vmatpush2.msra.mxu1 %v1859_v53  ;;  %v2027_v53 = vld [vmem:[#allocation8 + $0xd78] sm:$0xff] }
 0x4ff   : > { %1969 = vmatmul.mubr.f32.vlgmr.msra.gmra.mxu1 %v5650_v55 }
 0x57f   : > { %v1668_v59 = vpop.f32.mrf.mxu1 }
 0x580   : > { %v1669_v60 = vadd.f32 %v1668_v59, %v1595_v57  ;;  %v2024_v57 = vld [vmem:[#allocation8 + $0xd60] sm:$0xff]  ;;  %v2022_v59 = vld [vmem:[#allocation8 + $0xd50] sm:$0xff] }
 0x581   : > { %v1670_v0 = vpop.f32.mrf.mxu1 }
 0x582   : > { %v1671_v2 = vadd.f32 %v1670_v0, %v1599_v58  ;;  %v1673_v4 = vmax.f32 %v1669_v60, 0.0  ;;  %v2023_v58 = vld [vmem:[#allocation8 + $0xd58] sm:$0xff]  ;;  %v2021_v60 = vld [vmem:[#allocation8 + $0xd48] sm:$0xff]  ;;  %v2020_v0 = vld [vmem:[#allocation8 + $0xd40] sm:$0xff] }
 0x584   : > { %v1674_v3 = vmax.f32 %v1671_v2, 0.0  ;;  %v2019_v2 = vld [vmem:[#allocation8 + $0xd38] sm:$0xff] }
 0x586   : > { %1817 = vmatprep.mubr.f32.mxu0 %v1674_v3  ;;  %v2018_v3 = vld [vmem:[#allocation8 + $0xd30] sm:$0xff] }
 0x587   : > { %1818 = vmatmul.mubr.f32.vlgmr.msra.gmra.mxu0 %v1673_v4  ;;  %v2017_v4 = vld [vmem:[#allocation8 + $0xd28] sm:$0xff] }
 0x588   : > { %2058 = vmatpush1.msra.mxu0 %v2010_v5  ;;  %v2016_v5 = vld [vmem:[#allocation8 + $0xd20] sm:$0xff] }
 0x589   : > { %2059 = vmatprep.subr.mxu0 %v2009_v7  ;;  %v2015_v7 = vld [vmem:[#allocation8 + $0xd18] sm:$0xff] }
 0x58a   : > { %2060 = vmatpush1.msra.mxu0 %v2008_v8  ;;  %v2014_v8 = vld [vmem:[#allocation8 + $0xd10] sm:$0xff] }
 0x58b   : > { %2061 = vmatprep.subr.mxu0 %v2007_v9  ;;  %v2013_v9 = vld [vmem:[#allocation8 + $0xd08] sm:$0xff] }
 0x58c   : > { %2062 = vmatpush1.msra.mxu0 %v2006_v6  ;;  %v2012_v6 = vld [vmem:[#allocation8 + $0xd00] sm:$0xff] }
 0x58d   : > { %2063 = vmatprep.subr.mxu0 %v2005_v10  ;;  %v2162_v10 = vld [vmem:[#allocation8 + $0xef8] sm:$0xff] }
 0x58e   : > { %2064 = vmatpush1.msra.mxu0 %v2004_v11  ;;  %v2161_v11 = vld [vmem:[#allocation8 + $0xef0] sm:$0xff]  ;;  %2208 = vmatprep.subr.mxu1 %v2162_v10 }
 0x58f   : > { %2065 = vmatprep.subr.mxu0 %v2003_v12  ;;  %v2160_v12 = vld [vmem:[#allocation8 + $0xee8] sm:$0xff]  ;;  %2209 = vmatpush1.msra.mxu1 %v2161_v11 }
 0x590   : > { %2066 = vmatpush1.msra.mxu0 %v2002_v13  ;;  %v2313_v13 = vld [vmem:[#allocation11 + $0x6f8] sm:$0xff]  ;;  %2210 = vmatprep.subr.mxu1 %v2160_v12  ;;  %v1892_v12 = vld [vmem:[#allocation13 + $0x4] sm:$0x3] }
 0x591   : > { %2067 = vmatprep.subr.mxu0 %v2001_v23  ;;  %v2159_v23 = vld [vmem:[#allocation8 + $0xee0] sm:$0xff] }
 0x592   : > { %2068 = vmatpush1.msra.mxu0 %v2000_v14  ;;  %v2158_v14 = vld [vmem:[#allocation8 + $0xed8] sm:$0xff]  ;;  %2211 = vmatpush1.msra.mxu1 %v2159_v23 }
 0x593   : > { %2069 = vmatprep.subr.mxu0 %v1999_v15  ;;  %v2157_v15 = vld [vmem:[#allocation8 + $0xed0] sm:$0xff]  ;;  %2212 = vmatprep.subr.mxu1 %v2158_v14 }
 0x594   : > { %2070 = vmatpush1.msra.mxu0 %v1998_v16  ;;  %v2156_v16 = vld [vmem:[#allocation8 + $0xec8] sm:$0xff]  ;;  %2213 = vmatpush1.msra.mxu1 %v2157_v15 }
 0x595   : > { %2071 = vmatprep.subr.mxu0 %v1997_v17  ;;  %v2155_v17 = vld [vmem:[#allocation8 + $0xec0] sm:$0xff]  ;;  %2214 = vmatprep.subr.mxu1 %v2156_v16  ;;  %v1897_v16 = vrot.slane %v1892_v12, %v5593_v63 }
 0x596   : > { %2072 = vmatpush1.msra.mxu0 %v1996_v18  ;;  %v2154_v18 = vld [vmem:[#allocation8 + $0xeb8] sm:$0xff]  ;;  %2215 = vmatpush1.msra.mxu1 %v2155_v17 }
 0x597   : > { %2073 = vmatprep.subr.mxu0 %v1995_v19  ;;  %v2153_v19 = vld [vmem:[#allocation8 + $0xeb0] sm:$0xff]  ;;  %2216 = vmatprep.subr.mxu1 %v2154_v18 }
 0x598   : > { %2074 = vmatpush1.msra.mxu0 %v1994_v20  ;;  %v2152_v20 = vld [vmem:[#allocation8 + $0xea8] sm:$0xff]  ;;  %2217 = vmatpush1.msra.mxu1 %v2153_v19  ;;  %v1901_v19 = vrot.slane %v1892_v12, %v5595_v1  ;;  %v2332_v12 = vld [vmem:[#allocation11 + $0x790] sm:$0xff] }
 0x599   : > { %2075 = vmatprep.subr.mxu0 %v1993_v21  ;;  %v2151_v21 = vld [vmem:[#allocation8 + $0xea0] sm:$0xff]  ;;  %2218 = vmatprep.subr.mxu1 %v2152_v20 }
 0x59a   : > { %2076 = vmatpush1.msra.mxu0 %v1992_v22  ;;  %v2150_v22 = vld [vmem:[#allocation8 + $0xe98] sm:$0xff]  ;;  %2219 = vmatpush1.msra.mxu1 %v2151_v21 }
 0x59b   : > { %2077 = vmatprep.subr.mxu0 %v1991_v25  ;;  %v2149_v25 = vld [vmem:[#allocation8 + $0xe90] sm:$0xff]  ;;  %2220 = vmatprep.subr.mxu1 %v2150_v22 }
 0x59c   : > { %2078 = vmatpush1.msra.mxu0 %v1990_v26  ;;  %v2148_v26 = vld [vmem:[#allocation8 + $0xe88] sm:$0xff]  ;;  %2221 = vmatpush1.msra.mxu1 %v2149_v25 }
 0x59d   : > { %2079 = vmatprep.subr.mxu0 %v1989_v27  ;;  %v2147_v27 = vld [vmem:[#allocation8 + $0xe80] sm:$0xff]  ;;  %2222 = vmatprep.subr.mxu1 %v2148_v26 }
 0x59e   : > { %2080 = vmatpush1.msra.mxu0 %v1988_v24  ;;  %v2146_v24 = vld [vmem:[#allocation8 + $0xe78] sm:$0xff]  ;;  %2223 = vmatpush1.msra.mxu1 %v2147_v27 }
 0x59f   : > { %2081 = vmatprep.subr.mxu0 %v1987_v28  ;;  %v2145_v28 = vld [vmem:[#allocation8 + $0xe70] sm:$0xff]  ;;  %2224 = vmatprep.subr.mxu1 %v2146_v24 }
 0x5a0   : > { %2082 = vmatpush1.msra.mxu0 %v1986_v29  ;;  %v2144_v29 = vld [vmem:[#allocation8 + $0xe68] sm:$0xff]  ;;  %2225 = vmatpush1.msra.mxu1 %v2145_v28 }
 0x5a1   : > { %2083 = vmatprep.subr.mxu0 %v1985_v30  ;;  %v2143_v30 = vld [vmem:[#allocation8 + $0xe60] sm:$0xff]  ;;  %2226 = vmatprep.subr.mxu1 %v2144_v29 }
 0x5a2   : > { %2084 = vmatpush1.msra.mxu0 %v1984_v31  ;;  %v2142_v31 = vld [vmem:[#allocation8 + $0xe58] sm:$0xff]  ;;  %2227 = vmatpush1.msra.mxu1 %v2143_v30  ;;  %v2312_v29 = vld [vmem:[#allocation11 + $0x6f0] sm:$0xff] }
 0x5a3   : > { %2085 = vmatprep.subr.mxu0 %v1983_v32  ;;  %v2141_v32 = vld [vmem:[#allocation8 + $0xe50] sm:$0xff]  ;;  %2228 = vmatprep.subr.mxu1 %v2142_v31  ;;  %v2311_v30 = vld [vmem:[#allocation11 + $0x6e8] sm:$0xff] }
 0x5a4   : > { %2086 = vmatpush1.msra.mxu0 %v1982_v33  ;;  %v2140_v33 = vld [vmem:[#allocation8 + $0xe48] sm:$0xff]  ;;  %2229 = vmatpush1.msra.mxu1 %v2141_v32  ;;  %v2310_v31 = vld [vmem:[#allocation11 + $0x6e0] sm:$0xff] }
 0x5a5   : > { %2087 = vmatprep.subr.mxu0 %v1981_v34  ;;  %v2139_v34 = vld [vmem:[#allocation8 + $0xe40] sm:$0xff]  ;;  %2230 = vmatprep.subr.mxu1 %v2140_v33  ;;  %v2309_v32 = vld [vmem:[#allocation11 + $0x6d8] sm:$0xff]  ;;  %v2306_v33 = vld [vmem:[#allocation11 + $0x6c0] sm:$0xff] }
 0x5a6   : > { %2088 = vmatpush1.msra.mxu0 %v1980_v35  ;;  %v2138_v35 = vld [vmem:[#allocation8 + $0xe38] sm:$0xff]  ;;  %2231 = vmatpush1.msra.mxu1 %v2139_v34  ;;  %v2305_v34 = vld [vmem:[#allocation11 + $0x6b8] sm:$0xff] }
 0x5a7   : > { %2089 = vmatprep.subr.mxu0 %v2043_v36  ;;  %v2137_v36 = vld [vmem:[#allocation8 + $0xe30] sm:$0xff]  ;;  %2232 = vmatprep.subr.mxu1 %v2138_v35  ;;  %v2304_v35 = vld [vmem:[#allocation11 + $0x6b0] sm:$0xff] }
 0x5a8   : > { %2090 = vmatpush2.msra.mxu0 %v2042_v37  ;;  %v2136_v37 = vld [vmem:[#allocation8 + $0xe28] sm:$0xff]  ;;  %2233 = vmatpush1.msra.mxu1 %v2137_v36  ;;  %v2303_v36 = vld [vmem:[#allocation11 + $0x6a8] sm:$0xff] }
 0x5a9   : > { %2091 = vmatprep.subr.mxu0 %v2041_v38  ;;  %v2135_v38 = vld [vmem:[#allocation8 + $0xe20] sm:$0xff]  ;;  %2234 = vmatprep.subr.mxu1 %v2136_v37  ;;  %v2302_v37 = vld [vmem:[#allocation11 + $0x6a0] sm:$0xff] }
 0x5aa   : > { %2092 = vmatpush2.msra.mxu0 %v2040_v39  ;;  %v2134_v39 = vld [vmem:[#allocation8 + $0xe18] sm:$0xff]  ;;  %2235 = vmatpush1.msra.mxu1 %v2135_v38  ;;  %v2301_v38 = vld [vmem:[#allocation11 + $0x698] sm:$0xff] }
 0x5ab   : > { %2093 = vmatprep.subr.mxu0 %v2039_v40  ;;  %v2133_v40 = vld [vmem:[#allocation8 + $0xe10] sm:$0xff]  ;;  %2236 = vmatprep.subr.mxu1 %v2134_v39  ;;  %v2300_v39 = vld [vmem:[#allocation11 + $0x690] sm:$0xff] }
 0x5ac   : > { %2094 = vmatpush2.msra.mxu0 %v2038_v43  ;;  %v2132_v43 = vld [vmem:[#allocation8 + $0xe08] sm:$0xff]  ;;  %2237 = vmatpush1.msra.mxu1 %v2133_v40  ;;  %v2298_v40 = vld [vmem:[#allocation11 + $0x680] sm:$0xff] }
 0x5ad   : > { %2095 = vmatprep.subr.mxu0 %v2037_v44  ;;  %v2131_v44 = vld [vmem:[#allocation8 + $0xe00] sm:$0xff]  ;;  %2238 = vmatprep.subr.mxu1 %v2132_v43  ;;  %v2297_v43 = vld [vmem:[#allocation11 + $0x678] sm:$0xff] }
 0x5ae   : > { %2096 = vmatpush2.msra.mxu0 %v2036_v45  ;;  %v2194_v45 = vld [vmem:[#allocation8 + $0xff8] sm:$0xff]  ;;  %2239 = vmatpush1.msra.mxu1 %v2131_v44  ;;  %v2296_v44 = vld [vmem:[#allocation11 + $0x670] sm:$0xff] }
 0x5af   : > { %2097 = vmatprep.subr.mxu0 %v2035_v46  ;;  %v2193_v46 = vld [vmem:[#allocation8 + $0xff0] sm:$0xff]  ;;  %2240 = vmatprep.subr.mxu1 %v2194_v45  ;;  %v2295_v45 = vld [vmem:[#allocation11 + $0x668] sm:$0xff] }
 0x5b0   : > { %2098 = vmatpush2.msra.mxu0 %v2034_v61  ;;  %v2192_v61 = vld [vmem:[#allocation8 + $0xfe8] sm:$0xff]  ;;  %2241 = vmatpush2.msra.mxu1 %v2193_v46  ;;  %v2294_v46 = vld [vmem:[#allocation11 + $0x660] sm:$0xff] }
 0x5b1   : > { %2099 = vmatprep.subr.mxu0 %v2033_v62  ;;  %v2191_v62 = vld [vmem:[#allocation8 + $0xfe0] sm:$0xff]  ;;  %2242 = vmatprep.subr.mxu1 %v2192_v61  ;;  %v2293_v61 = vld [vmem:[#allocation11 + $0x658] sm:$0xff] }
 0x5b2   : > { %2100 = vmatpush2.msra.mxu0 %v2032_v48  ;;  %v2190_v48 = vld [vmem:[#allocation8 + $0xfd8] sm:$0xff]  ;;  %2243 = vmatpush2.msra.mxu1 %v2191_v62  ;;  %v2292_v62 = vld [vmem:[#allocation11 + $0x650] sm:$0xff] }
 0x5b3   : > { %2101 = vmatprep.subr.mxu0 %v2031_v49  ;;  %v2189_v49 = vld [vmem:[#allocation8 + $0xfd0] sm:$0xff]  ;;  %2244 = vmatprep.subr.mxu1 %v2190_v48  ;;  %v2291_v48 = vld [vmem:[#allocation11 + $0x648] sm:$0xff] }
 0x5b4   : > { %2102 = vmatpush2.msra.mxu0 %v2030_v50  ;;  %v2188_v50 = vld [vmem:[#allocation8 + $0xfc8] sm:$0xff]  ;;  %2245 = vmatpush2.msra.mxu1 %v2189_v49  ;;  %v2290_v49 = vld [vmem:[#allocation11 + $0x640] sm:$0xff] }
 0x5b5   : > { %2103 = vmatprep.subr.mxu0 %v2029_v51  ;;  %v2187_v51 = vld [vmem:[#allocation8 + $0xfc0] sm:$0xff]  ;;  %2246 = vmatprep.subr.mxu1 %v2188_v50  ;;  %v2289_v50 = vld [vmem:[#allocation11 + $0x638] sm:$0xff] }
 0x5b6   : > { %2104 = vmatpush2.msra.mxu0 %v2028_v52  ;;  %v2186_v52 = vld [vmem:[#allocation8 + $0xfb8] sm:$0xff]  ;;  %2247 = vmatpush2.msra.mxu1 %v2187_v51  ;;  %v2288_v51 = vld [vmem:[#allocation11 + $0x630] sm:$0xff] }
 0x5b7   : > { %2105 = vmatprep.subr.mxu0 %v2027_v53  ;;  %v2185_v53 = vld [vmem:[#allocation8 + $0xfb0] sm:$0xff]  ;;  %2248 = vmatprep.subr.mxu1 %v2186_v52  ;;  %v2287_v52 = vld [vmem:[#allocation11 + $0x628] sm:$0xff] }
 0x5b8   : > { %2106 = vmatpush2.msra.mxu0 %v2026_v54  ;;  %v2184_v54 = vld [vmem:[#allocation8 + $0xfa8] sm:$0xff]  ;;  %2249 = vmatpush2.msra.mxu1 %v2185_v53  ;;  %v2286_v53 = vld [vmem:[#allocation11 + $0x620] sm:$0xff] }
 0x5b9   : > { %2107 = vmatprep.subr.mxu0 %v2025_v56  ;;  %v2183_v56 = vld [vmem:[#allocation8 + $0xfa0] sm:$0xff]  ;;  %2250 = vmatprep.subr.mxu1 %v2184_v54  ;;  %v2285_v54 = vld [vmem:[#allocation11 + $0x618] sm:$0xff] }
 0x5ba   : > { %2108 = vmatpush2.msra.mxu0 %v2024_v57  ;;  %v2182_v57 = vld [vmem:[#allocation8 + $0xf98] sm:$0xff]  ;;  %2251 = vmatpush2.msra.mxu1 %v2183_v56  ;;  %v2284_v56 = vld [vmem:[#allocation11 + $0x610] sm:$0xff] }
 0x5bb   : > { %2109 = vmatprep.subr.mxu0 %v2023_v58  ;;  %v2181_v58 = vld [vmem:[#allocation8 + $0xf90] sm:$0xff]  ;;  %2252 = vmatprep.subr.mxu1 %v2182_v57  ;;  %v2283_v57 = vld [vmem:[#allocation11 + $0x608] sm:$0xff] }
 0x5bc   : > { %2110 = vmatpush2.msra.mxu0 %v2022_v59  ;;  %v2180_v59 = vld [vmem:[#allocation8 + $0xf88] sm:$0xff]  ;;  %2253 = vmatpush2.msra.mxu1 %v2181_v58  ;;  %v2282_v58 = vld [vmem:[#allocation11 + $0x600] sm:$0xff] }
 0x5bd   : > { %2111 = vmatprep.subr.mxu0 %v2021_v60  ;;  %v2179_v60 = vld [vmem:[#allocation8 + $0xf80] sm:$0xff]  ;;  %2254 = vmatprep.subr.mxu1 %v2180_v59  ;;  %v2345_v59 = vld [vmem:[#allocation11 + $0x7f8] sm:$0xff] }
 0x5be   : > { %2112 = vmatpush2.msra.mxu0 %v2020_v0  ;;  %v2178_v0 = vld [vmem:[#allocation8 + $0xf78] sm:$0xff]  ;;  %2255 = vmatpush2.msra.mxu1 %v2179_v60  ;;  %v2344_v60 = vld [vmem:[#allocation11 + $0x7f0] sm:$0xff] }
 0x5bf   : > { %2113 = vmatprep.subr.mxu0 %v2019_v2  ;;  %v2177_v2 = vld [vmem:[#allocation8 + $0xf70] sm:$0xff]  ;;  %2256 = vmatprep.subr.mxu1 %v2178_v0  ;;  %v1970_v23 = vpop.f32.mrf.mxu1  ;;  %v2343_v0 = vld [vmem:[#allocation11 + $0x7e8] sm:$0xff] }
 0x5c0   : > { %2114 = vmatpush2.msra.mxu0 %v2018_v3  ;;  %v2176_v3 = vld [vmem:[#allocation8 + $0xf68] sm:$0xff]  ;;  %2257 = vmatpush2.msra.mxu1 %v2177_v2  ;;  %v1971_v25 = vadd.f32 %v1970_v23, %v1897_v16  ;;  %v2342_v2 = vld [vmem:[#allocation11 + $0x7e0] sm:$0xff]  ;;  %v2327_v16 = vld [vmem:[#allocation11 + $0x768] sm:$0xff] }
 0x5c1   : > { %2115 = vmatprep.subr.mxu0 %v2017_v4  ;;  %v2175_v4 = vld [vmem:[#allocation8 + $0xf60] sm:$0xff]  ;;  %2258 = vmatprep.subr.mxu1 %v2176_v3  ;;  %v1972_v20 = vpop.f32.mrf.mxu1  ;;  %v2341_v3 = vld [vmem:[#allocation11 + $0x7d8] sm:$0xff]  ;;  %v2330_v23 = vld [vmem:[#allocation11 + $0x780] sm:$0xff] }
 0x5c2   : > { %2116 = vmatpush2.msra.mxu0 %v2016_v5  ;;  %v2174_v5 = vld [vmem:[#allocation8 + $0xf58] sm:$0xff]  ;;  %2259 = vmatpush2.msra.mxu1 %v2175_v4  ;;  %v1973_v27 = vadd.f32 %v1972_v20, %v1901_v19  ;;  %v2340_v4 = vld [vmem:[#allocation11 + $0x7d0] sm:$0xff] }
 0x5c3   : > { %2117 = vmatprep.subr.mxu0 %v2015_v7  ;;  %v2173_v7 = vld [vmem:[#allocation8 + $0xf50] sm:$0xff]  ;;  %2260 = vmatprep.subr.mxu1 %v2174_v5  ;;  %v2339_v5 = vld [vmem:[#allocation11 + $0x7c8] sm:$0xff]  ;;  %v2324_v19 = vld [vmem:[#allocation11 + $0x750] sm:$0xff] }
 0x5c4   : > { %2118 = vmatpush2.msra.mxu0 %v2014_v8  ;;  %v2172_v8 = vld [vmem:[#allocation8 + $0xf48] sm:$0xff]  ;;  %2261 = vmatpush2.msra.mxu1 %v2173_v7  ;;  %v2338_v7 = vld [vmem:[#allocation11 + $0x7c0] sm:$0xff]  ;;  %v2170_v20 = vld [vmem:[#allocation8 + $0xf38] sm:$0xff] }
 0x5c5   : > { %2119 = vmatprep.subr.mxu0 %v2013_v9  ;;  %v2171_v9 = vld [vmem:[#allocation8 + $0xf40] sm:$0xff]  ;;  %2262 = vmatprep.subr.mxu1 %v2172_v8  ;;  %v2337_v8 = vld [vmem:[#allocation11 + $0x7b8] sm:$0xff] }
 0x5c6   : > { %2120 = vmatpush2.msra.mxu0 %v2012_v6  ;;  %2263 = vmatpush2.msra.mxu1 %v2171_v9  ;;  %v1741_v6 = vld [vmem:[#allocation10 + $0xa] sm:$0x3]  ;;  %v2336_v9 = vld [vmem:[#allocation11 + $0x7b0] sm:$0xff] }
 0x5c7   : > { %2359 = vmatprep.subr.mxu0 %v2313_v13  ;;  %v1746_v10 = vrot.slane %v1741_v6, %v5593_v63  ;;  %v1750_v11 = vrot.slane %v1741_v6, %v5595_v1  ;;  %v2335_v6 = vld [vmem:[#allocation11 + $0x7a8] sm:$0xff]  ;;  %2264 = vmatprep.subr.mxu1 %v2170_v20 }
 0x647   : > { %v1819_v13 = vpop.f32.mrf.mxu0 }
 0x648   : > { %v1820_v14 = vadd.f32 %v1819_v13, %v1746_v10  ;;  %v2334_v10 = vld [vmem:[#allocation11 + $0x7a0] sm:$0xff]  ;;  %v2331_v13 = vld [vmem:[#allocation11 + $0x788] sm:$0xff] }
 0x649   : > { %v1821_v15 = vpop.f32.mrf.mxu0 }
 0x64a   : > { %v1824_v17 = vmax.f32 %v1820_v14, 0.0  ;;  %v1822_v18 = vadd.f32 %v1821_v15, %v1750_v11  ;;  %v2333_v11 = vld [vmem:[#allocation11 + $0x798] sm:$0xff]  ;;  %v2328_v15 = vld [vmem:[#allocation11 + $0x770] sm:$0xff] }
 0x64b   : > { %v2329_v14 = vld [vmem:[#allocation11 + $0x778] sm:$0xff] }
 0x64c   : > { %v1825_v21 = vmax.f32 %v1822_v18, 0.0  ;;  %v1975_v22 = vadd.f32 %v1824_v17, %v5643_v42  ;;  %v2308_v42 = vld [vmem:[#allocation11 + $0x6d0] sm:$0xff]  ;;  %v2326_v17 = vld [vmem:[#allocation11 + $0x760] sm:$0xff]  ;;  %v2325_v18 = vld [vmem:[#allocation11 + $0x758] sm:$0xff] }
 0x64e   : > { %v1976_v26 = vadd.f32 %v1825_v21, %v5641_v41  ;;  %v5663_v28 = vadd.f32 %v1975_v22, %v1971_v25  ;;  %v2307_v41 = vld [vmem:[#allocation11 + $0x6c8] sm:$0xff]  ;;  %v2169_v22 = vld [vmem:[#allocation8 + $0xf30] sm:$0xff] }
 0x64f   : > { %v2323_v21 = vld [vmem:[#allocation11 + $0x748] sm:$0xff]  ;;  %v2322_v25 = vld [vmem:[#allocation11 + $0x740] sm:$0xff]  ;;  %2265 = vmatpush2.msra.mxu1 %v2169_v22 }
 0x650   : > { %v5661_v24 = vadd.f32 %v1976_v26, %v1973_v27  ;;  %v2168_v26 = vld [vmem:[#allocation8 + $0xf28] sm:$0xff] }
 0x651   : > { %v2321_v27 = vld [vmem:[#allocation11 + $0x738] sm:$0xff]  ;;  %2266 = vmatprep.subr.mxu1 %v2168_v26 }
 0x652   : > { %2121 = vmatprep.mubr.f32.mxu0 %v5661_v24 }
 0x653   : > { %2122 = vmatmul.mubr.f32.vlgmr.msra.gmra.mxu0 %v5663_v28 }
 0x654   : > { %2360 = vmatpush1.msra.mxu0 %v2312_v29  ;;  %2423 = vmatprep.mubr.f32.mxu0 %v5647_v47  ;;  %v2299_v47 = vld [vmem:[#allocation11 + $0x688] sm:$0xff]  ;;  %v2167_v29 = vld [vmem:[#allocation8 + $0xf20] sm:$0xff] }
 0x655   : > { %2361 = vmatprep.subr.mxu0 %v2311_v30  ;;  %v2320_v30 = vld [vmem:[#allocation11 + $0x730] sm:$0xff]  ;;  %2267 = vmatpush2.msra.mxu1 %v2167_v29 }
 0x656   : > { %2362 = vmatpush1.msra.mxu0 %v2310_v31  ;;  %v2166_v31 = vld [vmem:[#allocation8 + $0xf18] sm:$0xff] }
 0x657   : > { %2363 = vmatprep.subr.mxu0 %v2309_v32  ;;  %v2319_v32 = vld [vmem:[#allocation11 + $0x728] sm:$0xff]  ;;  %2268 = vmatprep.subr.mxu1 %v2166_v31 }
 0x658   : > { %2364 = vmatpush1.msra.mxu0 %v2308_v42  ;;  %v2165_v42 = vld [vmem:[#allocation8 + $0xf10] sm:$0xff] }
 0x659   : > { %2365 = vmatprep.subr.mxu0 %v2307_v41  ;;  %v2318_v41 = vld [vmem:[#allocation11 + $0x720] sm:$0xff]  ;;  %2269 = vmatpush2.msra.mxu1 %v2165_v42 }
 0x65a   : > { %2366 = vmatpush1.msra.mxu0 %v2306_v33  ;;  %v2164_v33 = vld [vmem:[#allocation8 + $0xf08] sm:$0xff] }
 0x65b   : > { %2367 = vmatprep.subr.mxu0 %v2305_v34  ;;  %v2317_v34 = vld [vmem:[#allocation11 + $0x718] sm:$0xff]  ;;  %2270 = vmatprep.subr.mxu1 %v2164_v33 }
 0x65c   : > { %2368 = vmatpush1.msra.mxu0 %v2304_v35  ;;  %v2163_v35 = vld [vmem:[#allocation8 + $0xf00] sm:$0xff] }
 0x65d   : > { %2369 = vmatprep.subr.mxu0 %v2303_v36  ;;  %v2316_v36 = vld [vmem:[#allocation11 + $0x710] sm:$0xff]  ;;  %2271 = vmatpush2.msra.mxu1 %v2163_v35 }
 0x65e   : > { %2370 = vmatpush1.msra.mxu0 %v2302_v37  ;;  %v2315_v37 = vld [vmem:[#allocation11 + $0x708] sm:$0xff] }
 0x65f   : > { %2371 = vmatprep.subr.mxu0 %v2301_v38  ;;  %v2314_v38 = vld [vmem:[#allocation11 + $0x700] sm:$0xff] }
 0x660   : > { %2372 = vmatpush1.msra.mxu0 %v2300_v39  ;;  %v2045_v39 = vld [vmem:[#allocation10 + $0xc] sm:$0x3] }
 0x661   : > { %2373 = vmatprep.subr.mxu0 %v2299_v47  ;;  %v2050_v47 = vrot.slane %v2045_v39, %v5593_v63 }
 0x662   : > { %2374 = vmatpush1.msra.mxu0 %v2298_v40  ;;  %v2054_v40 = vrot.slane %v2045_v39, %v5595_v1 }
 0x663   : > { %2375 = vmatprep.subr.mxu0 %v2297_v43 }
 0x664   : > { %2376 = vmatpush1.msra.mxu0 %v2296_v44 }
 0x665   : > { %2377 = vmatprep.subr.mxu0 %v2295_v45 }
 0x666   : > { %2378 = vmatpush1.msra.mxu0 %v2294_v46 }
 0x667   : > { %2379 = vmatprep.subr.mxu0 %v2293_v61 }
 0x668   : > { %2380 = vmatpush1.msra.mxu0 %v2292_v62 }
 0x669   : > { %2381 = vmatprep.subr.mxu0 %v2291_v48  ;;  %v2196_v48 = vld [vmem:[#allocation10 + $0xe] sm:$0x3] }
 0x66a   : > { %2382 = vmatpush1.msra.mxu0 %v2290_v49  ;;  %v2201_v49 = vrot.slane %v2196_v48, %v5593_v63 }
 0x66b   : > { %2383 = vmatprep.subr.mxu0 %v2289_v50  ;;  %v2347_v50 = vld [vmem:[#allocation13 + $0x6] sm:$0x3] }
 0x66c   : > { %2384 = vmatpush1.msra.mxu0 %v2288_v51  ;;  %v2205_v51 = vrot.slane %v2196_v48, %v5595_v1 }
 0x66d   : > { %2385 = vmatprep.subr.mxu0 %v2287_v52 }
 0x66e   : > { %2386 = vmatpush1.msra.mxu0 %v2286_v53 }
 0x66f   : > { %2387 = vmatprep.subr.mxu0 %v2285_v54  ;;  %v2352_v54 = vrot.slane %v2347_v50, %v5593_v63 }
 0x670   : > { %2388 = vmatpush1.msra.mxu0 %v2284_v56 }
 0x671   : > { %2389 = vmatprep.subr.mxu0 %v2283_v57 }
 0x672   : > { %2390 = vmatpush1.msra.mxu0 %v2282_v58 }
 0x673   : > { %2391 = vmatprep.subr.mxu0 %v2345_v59  ;;  %v2356_v59 = vrot.slane %v2347_v50, %v5595_v1 }
 0x674   : > { %2392 = vmatpush2.msra.mxu0 %v2344_v60 }
 0x675   : > { %2393 = vmatprep.subr.mxu0 %v2343_v0 }
 0x676   : > { %2394 = vmatpush2.msra.mxu0 %v2342_v2 }
 0x677   : > { %2395 = vmatprep.subr.mxu0 %v2341_v3 }
 0x678   : > { %2396 = vmatpush2.msra.mxu0 %v2340_v4 }
 0x679   : > { %2397 = vmatprep.subr.mxu0 %v2339_v5 }
 0x67a   : > { %2398 = vmatpush2.msra.mxu0 %v2338_v7 }
 0x67b   : > { %2399 = vmatprep.subr.mxu0 %v2337_v8 }
 0x67c   : > { %2400 = vmatpush2.msra.mxu0 %v2336_v9 }
 0x67d   : > { %2401 = vmatprep.subr.mxu0 %v2335_v6 }
 0x67e   : > { %2402 = vmatpush2.msra.mxu0 %v2334_v10 }
 0x67f   : > { %2403 = vmatprep.subr.mxu0 %v2333_v11 }
 0x680   : > { %2404 = vmatpush2.msra.mxu0 %v2332_v12 }
 0x681   : > { %2405 = vmatprep.subr.mxu0 %v2331_v13 }
 0x682   : > { %2406 = vmatpush2.msra.mxu0 %v2330_v23 }
 0x683   : > { %2407 = vmatprep.subr.mxu0 %v2329_v14 }
 0x684   : > { %2408 = vmatpush2.msra.mxu0 %v2328_v15 }
 0x685   : > { %2409 = vmatprep.subr.mxu0 %v2327_v16 }
 0x686   : > { %2410 = vmatpush2.msra.mxu0 %v2326_v17 }
 0x687   : > { %2411 = vmatprep.subr.mxu0 %v2325_v18 }
 0x688   : > { %2412 = vmatpush2.msra.mxu0 %v2324_v19 }
 0x689   : > { %2413 = vmatprep.subr.mxu0 %v2323_v21 }
 0x68a   : > { %2414 = vmatpush2.msra.mxu0 %v2322_v25 }
 0x68b   : > { %2415 = vmatprep.subr.mxu0 %v2321_v27 }
 0x68c   : > { %2416 = vmatpush2.msra.mxu0 %v2320_v30 }
 0x68d   : > { %2417 = vmatprep.subr.mxu0 %v2319_v32 }
 0x68e   : > { %2418 = vmatpush2.msra.mxu0 %v2318_v41 }
 0x68f   : > { %2419 = vmatprep.subr.mxu0 %v2317_v34 }
 0x690   : > { %2420 = vmatpush2.msra.mxu0 %v2316_v36 }
 0x691   : > { %2421 = vmatprep.subr.mxu0 %v2315_v37 }
 0x692   : > { %2422 = vmatpush2.msra.mxu0 %v2314_v38 }
 0x693   : > { %2424 = vmatmul.mubr.f32.vlgmr.msra.gmra.mxu0 %v5650_v55 }
 0x713   : > { %v2123_v43 = vpop.f32.mrf.mxu0 }
 0x714   : > { %v2124_v44 = vadd.f32 %v2123_v43, %v2050_v47 }
 0x715   : > { %v2125_v45 = vpop.f32.mrf.mxu0 }
 0x716   : > { %v2126_v46 = vadd.f32 %v2125_v45, %v2054_v40  ;;  %v2128_v62 = vmax.f32 %v2124_v44, 0.0 }
 0x718   : > { %v2129_v61 = vmax.f32 %v2126_v46, 0.0 }
 0x71a   : > { %2272 = vmatprep.mubr.f32.mxu1 %v2129_v61 }
 0x71b   : > { %2273 = vmatmul.mubr.f32.vlgmr.msra.gmra.mxu1 %v2128_v62 }
 0x753   : > { %v2425_v52 = vpop.f32.mrf.mxu0 }
 0x754   : > { %v2426_v3 = vadd.f32 %v2425_v52, %v2352_v54 }
 0x755   : > { %v2427_v60 = vpop.f32.mrf.mxu0 }
 0x756   : > { %v2428_v5 = vadd.f32 %v2427_v60, %v2356_v59 }
 0x7db   : > { %v2274_v55 = vpop.f32.mrf.mxu1 }
 0x7dc   : > { %v2275_v53 = vadd.f32 %v2274_v55, %v2201_v49 }
 0x7dd   : > { %v2276_v56 = vpop.f32.mrf.mxu1 }
 0x7de   : > { %v2279_v57 = vmax.f32 %v2275_v53, 0.0  ;;  %v2277_v58 = vadd.f32 %v2276_v56, %v2205_v51 }
 0x7e0   : > { %v2430_v0 = vadd.f32 %v2279_v57, %v5663_v28  ;;  %v2280_v2 = vmax.f32 %v2277_v58, 0.0 }
 0x7e2   : > { %v2431_v4 = vadd.f32 %v2280_v2, %v5661_v24  ;;  %v2432_v7 = vadd.f32 %v2430_v0, %v2426_v3 }
 0x7e4   : > { %v2433_v8 = vadd.f32 %v2431_v4, %v2428_v5 }
 0x7e6   : > { %v4867_v9 = vpack.c.bf16 %v2433_v8, %v2432_v7 }
 0x7e8   : > { %2442 = vst [vmem:[#allocation2] sm:$0xff] %v4867_v9 }
 0x7e9 PF: > { %v2556_v63 = vld [vmem:[%s5571_s2 + $0x380] sm:$0xff]  ;;  %v2557_v24 = vld [vmem:[%s5571_s2 + $0x388] sm:$0xff] }
 0x7ea   : > { %v2564_v1 = vld [vmem:[%s5571_s2 + $0x3c0] sm:$0xff]  ;;  %v2565_v6 = vld [vmem:[%s5571_s2 + $0x3c8] sm:$0xff] }
 0x7eb   : > { %v4720_v28 = vcombine.high %v2556_v63, %v2564_v1  ;;  %v4719_v10 = vcombine.low %v2556_v63, %v2564_v1  ;;  %v2540_v11 = vld [vmem:[%s5571_s2 + $0x300] sm:$0xff]  ;;  %v4722_v13 = vcombine.high %v2557_v24, %v2565_v6  ;;  %v4721_v23 = vcombine.low %v2557_v24, %v2565_v6  ;;  %v2541_v15 = vld [vmem:[%s5571_s2 + $0x308] sm:$0xff] }
 0x7ec   : > { %v2548_v12 = vld [vmem:[%s5571_s2 + $0x340] sm:$0xff]  ;;  %v2549_v16 = vld [vmem:[%s5571_s2 + $0x348] sm:$0xff] }
 0x7ed   : > { %v4704_v14 = vcombine.high %v2540_v11, %v2548_v12  ;;  %v2524_v17 = vld [vmem:[%s5571_s2 + $0x280] sm:$0xff]  ;;  %4071 = vmatprep.subr.bf16.mxu0 %v4720_v28  ;;  %v4706_v18 = vcombine.high %v2541_v15, %v2549_v16  ;;  %v2525_v20 = vld [vmem:[%s5571_s2 + $0x288] sm:$0xff]  ;;  %4112 = vmatprep.subr.bf16.mxu1 %v4722_v13  ;;  %v4703_v22 = vcombine.low %v2540_v11, %v2548_v12 }
 0x7ee   : > { %v2532_v19 = vld [vmem:[%s5571_s2 + $0x2c0] sm:$0xff]  ;;  %v2533_v21 = vld [vmem:[%s5571_s2 + $0x2c8] sm:$0xff]  ;;  %4072 = vmatpush1.bf16.msra.mxu0 %v4719_v10  ;;  %4113 = vmatpush1.bf16.msra.mxu1 %v4721_v23  ;;  %v4705_v25 = vcombine.low %v2541_v15, %v2549_v16 }
 0x7ef   : > { %4073 = vmatprep.subr.bf16.mxu0 %v4704_v14  ;;  %v4688_v26 = vcombine.high %v2524_v17, %v2532_v19  ;;  %4114 = vmatprep.subr.bf16.mxu1 %v4706_v18  ;;  %v4690_v27 = vcombine.high %v2525_v20, %v2533_v21  ;;  %v2508_v29 = vld [vmem:[%s5571_s2 + $0x200] sm:$0xff]  ;;  %v2509_v31 = vld [vmem:[%s5571_s2 + $0x208] sm:$0xff]  ;;  %v4687_v42 = vcombine.low %v2524_v17, %v2532_v19 }
 0x7f0   : > { %v2516_v30 = vld [vmem:[%s5571_s2 + $0x240] sm:$0xff]  ;;  %v2517_v32 = vld [vmem:[%s5571_s2 + $0x248] sm:$0xff]  ;;  %v4689_v41 = vcombine.low %v2525_v20, %v2533_v21 }
 0x7f1   : > { %v4672_v33 = vcombine.high %v2508_v29, %v2516_v30  ;;  %v4674_v34 = vcombine.high %v2509_v31, %v2517_v32  ;;  %v2492_v35 = vld [vmem:[%s5571_s2 + $0x180] sm:$0xff]  ;;  %v2493_v37 = vld [vmem:[%s5571_s2 + $0x188] sm:$0xff]  ;;  %v4671_v39 = vcombine.low %v2508_v29, %v2516_v30  ;;  %v4673_v47 = vcombine.low %v2509_v31, %v2517_v32 }
 0x7f2   : > { %4074 = vmatpush1.bf16.msra.mxu0 %v4703_v22  ;;  %4115 = vmatpush1.bf16.msra.mxu1 %v4705_v25  ;;  %v2500_v36 = vld [vmem:[%s5571_s2 + $0x1c0] sm:$0xff]  ;;  %v2501_v38 = vld [vmem:[%s5571_s2 + $0x1c8] sm:$0xff] }
 0x7f3   : > { %4075 = vmatprep.subr.bf16.mxu0 %v4688_v26  ;;  %4116 = vmatprep.subr.bf16.mxu1 %v4690_v27  ;;  %v4656_v40 = vcombine.high %v2492_v35, %v2500_v36  ;;  %v4658_v43 = vcombine.high %v2493_v37, %v2501_v38  ;;  %v2476_v44 = vld [vmem:[%s5571_s2 + $0x100] sm:$0xff]  ;;  %v2477_v46 = vld [vmem:[%s5571_s2 + $0x108] sm:$0xff]  ;;  %v4655_v62 = vcombine.low %v2492_v35, %v2500_v36 }
 0x7f4   : > { %v2484_v45 = vld [vmem:[%s5571_s2 + $0x140] sm:$0xff]  ;;  %v2485_v61 = vld [vmem:[%s5571_s2 + $0x148] sm:$0xff]  ;;  %v4657_v48 = vcombine.low %v2493_v37, %v2501_v38 }
 0x7f5   : > { %v4640_v49 = vcombine.high %v2476_v44, %v2484_v45  ;;  %v4642_v50 = vcombine.high %v2477_v46, %v2485_v61  ;;  %v2460_v51 = vld [vmem:[%s5571_s2 + $0x80] sm:$0xff]  ;;  %v2461_v52 = vld [vmem:[%s5571_s2 + $0x88] sm:$0xff]  ;;  %v4639_v54 = vcombine.low %v2476_v44, %v2484_v45  ;;  %v4641_v56 = vcombine.low %v2477_v46, %v2485_v61 }
 0x7f6   : > { %4076 = vmatpush1.bf16.msra.mxu0 %v4687_v42  ;;  %4117 = vmatpush1.bf16.msra.mxu1 %v4689_v41  ;;  %v2468_v55 = vld [vmem:[%s5571_s2 + $0xc0] sm:$0xff]  ;;  %v2469_v53 = vld [vmem:[%s5571_s2 + $0xc8] sm:$0xff] }
 0x7f7   : > { %4077 = vmatprep.subr.bf16.mxu0 %v4672_v33  ;;  %4118 = vmatprep.subr.bf16.mxu1 %v4674_v34  ;;  %v4624_v57 = vcombine.high %v2460_v51, %v2468_v55  ;;  %v5705_v58 = vld [vmem:[#allocation2] sm:$0xff]  ;;  %v4626_v59 = vcombine.high %v2461_v52, %v2469_v53  ;;  %v4623_v5 = vcombine.low %v2460_v51, %v2468_v55 }
 0x7f8   : > { %v2444_v60 = vld [vmem:[%s5571_s2] sm:$0xff]  ;;  %v5711_v2 = vcombine.high %v5705_v58, %v5705_v58  ;;  %v2445_v3 = vld [vmem:[%s5571_s2 + $0x8] sm:$0xff]  ;;  %v4625_v7 = vcombine.low %v2461_v52, %v2469_v53 }
 0x7f9   : > { %v2452_v0 = vld [vmem:[%s5571_s2 + $0x40] sm:$0xff]  ;;  %v2453_v4 = vld [vmem:[%s5571_s2 + $0x48] sm:$0xff] }
 0x7fa   : > { %4078 = vmatpush1.bf16.msra.mxu0 %v4671_v39  ;;  %4119 = vmatpush1.bf16.msra.mxu1 %v4673_v47  ;;  %v4608_v8 = vcombine.high %v2444_v60, %v2452_v0  ;;  %v4610_v9 = vcombine.high %v2445_v3, %v2453_v4  ;;  %v2684_v63 = vld [vmem:[%s5571_s2 + $0x780] sm:$0xff]  ;;  %v2685_v24 = vld [vmem:[%s5571_s2 + $0x788] sm:$0xff]  ;;  %v4607_v6 = vcombine.low %v2444_v60, %v2452_v0 }
 0x7fb   : > { %4079 = vmatprep.subr.bf16.mxu0 %v4656_v40  ;;  %4120 = vmatprep.subr.bf16.mxu1 %v4658_v43  ;;  %v2692_v1 = vld [vmem:[%s5571_s2 + $0x7c0] sm:$0xff]  ;;  %v2693_v28 = vld [vmem:[%s5571_s2 + $0x7c8] sm:$0xff]  ;;  %v4609_v10 = vcombine.low %v2445_v3, %v2453_v4 }
 0x7fc   : > { %4103 = vmatprep.mubr.bf16.mxu0 %v5711_v2  ;;  %4144 = vmatprep.mubr.bf16.mxu1 %v5711_v2  ;;  %v4848_v11 = vcombine.high %v2684_v63, %v2692_v1  ;;  %v4850_v12 = vcombine.high %v2685_v24, %v2693_v28  ;;  %v2668_v13 = vld [vmem:[%s5571_s2 + $0x700] sm:$0xff]  ;;  %v2669_v14 = vld [vmem:[%s5571_s2 + $0x708] sm:$0xff]  ;;  %v4847_v16 = vcombine.low %v2684_v63, %v2692_v1 }
 0x7fd   : > { %v2676_v23 = vld [vmem:[%s5571_s2 + $0x740] sm:$0xff]  ;;  %v2677_v15 = vld [vmem:[%s5571_s2 + $0x748] sm:$0xff]  ;;  %v4849_v17 = vcombine.low %v2685_v24, %v2693_v28  ;;  %v2558_v24 = vld [vmem:[%s5571_s2 + $0x390] sm:$0xff] }
 0x7fe   : > { %4080 = vmatpush1.bf16.msra.mxu0 %v4655_v62  ;;  %4121 = vmatpush1.bf16.msra.mxu1 %v4657_v48  ;;  %v4832_v18 = vcombine.high %v2668_v13, %v2676_v23  ;;  %v4834_v19 = vcombine.high %v2669_v14, %v2677_v15  ;;  %v2652_v20 = vld [vmem:[%s5571_s2 + $0x680] sm:$0xff]  ;;  %v2653_v22 = vld [vmem:[%s5571_s2 + $0x688] sm:$0xff]  ;;  %v4831_v26 = vcombine.low %v2668_v13, %v2676_v23  ;;  %v2566_v28 = vld [vmem:[%s5571_s2 + $0x3d0] sm:$0xff] }
 0x7ff   : > { %4081 = vmatprep.subr.bf16.mxu0 %v4640_v49  ;;  %4122 = vmatprep.subr.bf16.mxu1 %v4642_v50  ;;  %v2660_v21 = vld [vmem:[%s5571_s2 + $0x6c0] sm:$0xff]  ;;  %v2661_v25 = vld [vmem:[%s5571_s2 + $0x6c8] sm:$0xff]  ;;  %v4833_v27 = vcombine.low %v2669_v14, %v2677_v15  ;;  %v4724_v13 = vcombine.high %v2558_v24, %v2566_v28  ;;  %v2542_v14 = vld [vmem:[%s5571_s2 + $0x310] sm:$0xff] }
 0x800   : > { %v4816_v29 = vcombine.high %v2652_v20, %v2660_v21  ;;  %v4818_v30 = vcombine.high %v2653_v22, %v2661_v25  ;;  %v2636_v31 = vld [vmem:[%s5571_s2 + $0x600] sm:$0xff]  ;;  %v2637_v42 = vld [vmem:[%s5571_s2 + $0x608] sm:$0xff]  ;;  %v4815_v33 = vcombine.low %v2652_v20, %v2660_v21  ;;  %v4817_v34 = vcombine.low %v2653_v22, %v2661_v25  ;;  %v2550_v15 = vld [vmem:[%s5571_s2 + $0x350] sm:$0xff] }
 0x801   : > { %v2644_v32 = vld [vmem:[%s5571_s2 + $0x640] sm:$0xff]  ;;  %v2645_v41 = vld [vmem:[%s5571_s2 + $0x648] sm:$0xff]  ;;  %v4708_v21 = vcombine.high %v2542_v14, %v2550_v15  ;;  %v2526_v25 = vld [vmem:[%s5571_s2 + $0x290] sm:$0xff] }
 0x802   : > { %4082 = vmatpush1.bf16.msra.mxu0 %v4639_v54  ;;  %4123 = vmatpush1.bf16.msra.mxu1 %v4641_v56  ;;  %v4800_v35 = vcombine.high %v2636_v31, %v2644_v32  ;;  %v4802_v36 = vcombine.high %v2637_v42, %v2645_v41  ;;  %v2620_v37 = vld [vmem:[%s5571_s2 + $0x580] sm:$0xff]  ;;  %v2621_v39 = vld [vmem:[%s5571_s2 + $0x588] sm:$0xff]  ;;  %v4799_v40 = vcombine.low %v2636_v31, %v2644_v32 }
 0x803   : > { %4083 = vmatprep.subr.bf16.mxu0 %v4624_v57  ;;  %4124 = vmatprep.subr.bf16.mxu1 %v4626_v59  ;;  %v2628_v38 = vld [vmem:[%s5571_s2 + $0x5c0] sm:$0xff]  ;;  %v2629_v47 = vld [vmem:[%s5571_s2 + $0x5c8] sm:$0xff]  ;;  %v4801_v43 = vcombine.low %v2637_v42, %v2645_v41  ;;  %v2510_v42 = vld [vmem:[%s5571_s2 + $0x210] sm:$0xff] }
 0x804   : > { %v4784_v44 = vcombine.high %v2620_v37, %v2628_v38  ;;  %v4786_v45 = vcombine.high %v2621_v39, %v2629_v47  ;;  %v2604_v46 = vld [vmem:[%s5571_s2 + $0x500] sm:$0xff]  ;;  %v2605_v62 = vld [vmem:[%s5571_s2 + $0x508] sm:$0xff]  ;;  %v4783_v49 = vcombine.low %v2620_v37, %v2628_v38  ;;  %v4785_v50 = vcombine.low %v2621_v39, %v2629_v47  ;;  %v2518_v41 = vld [vmem:[%s5571_s2 + $0x250] sm:$0xff] }
 0x805   : > { %v2612_v61 = vld [vmem:[%s5571_s2 + $0x540] sm:$0xff]  ;;  %v2613_v48 = vld [vmem:[%s5571_s2 + $0x548] sm:$0xff]  ;;  %v4676_v37 = vcombine.high %v2510_v42, %v2518_v41  ;;  %v2494_v39 = vld [vmem:[%s5571_s2 + $0x190] sm:$0xff] }
 0x806   : > { %4084 = vmatpush1.bf16.msra.mxu0 %v4623_v5  ;;  %4125 = vmatpush1.bf16.msra.mxu1 %v4625_v7  ;;  %v4768_v51 = vcombine.high %v2604_v46, %v2612_v61  ;;  %v4770_v55 = vcombine.high %v2605_v62, %v2613_v48  ;;  %v2588_v52 = vld [vmem:[%s5571_s2 + $0x480] sm:$0xff]  ;;  %v2589_v54 = vld [vmem:[%s5571_s2 + $0x488] sm:$0xff]  ;;  %v4767_v57 = vcombine.low %v2604_v46, %v2612_v61  ;;  %v2502_v47 = vld [vmem:[%s5571_s2 + $0x1d0] sm:$0xff] }
 0x807   : > { %4085 = vmatprep.subr.bf16.mxu0 %v4608_v8  ;;  %4126 = vmatprep.subr.bf16.mxu1 %v4610_v9  ;;  %v2596_v53 = vld [vmem:[%s5571_s2 + $0x4c0] sm:$0xff]  ;;  %v2597_v56 = vld [vmem:[%s5571_s2 + $0x4c8] sm:$0xff]  ;;  %v4769_v59 = vcombine.low %v2605_v62, %v2613_v48  ;;  %v4660_v46 = vcombine.high %v2494_v39, %v2502_v47  ;;  %v2478_v62 = vld [vmem:[%s5571_s2 + $0x110] sm:$0xff] }
 0x808   : > { %v4752_v60 = vcombine.high %v2588_v52, %v2596_v53  ;;  %v4754_v0 = vcombine.high %v2589_v54, %v2597_v56  ;;  %v2572_v3 = vld [vmem:[%s5571_s2 + $0x400] sm:$0xff]  ;;  %v2573_v5 = vld [vmem:[%s5571_s2 + $0x408] sm:$0xff]  ;;  %v4751_v8 = vcombine.low %v2588_v52, %v2596_v53  ;;  %v4753_v9 = vcombine.low %v2589_v54, %v2597_v56  ;;  %v2486_v48 = vld [vmem:[%s5571_s2 + $0x150] sm:$0xff] }
 0x809   : > { %v2580_v4 = vld [vmem:[%s5571_s2 + $0x440] sm:$0xff]  ;;  %v2581_v7 = vld [vmem:[%s5571_s2 + $0x448] sm:$0xff]  ;;  %v4644_v52 = vcombine.high %v2478_v62, %v2486_v48  ;;  %v2462_v54 = vld [vmem:[%s5571_s2 + $0x90] sm:$0xff] }
 0x80a   : > { %4086 = vmatpush1.bf16.msra.mxu0 %v4607_v6  ;;  %4127 = vmatpush1.bf16.msra.mxu1 %v4609_v10  ;;  %v4736_v63 = vcombine.high %v2572_v3, %v2580_v4  ;;  %v4738_v1 = vcombine.high %v2573_v5, %v2581_v7  ;;  %v2559_v6 = vld [vmem:[%s5571_s2 + $0x398] sm:$0xff]  ;;  %v2470_v56 = vld [vmem:[%s5571_s2 + $0xd0] sm:$0xff] }
 0x80b   : > { %4087 = vmatprep.subr.bf16.mxu0 %v4848_v11  ;;  %4128 = vmatprep.subr.bf16.mxu1 %v4850_v12  ;;  %v2567_v10 = vld [vmem:[%s5571_s2 + $0x3d8] sm:$0xff]  ;;  %v4735_v11 = vcombine.low %v2572_v3, %v2580_v4  ;;  %v4737_v12 = vcombine.low %v2573_v5, %v2581_v7  ;;  %v4628_v3 = vcombine.high %v2462_v54, %v2470_v56  ;;  %v2446_v5 = vld [vmem:[%s5571_s2 + $0x10] sm:$0xff] }
 0x80c   : > { %v4726_v23 = vcombine.high %v2559_v6, %v2567_v10  ;;  %v4725_v20 = vcombine.low %v2559_v6, %v2567_v10  ;;  %v2454_v7 = vld [vmem:[%s5571_s2 + $0x50] sm:$0xff] }
 0x80d   : > { %v2686_v6 = vld [vmem:[%s5571_s2 + $0x790] sm:$0xff] }
 0x80e   : > { %4088 = vmatpush2.bf16.msra.mxu0 %v4847_v16  ;;  %4129 = vmatpush2.bf16.msra.mxu1 %v4849_v17  ;;  %v5757_v16 = vcombine.low %v5705_v58, %v5705_v58  ;;  %v2543_v17 = vld [vmem:[%s5571_s2 + $0x318] sm:$0xff]  ;;  %v2694_v10 = vld [vmem:[%s5571_s2 + $0x7d0] sm:$0xff] }
 0x80f   : > { %4089 = vmatprep.subr.bf16.mxu0 %v4832_v18  ;;  %4130 = vmatprep.subr.bf16.mxu1 %v4834_v19  ;;  %v2551_v18 = vld [vmem:[%s5571_s2 + $0x358] sm:$0xff]  ;;  %v4723_v19 = vcombine.low %v2558_v24, %v2566_v28  ;;  %v4612_v24 = vcombine.high %v2446_v5, %v2454_v7 }
 0x810   : > { %v4710_v22 = vcombine.high %v2543_v17, %v2551_v18  ;;  %v2527_v58 = vld [vmem:[%s5571_s2 + $0x298] sm:$0xff] }
 0x812   : > { %4090 = vmatpush2.bf16.msra.mxu0 %v4831_v26  ;;  %4131 = vmatpush2.bf16.msra.mxu1 %v4833_v27  ;;  %v2534_v26 = vld [vmem:[%s5571_s2 + $0x2d0] sm:$0xff]  ;;  %v2535_v27 = vld [vmem:[%s5571_s2 + $0x2d8] sm:$0xff] }
 0x813   : > { %4091 = vmatprep.subr.bf16.mxu0 %v4816_v29  ;;  %4132 = vmatprep.subr.bf16.mxu1 %v4818_v30  ;;  %v4707_v29 = vcombine.low %v2542_v14, %v2550_v15  ;;  %v4709_v30 = vcombine.low %v2543_v17, %v2551_v18  ;;  %v4692_v31 = vcombine.high %v2526_v25, %v2534_v26  ;;  %v2670_v17 = vld [vmem:[%s5571_s2 + $0x710] sm:$0xff] }
 0x814   : > { %v4694_v32 = vcombine.high %v2527_v58, %v2535_v27  ;;  %v4852_v14 = vcombine.high %v2686_v6, %v2694_v10  ;;  %v2678_v18 = vld [vmem:[%s5571_s2 + $0x750] sm:$0xff] }
 0x816   : > { %4092 = vmatpush2.bf16.msra.mxu0 %v4815_v33  ;;  %4133 = vmatpush2.bf16.msra.mxu1 %v4817_v34  ;;  %v2511_v33 = vld [vmem:[%s5571_s2 + $0x218] sm:$0xff] }
 0x817   : > { %4093 = vmatprep.subr.bf16.mxu0 %v4800_v35  ;;  %4134 = vmatprep.subr.bf16.mxu1 %v4802_v36  ;;  %v2519_v34 = vld [vmem:[%s5571_s2 + $0x258] sm:$0xff]  ;;  %v4691_v35 = vcombine.low %v2526_v25, %v2534_v26  ;;  %v4693_v36 = vcombine.low %v2527_v58, %v2535_v27  ;;  %v4836_v25 = vcombine.high %v2670_v17, %v2678_v18  ;;  %v2654_v58 = vld [vmem:[%s5571_s2 + $0x690] sm:$0xff] }
 0x818   : > { %v4678_v38 = vcombine.high %v2511_v33, %v2519_v34  ;;  %v2662_v27 = vld [vmem:[%s5571_s2 + $0x6d0] sm:$0xff] }
 0x81a   : > { %4094 = vmatpush2.bf16.msra.mxu0 %v4799_v40  ;;  %4135 = vmatpush2.bf16.msra.mxu1 %v4801_v43  ;;  %v2495_v40 = vld [vmem:[%s5571_s2 + $0x198] sm:$0xff] }
 0x81b   : > { %4095 = vmatprep.subr.bf16.mxu0 %v4784_v44  ;;  %4136 = vmatprep.subr.bf16.mxu1 %v4786_v45  ;;  %v2503_v43 = vld [vmem:[%s5571_s2 + $0x1d8] sm:$0xff]  ;;  %v4675_v44 = vcombine.low %v2510_v42, %v2518_v41  ;;  %v4677_v45 = vcombine.low %v2511_v33, %v2519_v34  ;;  %v4820_v42 = vcombine.high %v2654_v58, %v2662_v27  ;;  %v2638_v33 = vld [vmem:[%s5571_s2 + $0x610] sm:$0xff] }
 0x81c   : > { %v4662_v61 = vcombine.high %v2495_v40, %v2503_v43  ;;  %v2646_v34 = vld [vmem:[%s5571_s2 + $0x650] sm:$0xff] }
 0x81e   : > { %4096 = vmatpush2.bf16.msra.mxu0 %v4783_v49  ;;  %4137 = vmatpush2.bf16.msra.mxu1 %v4785_v50  ;;  %v2479_v49 = vld [vmem:[%s5571_s2 + $0x118] sm:$0xff] }
 0x81f   : > { %4097 = vmatprep.subr.bf16.mxu0 %v4768_v51  ;;  %4138 = vmatprep.subr.bf16.mxu1 %v4770_v55  ;;  %v2487_v50 = vld [vmem:[%s5571_s2 + $0x158] sm:$0xff]  ;;  %v4659_v51 = vcombine.low %v2494_v39, %v2502_v47  ;;  %v4661_v55 = vcombine.low %v2495_v40, %v2503_v43  ;;  %v4804_v39 = vcombine.high %v2638_v33, %v2646_v34  ;;  %v2622_v40 = vld [vmem:[%s5571_s2 + $0x590] sm:$0xff] }
 0x820   : > { %v4646_v53 = vcombine.high %v2479_v49, %v2487_v50  ;;  %v2630_v43 = vld [vmem:[%s5571_s2 + $0x5d0] sm:$0xff] }
 0x822   : > { %4098 = vmatpush2.bf16.msra.mxu0 %v4767_v57  ;;  %4139 = vmatpush2.bf16.msra.mxu1 %v4769_v59  ;;  %v2463_v57 = vld [vmem:[%s5571_s2 + $0x98] sm:$0xff] }
 0x823   : > { %4099 = vmatprep.subr.bf16.mxu0 %v4752_v60  ;;  %4140 = vmatprep.subr.bf16.mxu1 %v4754_v0  ;;  %v2471_v59 = vld [vmem:[%s5571_s2 + $0xd8] sm:$0xff]  ;;  %v4643_v60 = vcombine.low %v2478_v62, %v2486_v48  ;;  %v4645_v0 = vcombine.low %v2479_v49, %v2487_v50  ;;  %v4788_v62 = vcombine.high %v2622_v40, %v2630_v43  ;;  %v2606_v49 = vld [vmem:[%s5571_s2 + $0x510] sm:$0xff] }
 0x824   : > { %v4630_v4 = vcombine.high %v2463_v57, %v2471_v59  ;;  %v2614_v50 = vld [vmem:[%s5571_s2 + $0x550] sm:$0xff] }
 0x826   : > { %4100 = vmatpush2.bf16.msra.mxu0 %v4751_v8  ;;  %4141 = vmatpush2.bf16.msra.mxu1 %v4753_v9  ;;  %v2447_v8 = vld [vmem:[%s5571_s2 + $0x18] sm:$0xff] }
 0x827   : > { %4101 = vmatprep.subr.bf16.mxu0 %v4736_v63  ;;  %4142 = vmatprep.subr.bf16.mxu1 %v4738_v1  ;;  %v2455_v9 = vld [vmem:[%s5571_s2 + $0x58] sm:$0xff]  ;;  %v4627_v63 = vcombine.low %v2462_v54, %v2470_v56  ;;  %v4629_v1 = vcombine.low %v2463_v57, %v2471_v59  ;;  %v4772_v54 = vcombine.high %v2606_v49, %v2614_v50  ;;  %v2590_v57 = vld [vmem:[%s5571_s2 + $0x490] sm:$0xff] }
 0x828   : > { %v4614_v28 = vcombine.high %v2447_v8, %v2455_v9  ;;  %v2598_v59 = vld [vmem:[%s5571_s2 + $0x4d0] sm:$0xff] }
 0x82a   : > { %4102 = vmatpush2.bf16.msra.mxu0 %v4735_v11  ;;  %4143 = vmatpush2.bf16.msra.mxu1 %v4737_v12  ;;  %v2687_v11 = vld [vmem:[%s5571_s2 + $0x798] sm:$0xff] }
 0x82b   : > { %4153 = vmatprep.subr.bf16.mxu0 %v4724_v13  ;;  %4194 = vmatprep.subr.bf16.mxu1 %v4726_v23  ;;  %v2695_v12 = vld [vmem:[%s5571_s2 + $0x7d8] sm:$0xff]  ;;  %v4611_v13 = vcombine.low %v2446_v5, %v2454_v7  ;;  %v4613_v23 = vcombine.low %v2447_v8, %v2455_v9  ;;  %v4756_v5 = vcombine.high %v2590_v57, %v2598_v59  ;;  %v2574_v8 = vld [vmem:[%s5571_s2 + $0x410] sm:$0xff] }
 0x82c   : > { %v4854_v15 = vcombine.high %v2687_v11, %v2695_v12  ;;  %v2582_v9 = vld [vmem:[%s5571_s2 + $0x450] sm:$0xff] }
 0x82d   : > { %4104 = vmatmul.mubr.bf16.vlgmr.msra.gmra.mxu0 %v5757_v16  ;;  %4145 = vmatmul.mubr.bf16.vlgmr.msra.gmra.mxu1 %v5757_v16 }
 0x82e   : > { %4154 = vmatpush1.bf16.msra.mxu0 %v4723_v19  ;;  %4195 = vmatpush1.bf16.msra.mxu1 %v4725_v20  ;;  %v2671_v19 = vld [vmem:[%s5571_s2 + $0x718] sm:$0xff] }
 0x82f   : > { %4155 = vmatprep.subr.bf16.mxu0 %v4708_v21  ;;  %4196 = vmatprep.subr.bf16.mxu1 %v4710_v22  ;;  %v2679_v20 = vld [vmem:[%s5571_s2 + $0x758] sm:$0xff]  ;;  %v4851_v21 = vcombine.low %v2686_v6, %v2694_v10  ;;  %v4853_v22 = vcombine.low %v2687_v11, %v2695_v12  ;;  %v4740_v6 = vcombine.high %v2574_v8, %v2582_v9  ;;  %v2560_v11 = vld [vmem:[%s5571_s2 + $0x3a0] sm:$0xff] }
 0x830   : > { %4185 = vmatprep.mubr.bf16.mxu0 %v5711_v2  ;;  %4226 = vmatprep.mubr.bf16.mxu1 %v5711_v2  ;;  %v4838_v26 = vcombine.high %v2671_v19, %v2679_v20  ;;  %v2568_v12 = vld [vmem:[%s5571_s2 + $0x3e0] sm:$0xff] }
 0x832   : > { %4156 = vmatpush1.bf16.msra.mxu0 %v4707_v29  ;;  %4197 = vmatpush1.bf16.msra.mxu1 %v4709_v30  ;;  %v2655_v29 = vld [vmem:[%s5571_s2 + $0x698] sm:$0xff] }
 0x833   : > { %4157 = vmatprep.subr.bf16.mxu0 %v4692_v31  ;;  %4198 = vmatprep.subr.bf16.mxu1 %v4694_v32  ;;  %v2663_v30 = vld [vmem:[%s5571_s2 + $0x6d8] sm:$0xff]  ;;  %v4835_v31 = vcombine.low %v2670_v17, %v2678_v18  ;;  %v4837_v32 = vcombine.low %v2671_v19, %v2679_v20  ;;  %v4728_v17 = vcombine.high %v2560_v11, %v2568_v12  ;;  %v2544_v19 = vld [vmem:[%s5571_s2 + $0x320] sm:$0xff] }
 0x834   : > { %v4822_v41 = vcombine.high %v2655_v29, %v2663_v30  ;;  %v2552_v20 = vld [vmem:[%s5571_s2 + $0x360] sm:$0xff] }
 0x836   : > { %4158 = vmatpush1.bf16.msra.mxu0 %v4691_v35  ;;  %4199 = vmatpush1.bf16.msra.mxu1 %v4693_v36  ;;  %v2639_v35 = vld [vmem:[%s5571_s2 + $0x618] sm:$0xff] }
 0x837   : > { %4159 = vmatprep.subr.bf16.mxu0 %v4676_v37  ;;  %4200 = vmatprep.subr.bf16.mxu1 %v4678_v38  ;;  %v2647_v36 = vld [vmem:[%s5571_s2 + $0x658] sm:$0xff]  ;;  %v4819_v37 = vcombine.low %v2654_v58, %v2662_v27  ;;  %v4821_v38 = vcombine.low %v2655_v29, %v2663_v30  ;;  %v4712_v58 = vcombine.high %v2544_v19, %v2552_v20  ;;  %v2528_v29 = vld [vmem:[%s5571_s2 + $0x2a0] sm:$0xff] }
 0x838   : > { %v4806_v47 = vcombine.high %v2639_v35, %v2647_v36  ;;  %v2536_v30 = vld [vmem:[%s5571_s2 + $0x2e0] sm:$0xff] }
 0x83a   : > { %4160 = vmatpush1.bf16.msra.mxu0 %v4675_v44  ;;  %4201 = vmatpush1.bf16.msra.mxu1 %v4677_v45  ;;  %v2623_v44 = vld [vmem:[%s5571_s2 + $0x598] sm:$0xff] }
 0x83b   : > { %4161 = vmatprep.subr.bf16.mxu0 %v4660_v46  ;;  %4202 = vmatprep.subr.bf16.mxu1 %v4662_v61  ;;  %v2631_v45 = vld [vmem:[%s5571_s2 + $0x5d8] sm:$0xff]  ;;  %v4803_v46 = vcombine.low %v2638_v33, %v2646_v34  ;;  %v4805_v61 = vcombine.low %v2639_v35, %v2647_v36  ;;  %v4696_v33 = vcombine.high %v2528_v29, %v2536_v30  ;;  %v2512_v35 = vld [vmem:[%s5571_s2 + $0x220] sm:$0xff] }
 0x83c   : > { %v4790_v48 = vcombine.high %v2623_v44, %v2631_v45  ;;  %v2520_v36 = vld [vmem:[%s5571_s2 + $0x260] sm:$0xff] }
 0x83e   : > { %4162 = vmatpush1.bf16.msra.mxu0 %v4659_v51  ;;  %4203 = vmatpush1.bf16.msra.mxu1 %v4661_v55  ;;  %v2607_v51 = vld [vmem:[%s5571_s2 + $0x518] sm:$0xff] }
 0x83f   : > { %4163 = vmatprep.subr.bf16.mxu0 %v4644_v52  ;;  %4204 = vmatprep.subr.bf16.mxu1 %v4646_v53  ;;  %v2615_v55 = vld [vmem:[%s5571_s2 + $0x558] sm:$0xff]  ;;  %v4787_v52 = vcombine.low %v2622_v40, %v2630_v43  ;;  %v4789_v53 = vcombine.low %v2623_v44, %v2631_v45  ;;  %v4680_v40 = vcombine.high %v2512_v35, %v2520_v36  ;;  %v2496_v44 = vld [vmem:[%s5571_s2 + $0x1a0] sm:$0xff] }
 0x840   : > { %v4774_v56 = vcombine.high %v2607_v51, %v2615_v55  ;;  %v2504_v45 = vld [vmem:[%s5571_s2 + $0x1e0] sm:$0xff] }
 0x842   : > { %4164 = vmatpush1.bf16.msra.mxu0 %v4643_v60  ;;  %4205 = vmatpush1.bf16.msra.mxu1 %v4645_v0  ;;  %v2591_v60 = vld [vmem:[%s5571_s2 + $0x498] sm:$0xff] }
 0x843   : > { %4165 = vmatprep.subr.bf16.mxu0 %v4628_v3  ;;  %4206 = vmatprep.subr.bf16.mxu1 %v4630_v4  ;;  %v2599_v0 = vld [vmem:[%s5571_s2 + $0x4d8] sm:$0xff]  ;;  %v4771_v3 = vcombine.low %v2606_v49, %v2614_v50  ;;  %v4773_v4 = vcombine.low %v2607_v51, %v2615_v55  ;;  %v4664_v49 = vcombine.high %v2496_v44, %v2504_v45  ;;  %v2480_v51 = vld [vmem:[%s5571_s2 + $0x120] sm:$0xff] }
 0x844   : > { %v4758_v7 = vcombine.high %v2591_v60, %v2599_v0  ;;  %v2488_v55 = vld [vmem:[%s5571_s2 + $0x160] sm:$0xff] }
 0x846   : > { %4166 = vmatpush1.bf16.msra.mxu0 %v4627_v63  ;;  %4207 = vmatpush1.bf16.msra.mxu1 %v4629_v1  ;;  %v2575_v63 = vld [vmem:[%s5571_s2 + $0x418] sm:$0xff] }
 0x847   : > { %4167 = vmatprep.subr.bf16.mxu0 %v4612_v24  ;;  %4208 = vmatprep.subr.bf16.mxu1 %v4614_v28  ;;  %v2583_v1 = vld [vmem:[%s5571_s2 + $0x458] sm:$0xff]  ;;  %v4755_v24 = vcombine.low %v2590_v57, %v2598_v59  ;;  %v4757_v28 = vcombine.low %v2591_v60, %v2599_v0  ;;  %v4648_v57 = vcombine.high %v2480_v51, %v2488_v55  ;;  %v2464_v60 = vld [vmem:[%s5571_s2 + $0xa0] sm:$0xff] }
 0x848   : > { %v4742_v10 = vcombine.high %v2575_v63, %v2583_v1  ;;  %v2472_v0 = vld [vmem:[%s5571_s2 + $0xe0] sm:$0xff] }
 0x84a   : > { %4168 = vmatpush1.bf16.msra.mxu0 %v4611_v13  ;;  %4209 = vmatpush1.bf16.msra.mxu1 %v4613_v23  ;;  %v2561_v13 = vld [vmem:[%s5571_s2 + $0x3a8] sm:$0xff] }
 0x84b   : > { %4169 = vmatprep.subr.bf16.mxu0 %v4852_v14  ;;  %4210 = vmatprep.subr.bf16.mxu1 %v4854_v15  ;;  %v2569_v23 = vld [vmem:[%s5571_s2 + $0x3e8] sm:$0xff]  ;;  %v4739_v14 = vcombine.low %v2574_v8, %v2582_v9  ;;  %v4741_v15 = vcombine.low %v2575_v63, %v2583_v1  ;;  %v4632_v8 = vcombine.high %v2464_v60, %v2472_v0  ;;  %v2448_v63 = vld [vmem:[%s5571_s2 + $0x20] sm:$0xff] }
 0x84c   : > { %v4730_v18 = vcombine.high %v2561_v13, %v2569_v23  ;;  %v2456_v1 = vld [vmem:[%s5571_s2 + $0x60] sm:$0xff] }
 0x84e   : > { %4170 = vmatpush2.bf16.msra.mxu0 %v4851_v21  ;;  %4211 = vmatpush2.bf16.msra.mxu1 %v4853_v22  ;;  %v2545_v21 = vld [vmem:[%s5571_s2 + $0x328] sm:$0xff] }
 0x84f   : > { %4171 = vmatprep.subr.bf16.mxu0 %v4836_v25  ;;  %4212 = vmatprep.subr.bf16.mxu1 %v4838_v26  ;;  %v2553_v22 = vld [vmem:[%s5571_s2 + $0x368] sm:$0xff]  ;;  %v4727_v25 = vcombine.low %v2560_v11, %v2568_v12  ;;  %v4729_v26 = vcombine.low %v2561_v13, %v2569_v23  ;;  %v4616_v11 = vcombine.high %v2448_v63, %v2456_v1  ;;  %v2688_v13 = vld [vmem:[%s5571_s2 + $0x7a0] sm:$0xff] }
 0x850   : > { %v4714_v27 = vcombine.high %v2545_v21, %v2553_v22  ;;  %v2696_v23 = vld [vmem:[%s5571_s2 + $0x7e0] sm:$0xff] }
 0x852   : > { %4172 = vmatpush2.bf16.msra.mxu0 %v4835_v31  ;;  %4213 = vmatpush2.bf16.msra.mxu1 %v4837_v32  ;;  %v2529_v31 = vld [vmem:[%s5571_s2 + $0x2a8] sm:$0xff] }
 0x853   : > { %4173 = vmatprep.subr.bf16.mxu0 %v4820_v42  ;;  %4214 = vmatprep.subr.bf16.mxu1 %v4822_v41  ;;  %v2537_v32 = vld [vmem:[%s5571_s2 + $0x2e8] sm:$0xff]  ;;  %v4711_v42 = vcombine.low %v2544_v19, %v2552_v20  ;;  %v4713_v41 = vcombine.low %v2545_v21, %v2553_v22  ;;  %v4856_v19 = vcombine.high %v2688_v13, %v2696_v23  ;;  %v2672_v21 = vld [vmem:[%s5571_s2 + $0x720] sm:$0xff] }
 0x854   : > { %v4698_v34 = vcombine.high %v2529_v31, %v2537_v32  ;;  %v2680_v22 = vld [vmem:[%s5571_s2 + $0x760] sm:$0xff] }
 0x856   : > { %4174 = vmatpush2.bf16.msra.mxu0 %v4819_v37  ;;  %4215 = vmatpush2.bf16.msra.mxu1 %v4821_v38  ;;  %v2513_v37 = vld [vmem:[%s5571_s2 + $0x228] sm:$0xff] }
 0x857   : > { %4175 = vmatprep.subr.bf16.mxu0 %v4804_v39  ;;  %4216 = vmatprep.subr.bf16.mxu1 %v4806_v47  ;;  %v2521_v38 = vld [vmem:[%s5571_s2 + $0x268] sm:$0xff]  ;;  %v4695_v39 = vcombine.low %v2528_v29, %v2536_v30  ;;  %v4697_v47 = vcombine.low %v2529_v31, %v2537_v32  ;;  %v4840_v29 = vcombine.high %v2672_v21, %v2680_v22  ;;  %v2656_v31 = vld [vmem:[%s5571_s2 + $0x6a0] sm:$0xff] }
 0x858   : > { %v4682_v43 = vcombine.high %v2513_v37, %v2521_v38  ;;  %v2664_v32 = vld [vmem:[%s5571_s2 + $0x6e0] sm:$0xff] }
 0x85a   : > { %4176 = vmatpush2.bf16.msra.mxu0 %v4803_v46  ;;  %4217 = vmatpush2.bf16.msra.mxu1 %v4805_v61  ;;  %v2497_v46 = vld [vmem:[%s5571_s2 + $0x1a8] sm:$0xff] }
 0x85b   : > { %4177 = vmatprep.subr.bf16.mxu0 %v4788_v62  ;;  %4218 = vmatprep.subr.bf16.mxu1 %v4790_v48  ;;  %v2505_v61 = vld [vmem:[%s5571_s2 + $0x1e8] sm:$0xff]  ;;  %v4679_v62 = vcombine.low %v2512_v35, %v2520_v36  ;;  %v4681_v48 = vcombine.low %v2513_v37, %v2521_v38  ;;  %v4824_v35 = vcombine.high %v2656_v31, %v2664_v32  ;;  %v2640_v37 = vld [vmem:[%s5571_s2 + $0x620] sm:$0xff] }
 0x85c   : > { %v4666_v50 = vcombine.high %v2497_v46, %v2505_v61  ;;  %v2648_v38 = vld [vmem:[%s5571_s2 + $0x660] sm:$0xff] }
 0x85e   : > { %4178 = vmatpush2.bf16.msra.mxu0 %v4787_v52  ;;  %4219 = vmatpush2.bf16.msra.mxu1 %v4789_v53  ;;  %v2481_v52 = vld [vmem:[%s5571_s2 + $0x128] sm:$0xff] }
 0x85f   : > { %4179 = vmatprep.subr.bf16.mxu0 %v4772_v54  ;;  %4220 = vmatprep.subr.bf16.mxu1 %v4774_v56  ;;  %v2489_v53 = vld [vmem:[%s5571_s2 + $0x168] sm:$0xff]  ;;  %v4663_v54 = vcombine.low %v2496_v44, %v2504_v45  ;;  %v4665_v56 = vcombine.low %v2497_v46, %v2505_v61  ;;  %v4808_v44 = vcombine.high %v2640_v37, %v2648_v38  ;;  %v2624_v46 = vld [vmem:[%s5571_s2 + $0x5a0] sm:$0xff] }
 0x860   : > { %v4650_v59 = vcombine.high %v2481_v52, %v2489_v53  ;;  %v2632_v61 = vld [vmem:[%s5571_s2 + $0x5e0] sm:$0xff] }
 0x862   : > { %4180 = vmatpush2.bf16.msra.mxu0 %v4771_v3  ;;  %4221 = vmatpush2.bf16.msra.mxu1 %v4773_v4  ;;  %v2465_v3 = vld [vmem:[%s5571_s2 + $0xa8] sm:$0xff] }
 0x863   : > { %4181 = vmatprep.subr.bf16.mxu0 %v4756_v5  ;;  %4222 = vmatprep.subr.bf16.mxu1 %v4758_v7  ;;  %v2473_v4 = vld [vmem:[%s5571_s2 + $0xe8] sm:$0xff]  ;;  %v4647_v5 = vcombine.low %v2480_v51, %v2488_v55  ;;  %v4649_v7 = vcombine.low %v2481_v52, %v2489_v53  ;;  %v4792_v51 = vcombine.high %v2624_v46, %v2632_v61  ;;  %v2608_v52 = vld [vmem:[%s5571_s2 + $0x520] sm:$0xff] }
 0x864   : > { %v4634_v9 = vcombine.high %v2465_v3, %v2473_v4  ;;  %v2616_v53 = vld [vmem:[%s5571_s2 + $0x560] sm:$0xff] }
 0x866   : > { %4182 = vmatpush2.bf16.msra.mxu0 %v4755_v24  ;;  %4223 = vmatpush2.bf16.msra.mxu1 %v4757_v28  ;;  %v2449_v24 = vld [vmem:[%s5571_s2 + $0x28] sm:$0xff] }
 0x867   : > { %4183 = vmatprep.subr.bf16.mxu0 %v4740_v6  ;;  %4224 = vmatprep.subr.bf16.mxu1 %v4742_v10  ;;  %v2457_v28 = vld [vmem:[%s5571_s2 + $0x68] sm:$0xff]  ;;  %v4631_v6 = vcombine.low %v2464_v60, %v2472_v0  ;;  %v4633_v10 = vcombine.low %v2465_v3, %v2473_v4  ;;  %v4776_v60 = vcombine.high %v2608_v52, %v2616_v53  ;;  %v2592_v3 = vld [vmem:[%s5571_s2 + $0x4a0] sm:$0xff] }
 0x868   : > { %v4618_v12 = vcombine.high %v2449_v24, %v2457_v28  ;;  %v2600_v4 = vld [vmem:[%s5571_s2 + $0x4e0] sm:$0xff] }
 0x86a   : > { %4184 = vmatpush2.bf16.msra.mxu0 %v4739_v14  ;;  %4225 = vmatpush2.bf16.msra.mxu1 %v4741_v15  ;;  %v2689_v14 = vld [vmem:[%s5571_s2 + $0x7a8] sm:$0xff] }
 0x86b   : > { %4235 = vmatprep.subr.bf16.mxu0 %v4728_v17  ;;  %4276 = vmatprep.subr.bf16.mxu1 %v4730_v18  ;;  %v2697_v15 = vld [vmem:[%s5571_s2 + $0x7e8] sm:$0xff]  ;;  %v4615_v17 = vcombine.low %v2448_v63, %v2456_v1  ;;  %v4617_v18 = vcombine.low %v2449_v24, %v2457_v28  ;;  %v4760_v63 = vcombine.high %v2592_v3, %v2600_v4  ;;  %v2576_v24 = vld [vmem:[%s5571_s2 + $0x420] sm:$0xff] }
 0x86c   : > { %v4858_v20 = vcombine.high %v2689_v14, %v2697_v15  ;;  %v2584_v28 = vld [vmem:[%s5571_s2 + $0x460] sm:$0xff] }
 0x86d   : > { %4186 = vmatmul.mubr.bf16.vlgmr.msra.gmra.mxu0 %v5757_v16  ;;  %4227 = vmatmul.mubr.bf16.vlgmr.msra.gmra.mxu1 %v5757_v16 }
 0x86e   : > { %4236 = vmatpush1.bf16.msra.mxu0 %v4727_v25  ;;  %4277 = vmatpush1.bf16.msra.mxu1 %v4729_v26  ;;  %v2673_v25 = vld [vmem:[%s5571_s2 + $0x728] sm:$0xff] }
 0x86f   : > { %4237 = vmatprep.subr.bf16.mxu0 %v4712_v58  ;;  %4278 = vmatprep.subr.bf16.mxu1 %v4714_v27  ;;  %v2681_v26 = vld [vmem:[%s5571_s2 + $0x768] sm:$0xff]  ;;  %v4855_v58 = vcombine.low %v2688_v13, %v2696_v23  ;;  %v4857_v27 = vcombine.low %v2689_v14, %v2697_v15  ;;  %v4744_v13 = vcombine.high %v2576_v24, %v2584_v28  ;;  %v2562_v14 = vld [vmem:[%s5571_s2 + $0x3b0] sm:$0xff] }
 0x870   : > { %4267 = vmatprep.mubr.bf16.mxu0 %v5711_v2  ;;  %4308 = vmatprep.mubr.bf16.mxu1 %v5711_v2  ;;  %v4842_v30 = vcombine.high %v2673_v25, %v2681_v26  ;;  %v2570_v15 = vld [vmem:[%s5571_s2 + $0x3f0] sm:$0xff] }
 0x872   : > { %4238 = vmatpush1.bf16.msra.mxu0 %v4711_v42  ;;  %4279 = vmatpush1.bf16.msra.mxu1 %v4713_v41  ;;  %v2657_v42 = vld [vmem:[%s5571_s2 + $0x6a8] sm:$0xff] }
 0x873   : > { %4239 = vmatprep.subr.bf16.mxu0 %v4696_v33  ;;  %4280 = vmatprep.subr.bf16.mxu1 %v4698_v34  ;;  %v2665_v41 = vld [vmem:[%s5571_s2 + $0x6e8] sm:$0xff]  ;;  %v4839_v33 = vcombine.low %v2672_v21, %v2680_v22  ;;  %v4841_v34 = vcombine.low %v2673_v25, %v2681_v26  ;;  %v4732_v21 = vcombine.high %v2562_v14, %v2570_v15  ;;  %v2546_v25 = vld [vmem:[%s5571_s2 + $0x330] sm:$0xff] }
 0x874   : > { %v4826_v36 = vcombine.high %v2657_v42, %v2665_v41  ;;  %v2554_v26 = vld [vmem:[%s5571_s2 + $0x370] sm:$0xff] }
 0x876   : > { %4240 = vmatpush1.bf16.msra.mxu0 %v4695_v39  ;;  %4281 = vmatpush1.bf16.msra.mxu1 %v4697_v47  ;;  %v2641_v39 = vld [vmem:[%s5571_s2 + $0x628] sm:$0xff] }
 0x877   : > { %4241 = vmatprep.subr.bf16.mxu0 %v4680_v40  ;;  %4282 = vmatprep.subr.bf16.mxu1 %v4682_v43  ;;  %v2649_v47 = vld [vmem:[%s5571_s2 + $0x668] sm:$0xff]  ;;  %v4823_v40 = vcombine.low %v2656_v31, %v2664_v32  ;;  %v4825_v43 = vcombine.low %v2657_v42, %v2665_v41  ;;  %v4716_v31 = vcombine.high %v2546_v25, %v2554_v26  ;;  %v2530_v42 = vld [vmem:[%s5571_s2 + $0x2b0] sm:$0xff] }
 0x878   : > { %v4810_v45 = vcombine.high %v2641_v39, %v2649_v47  ;;  %v2538_v41 = vld [vmem:[%s5571_s2 + $0x2f0] sm:$0xff] }
 0x87a   : > { %4242 = vmatpush1.bf16.msra.mxu0 %v4679_v62  ;;  %4283 = vmatpush1.bf16.msra.mxu1 %v4681_v48  ;;  %v2625_v62 = vld [vmem:[%s5571_s2 + $0x5a8] sm:$0xff] }
 0x87b   : > { %4243 = vmatprep.subr.bf16.mxu0 %v4664_v49  ;;  %4284 = vmatprep.subr.bf16.mxu1 %v4666_v50  ;;  %v2633_v48 = vld [vmem:[%s5571_s2 + $0x5e8] sm:$0xff]  ;;  %v4807_v49 = vcombine.low %v2640_v37, %v2648_v38  ;;  %v4809_v50 = vcombine.low %v2641_v39, %v2649_v47  ;;  %v4700_v37 = vcombine.high %v2530_v42, %v2538_v41  ;;  %v2514_v39 = vld [vmem:[%s5571_s2 + $0x230] sm:$0xff] }
 0x87c   : > { %v4794_v55 = vcombine.high %v2625_v62, %v2633_v48  ;;  %v2522_v47 = vld [vmem:[%s5571_s2 + $0x270] sm:$0xff] }
 0x87e   : > { %4244 = vmatpush1.bf16.msra.mxu0 %v4663_v54  ;;  %4285 = vmatpush1.bf16.msra.mxu1 %v4665_v56  ;;  %v2609_v54 = vld [vmem:[%s5571_s2 + $0x528] sm:$0xff] }
 0x87f   : > { %4245 = vmatprep.subr.bf16.mxu0 %v4648_v57  ;;  %4286 = vmatprep.subr.bf16.mxu1 %v4650_v59  ;;  %v2617_v56 = vld [vmem:[%s5571_s2 + $0x568] sm:$0xff]  ;;  %v4791_v57 = vcombine.low %v2624_v46, %v2632_v61  ;;  %v4793_v59 = vcombine.low %v2625_v62, %v2633_v48  ;;  %v4684_v46 = vcombine.high %v2514_v39, %v2522_v47  ;;  %v2498_v62 = vld [vmem:[%s5571_s2 + $0x1b0] sm:$0xff] }
 0x880   : > { %v4778_v0 = vcombine.high %v2609_v54, %v2617_v56  ;;  %v2506_v48 = vld [vmem:[%s5571_s2 + $0x1f0] sm:$0xff] }
 0x882   : > { %4246 = vmatpush1.bf16.msra.mxu0 %v4647_v5  ;;  %4287 = vmatpush1.bf16.msra.mxu1 %v4649_v7  ;;  %v2593_v5 = vld [vmem:[%s5571_s2 + $0x4a8] sm:$0xff] }
 0x883   : > { %4247 = vmatprep.subr.bf16.mxu0 %v4632_v8  ;;  %4288 = vmatprep.subr.bf16.mxu1 %v4634_v9  ;;  %v2601_v7 = vld [vmem:[%s5571_s2 + $0x4e8] sm:$0xff]  ;;  %v4775_v8 = vcombine.low %v2608_v52, %v2616_v53  ;;  %v4777_v9 = vcombine.low %v2609_v54, %v2617_v56  ;;  %v2482_v53 = vld [vmem:[%s5571_s2 + $0x130] sm:$0xff]  ;;  %v2483_v56 = vld [vmem:[%s5571_s2 + $0x138] sm:$0xff] }
 0x884   : > { %v4762_v1 = vcombine.high %v2593_v5, %v2601_v7  ;;  %v2490_v54 = vld [vmem:[%s5571_s2 + $0x170] sm:$0xff] }
 0x886   : > { %4248 = vmatpush1.bf16.msra.mxu0 %v4631_v6  ;;  %4289 = vmatpush1.bf16.msra.mxu1 %v4633_v10  ;;  %v2577_v6 = vld [vmem:[%s5571_s2 + $0x428] sm:$0xff] }
 0x887   : > { %4249 = vmatprep.subr.bf16.mxu0 %v4616_v11  ;;  %4290 = vmatprep.subr.bf16.mxu1 %v4618_v12  ;;  %v2585_v10 = vld [vmem:[%s5571_s2 + $0x468] sm:$0xff]  ;;  %v4759_v11 = vcombine.low %v2592_v3, %v2600_v4  ;;  %v4761_v12 = vcombine.low %v2593_v5, %v2601_v7  ;;  %v2466_v4 = vld [vmem:[%s5571_s2 + $0xb0] sm:$0xff]  ;;  %v2467_v7 = vld [vmem:[%s5571_s2 + $0xb8] sm:$0xff] }
 0x888   : > { %v4746_v23 = vcombine.high %v2577_v6, %v2585_v10  ;;  %v2474_v5 = vld [vmem:[%s5571_s2 + $0xf0] sm:$0xff] }
 0x88a   : > { %4250 = vmatpush1.bf16.msra.mxu0 %v4615_v17  ;;  %4291 = vmatpush1.bf16.msra.mxu1 %v4617_v18  ;;  %v2563_v17 = vld [vmem:[%s5571_s2 + $0x3b8] sm:$0xff] }
 0x88b   : > { %4251 = vmatprep.subr.bf16.mxu0 %v4856_v19  ;;  %4292 = vmatprep.subr.bf16.mxu1 %v4858_v20  ;;  %v2571_v18 = vld [vmem:[%s5571_s2 + $0x3f8] sm:$0xff]  ;;  %v4743_v19 = vcombine.low %v2576_v24, %v2584_v28  ;;  %v4745_v20 = vcombine.low %v2577_v6, %v2585_v10  ;;  %v2450_v28 = vld [vmem:[%s5571_s2 + $0x30] sm:$0xff] }
 0x88c   : > { %v4734_v22 = vcombine.high %v2563_v17, %v2571_v18  ;;  %v2458_v6 = vld [vmem:[%s5571_s2 + $0x70] sm:$0xff]  ;;  %v2451_v10 = vld [vmem:[%s5571_s2 + $0x38] sm:$0xff] }
 0x88e   : > { %4252 = vmatpush2.bf16.msra.mxu0 %v4855_v58  ;;  %4293 = vmatpush2.bf16.msra.mxu1 %v4857_v27  ;;  %v2547_v58 = vld [vmem:[%s5571_s2 + $0x338] sm:$0xff] }
 0x88f   : > { %4253 = vmatprep.subr.bf16.mxu0 %v4840_v29  ;;  %4294 = vmatprep.subr.bf16.mxu1 %v4842_v30  ;;  %v2555_v27 = vld [vmem:[%s5571_s2 + $0x378] sm:$0xff]  ;;  %v4731_v29 = vcombine.low %v2562_v14, %v2570_v15  ;;  %v4733_v30 = vcombine.low %v2563_v17, %v2571_v18  ;;  %v2690_v15 = vld [vmem:[%s5571_s2 + $0x7b0] sm:$0xff] }
 0x890   : > { %v4718_v32 = vcombine.high %v2547_v58, %v2555_v27  ;;  %v2698_v17 = vld [vmem:[%s5571_s2 + $0x7f0] sm:$0xff]  ;;  %v2691_v18 = vld [vmem:[%s5571_s2 + $0x7b8] sm:$0xff] }
 0x892   : > { %4254 = vmatpush2.bf16.msra.mxu0 %v4839_v33  ;;  %4295 = vmatpush2.bf16.msra.mxu1 %v4841_v34  ;;  %v2531_v33 = vld [vmem:[%s5571_s2 + $0x2b8] sm:$0xff] }
 0x893   : > { %4255 = vmatprep.subr.bf16.mxu0 %v4824_v35  ;;  %4296 = vmatprep.subr.bf16.mxu1 %v4826_v36  ;;  %v2539_v34 = vld [vmem:[%s5571_s2 + $0x2f8] sm:$0xff]  ;;  %v4715_v35 = vcombine.low %v2546_v25, %v2554_v26  ;;  %v4717_v36 = vcombine.low %v2547_v58, %v2555_v27  ;;  %v2674_v26 = vld [vmem:[%s5571_s2 + $0x730] sm:$0xff] }
 0x894   : > { %v4702_v38 = vcombine.high %v2531_v33, %v2539_v34  ;;  %v2682_v58 = vld [vmem:[%s5571_s2 + $0x770] sm:$0xff]  ;;  %v2675_v27 = vld [vmem:[%s5571_s2 + $0x738] sm:$0xff] }
 0x896   : > { %4256 = vmatpush2.bf16.msra.mxu0 %v4823_v40  ;;  %4297 = vmatpush2.bf16.msra.mxu1 %v4825_v43  ;;  %v2515_v40 = vld [vmem:[%s5571_s2 + $0x238] sm:$0xff] }
 0x897   : > { %4257 = vmatprep.subr.bf16.mxu0 %v4808_v44  ;;  %4298 = vmatprep.subr.bf16.mxu1 %v4810_v45  ;;  %v2523_v43 = vld [vmem:[%s5571_s2 + $0x278] sm:$0xff]  ;;  %v4699_v44 = vcombine.low %v2530_v42, %v2538_v41  ;;  %v4701_v45 = vcombine.low %v2531_v33, %v2539_v34  ;;  %v2658_v41 = vld [vmem:[%s5571_s2 + $0x6b0] sm:$0xff] }
 0x898   : > { %v4686_v61 = vcombine.high %v2515_v40, %v2523_v43  ;;  %v2666_v33 = vld [vmem:[%s5571_s2 + $0x6f0] sm:$0xff]  ;;  %v2659_v34 = vld [vmem:[%s5571_s2 + $0x6b8] sm:$0xff] }
 0x89a   : > { %4258 = vmatpush2.bf16.msra.mxu0 %v4807_v49  ;;  %4299 = vmatpush2.bf16.msra.mxu1 %v4809_v50  ;;  %v2499_v49 = vld [vmem:[%s5571_s2 + $0x1b8] sm:$0xff] }
 0x89b   : > { %4259 = vmatprep.subr.bf16.mxu0 %v4792_v51  ;;  %4300 = vmatprep.subr.bf16.mxu1 %v4794_v55  ;;  %v2507_v50 = vld [vmem:[%s5571_s2 + $0x1f8] sm:$0xff]  ;;  %v4683_v51 = vcombine.low %v2514_v39, %v2522_v47  ;;  %v4668_v55 = vcombine.high %v2498_v62, %v2506_v48  ;;  %v2642_v47 = vld [vmem:[%s5571_s2 + $0x630] sm:$0xff] }
 0x89c   : > { %v4670_v52 = vcombine.high %v2499_v49, %v2507_v50 }
 0x89e   : > { %4260 = vmatpush2.bf16.msra.mxu0 %v4791_v57  ;;  %4301 = vmatpush2.bf16.msra.mxu1 %v4793_v59  ;;  %v2491_v57 = vld [vmem:[%s5571_s2 + $0x178] sm:$0xff]  ;;  %v4667_v59 = vcombine.low %v2498_v62, %v2506_v48  ;;  %v2626_v48 = vld [vmem:[%s5571_s2 + $0x5b0] sm:$0xff] }
 0x89f   : > { %4261 = vmatprep.subr.bf16.mxu0 %v4776_v60  ;;  %4302 = vmatprep.subr.bf16.mxu1 %v4778_v0  ;;  %v4669_v60 = vcombine.low %v2499_v49, %v2507_v50  ;;  %v4652_v0 = vcombine.high %v2482_v53, %v2490_v54  ;;  %v4654_v3 = vcombine.high %v2483_v56, %v2491_v57  ;;  %v2634_v49 = vld [vmem:[%s5571_s2 + $0x5f0] sm:$0xff]  ;;  %v2627_v50 = vld [vmem:[%s5571_s2 + $0x5b8] sm:$0xff] }
 0x8a2   : > { %4262 = vmatpush2.bf16.msra.mxu0 %v4775_v8  ;;  %4303 = vmatpush2.bf16.msra.mxu1 %v4777_v9  ;;  %v2475_v8 = vld [vmem:[%s5571_s2 + $0xf8] sm:$0xff]  ;;  %v4651_v9 = vcombine.low %v2482_v53, %v2490_v54  ;;  %v2610_v54 = vld [vmem:[%s5571_s2 + $0x530] sm:$0xff] }
 0x8a3   : > { %4263 = vmatprep.subr.bf16.mxu0 %v4760_v63  ;;  %4304 = vmatprep.subr.bf16.mxu1 %v4762_v1  ;;  %v4653_v63 = vcombine.low %v2483_v56, %v2491_v57  ;;  %v4636_v1 = vcombine.high %v2466_v4, %v2474_v5  ;;  %v4638_v24 = vcombine.high %v2467_v7, %v2475_v8  ;;  %v2618_v56 = vld [vmem:[%s5571_s2 + $0x570] sm:$0xff]  ;;  %v2611_v57 = vld [vmem:[%s5571_s2 + $0x538] sm:$0xff] }
 0x8a6   : > { %4264 = vmatpush2.bf16.msra.mxu0 %v4759_v11  ;;  %4305 = vmatpush2.bf16.msra.mxu1 %v4761_v12  ;;  %v2459_v11 = vld [vmem:[%s5571_s2 + $0x78] sm:$0xff]  ;;  %v4635_v12 = vcombine.low %v2466_v4, %v2474_v5  ;;  %v2594_v5 = vld [vmem:[%s5571_s2 + $0x4b0] sm:$0xff] }
 0x8a7   : > { %4265 = vmatprep.subr.bf16.mxu0 %v4744_v13  ;;  %4306 = vmatprep.subr.bf16.mxu1 %v4746_v23  ;;  %v4637_v13 = vcombine.low %v2467_v7, %v2475_v8  ;;  %v4620_v23 = vcombine.high %v2450_v28, %v2458_v6  ;;  %v4622_v14 = vcombine.high %v2451_v10, %v2459_v11  ;;  %v2602_v7 = vld [vmem:[%s5571_s2 + $0x4f0] sm:$0xff]  ;;  %v2595_v8 = vld [vmem:[%s5571_s2 + $0x4b8] sm:$0xff] }
 0x8aa   : > { %4266 = vmatpush2.bf16.msra.mxu0 %v4743_v19  ;;  %4307 = vmatpush2.bf16.msra.mxu1 %v4745_v20  ;;  %v2699_v19 = vld [vmem:[%s5571_s2 + $0x7f8] sm:$0xff]  ;;  %v4619_v20 = vcombine.low %v2450_v28, %v2458_v6  ;;  %v4764_v28 = vcombine.high %v2594_v5, %v2602_v7 }
 0x8ab   : > { %4317 = vmatprep.subr.bf16.mxu0 %v4732_v21  ;;  %4358 = vmatprep.subr.bf16.mxu1 %v4734_v22  ;;  %v4621_v21 = vcombine.low %v2451_v10, %v2459_v11  ;;  %v4860_v22 = vcombine.high %v2690_v15, %v2698_v17  ;;  %v4862_v25 = vcombine.high %v2691_v18, %v2699_v19  ;;  %v2578_v10 = vld [vmem:[%s5571_s2 + $0x430] sm:$0xff] }
 0x8ac   : > { %v2586_v11 = vld [vmem:[%s5571_s2 + $0x470] sm:$0xff] }
 0x8ad   : > { %4268 = vmatmul.mubr.bf16.vlgmr.msra.gmra.mxu0 %v5757_v16  ;;  %4309 = vmatmul.mubr.bf16.vlgmr.msra.gmra.mxu1 %v5757_v16 }
 0x8ae   : > { %4318 = vmatpush1.bf16.msra.mxu0 %v4731_v29  ;;  %4359 = vmatpush1.bf16.msra.mxu1 %v4733_v30  ;;  %v2683_v29 = vld [vmem:[%s5571_s2 + $0x778] sm:$0xff]  ;;  %v4859_v30 = vcombine.low %v2690_v15, %v2698_v17  ;;  %v4748_v17 = vcombine.high %v2578_v10, %v2586_v11 }
 0x8af   : > { %4319 = vmatprep.subr.bf16.mxu0 %v4716_v31  ;;  %4360 = vmatprep.subr.bf16.mxu1 %v4718_v32  ;;  %v4861_v31 = vcombine.low %v2691_v18, %v2699_v19  ;;  %v4844_v32 = vcombine.high %v2674_v26, %v2682_v58  ;;  %v4846_v42 = vcombine.high %v2675_v27, %v2683_v29 }
 0x8b0   : > { %4349 = vmatprep.mubr.bf16.mxu0 %v5711_v2  ;;  %4390 = vmatprep.mubr.bf16.mxu1 %v5711_v2  ;;  %v4685_v2 = vcombine.low %v2515_v40, %v2523_v43  ;;  %v2650_v40 = vld [vmem:[%s5571_s2 + $0x670] sm:$0xff]  ;;  %v2643_v43 = vld [vmem:[%s5571_s2 + $0x638] sm:$0xff]  ;;  %v4747_v19 = vcombine.low %v2578_v10, %v2586_v11 }
 0x8b2   : > { %4320 = vmatpush1.bf16.msra.mxu0 %v4715_v35  ;;  %4361 = vmatpush1.bf16.msra.mxu1 %v4717_v36  ;;  %v2667_v35 = vld [vmem:[%s5571_s2 + $0x6f8] sm:$0xff]  ;;  %v4843_v36 = vcombine.low %v2674_v26, %v2682_v58 }
 0x8b3   : > { %4321 = vmatprep.subr.bf16.mxu0 %v4700_v37  ;;  %4362 = vmatprep.subr.bf16.mxu1 %v4702_v38  ;;  %v4845_v37 = vcombine.low %v2675_v27, %v2683_v29  ;;  %v4828_v38 = vcombine.high %v2658_v41, %v2666_v33  ;;  %v4830_v39 = vcombine.high %v2659_v34, %v2667_v35 }
 0x8b6   : > { %4322 = vmatpush1.bf16.msra.mxu0 %v4699_v44  ;;  %4363 = vmatpush1.bf16.msra.mxu1 %v4701_v45  ;;  %v2651_v44 = vld [vmem:[%s5571_s2 + $0x678] sm:$0xff]  ;;  %v4827_v45 = vcombine.low %v2658_v41, %v2666_v33 }
 0x8b7   : > { %4323 = vmatprep.subr.bf16.mxu0 %v4684_v46  ;;  %4364 = vmatprep.subr.bf16.mxu1 %v4686_v61  ;;  %v4829_v46 = vcombine.low %v2659_v34, %v2667_v35  ;;  %v4812_v61 = vcombine.high %v2642_v47, %v2650_v40  ;;  %v4814_v62 = vcombine.high %v2643_v43, %v2651_v44 }
 0x8ba   : > { %4324 = vmatpush1.bf16.msra.mxu0 %v4683_v51  ;;  %4365 = vmatpush1.bf16.msra.mxu1 %v4685_v2  ;;  %v2635_v51 = vld [vmem:[%s5571_s2 + $0x5f8] sm:$0xff]  ;;  %v4811_v2 = vcombine.low %v2642_v47, %v2650_v40 }
 0x8bb   : > { %4325 = vmatprep.subr.bf16.mxu0 %v4668_v55  ;;  %4366 = vmatprep.subr.bf16.mxu1 %v4670_v52  ;;  %v4813_v55 = vcombine.low %v2643_v43, %v2651_v44  ;;  %v4796_v52 = vcombine.high %v2626_v48, %v2634_v49  ;;  %v4798_v53 = vcombine.high %v2627_v50, %v2635_v51 }
 0x8be   : > { %4326 = vmatpush1.bf16.msra.mxu0 %v4667_v59  ;;  %4367 = vmatpush1.bf16.msra.mxu1 %v4669_v60  ;;  %v2619_v59 = vld [vmem:[%s5571_s2 + $0x578] sm:$0xff]  ;;  %v4795_v60 = vcombine.low %v2626_v48, %v2634_v49 }
 0x8bf   : > { %4327 = vmatprep.subr.bf16.mxu0 %v4652_v0  ;;  %4368 = vmatprep.subr.bf16.mxu1 %v4654_v3  ;;  %v4797_v0 = vcombine.low %v2627_v50, %v2635_v51  ;;  %v4780_v3 = vcombine.high %v2610_v54, %v2618_v56  ;;  %v4782_v4 = vcombine.high %v2611_v57, %v2619_v59 }
 0x8c2   : > { %4328 = vmatpush1.bf16.msra.mxu0 %v4651_v9  ;;  %4369 = vmatpush1.bf16.msra.mxu1 %v4653_v63  ;;  %v2603_v9 = vld [vmem:[%s5571_s2 + $0x4f8] sm:$0xff]  ;;  %v4779_v63 = vcombine.low %v2610_v54, %v2618_v56 }
 0x8c3   : > { %4329 = vmatprep.subr.bf16.mxu0 %v4636_v1  ;;  %4370 = vmatprep.subr.bf16.mxu1 %v4638_v24  ;;  %v2704_v1 = vlaneseq  ;;  %v4781_v24 = vcombine.low %v2611_v57, %v2619_v59  ;;  %v4766_v6 = vcombine.high %v2595_v8, %v2603_v9  ;;  %v4765_v15 = vcombine.low %v2595_v8, %v2603_v9 }
 0x8c6   : > { %4330 = vmatpush1.bf16.msra.mxu0 %v4635_v12  ;;  %4371 = vmatpush1.bf16.msra.mxu1 %v4637_v13  ;;  %v2579_v12 = vld [vmem:[%s5571_s2 + $0x438] sm:$0xff] }
 0x8c7   : > { %4331 = vmatprep.subr.bf16.mxu0 %v4620_v23  ;;  %4372 = vmatprep.subr.bf16.mxu1 %v4622_v14  ;;  %v2587_v13 = vld [vmem:[%s5571_s2 + $0x478] sm:$0xff]  ;;  %v4763_v23 = vcombine.low %v2594_v5, %v2602_v7  ;;  %v5957_v14 = vshrl.u32 %v2704_v1, 7 }
 0x8c8   : > { %v4750_v18 = vcombine.high %v2579_v12, %v2587_v13 }
 0x8c9   : > { %v2710_v26 = vsub.s32 1, %v5957_v14  ;;  %v2718_v58 = vsub.s32 3, %v5957_v14  ;;  %v2722_v43 = vsub.s32 4, %v5957_v14  ;;  %v2730_v44 = vsub.s32 6, %v5957_v14 }
 0x8ca   : > { %4332 = vmatpush1.bf16.msra.mxu0 %v4619_v20  ;;  %4373 = vmatpush1.bf16.msra.mxu1 %v4621_v21  ;;  %v2706_v20 = vsub.s32 0, %v5957_v14  ;;  %v4749_v21 = vcombine.low %v2579_v12, %v2587_v13 }
 0x8cb   : > { %4333 = vmatprep.subr.bf16.mxu0 %v4860_v22  ;;  %4374 = vmatprep.subr.bf16.mxu1 %v4862_v25  ;;  %v2700_v22 = vld [vmem:[%s464_s21] sm:$0xff]  ;;  %v2714_v25 = vsub.s32 2, %v5957_v14 }
 0x8cc   : > { %v2707_v27 = vrot.slane %v2700_v22, %v2706_v20 }
 0x8cd   : > { %v2715_v29 = vrot.slane %v2700_v22, %v2714_v25 }
 0x8ce   : > { %4334 = vmatpush2.bf16.msra.mxu0 %v4859_v30  ;;  %4375 = vmatpush2.bf16.msra.mxu1 %v4861_v31  ;;  %v2711_v30 = vrot.slane %v2700_v22, %v2710_v26 }
 0x8cf   : > { %4335 = vmatprep.subr.bf16.mxu0 %v4844_v32  ;;  %4376 = vmatprep.subr.bf16.mxu1 %v4846_v42  ;;  %v2719_v32 = vrot.slane %v2700_v22, %v2718_v58 }
 0x8d2   : > { %4336 = vmatpush2.bf16.msra.mxu0 %v4843_v36  ;;  %4377 = vmatpush2.bf16.msra.mxu1 %v4845_v37 }
 0x8d3   : > { %4337 = vmatprep.subr.bf16.mxu0 %v4828_v38  ;;  %4378 = vmatprep.subr.bf16.mxu1 %v4830_v39 }
 0x8d6   : > { %4338 = vmatpush2.bf16.msra.mxu0 %v4827_v45  ;;  %4379 = vmatpush2.bf16.msra.mxu1 %v4829_v46  ;;  %v2734_v45 = vsub.s32 7, %v5957_v14  ;;  %v2723_v46 = vrot.slane %v2700_v22, %v2722_v43 }
 0x8d7   : > { %4339 = vmatprep.subr.bf16.mxu0 %v4812_v61  ;;  %4380 = vmatprep.subr.bf16.mxu1 %v4814_v62  ;;  %v2731_v61 = vrot.slane %v2700_v22, %v2730_v44 }
 0x8d8   : > { %v2735_v49 = vrot.slane %v2700_v22, %v2734_v45 }
 0x8da   : > { %4340 = vmatpush2.bf16.msra.mxu0 %v4811_v2  ;;  %4381 = vmatpush2.bf16.msra.mxu1 %v4813_v55 }
 0x8db   : > { %4341 = vmatprep.subr.bf16.mxu0 %v4796_v52  ;;  %4382 = vmatprep.subr.bf16.mxu1 %v4798_v53 }
 0x8de   : > { %4342 = vmatpush2.bf16.msra.mxu0 %v4795_v60  ;;  %4383 = vmatpush2.bf16.msra.mxu1 %v4797_v0  ;;  %v2701_v0 = vld [vmem:[%s464_s21 + $0x8] sm:$0xff] }
 0x8df   : > { %4343 = vmatprep.subr.bf16.mxu0 %v4780_v3  ;;  %4384 = vmatprep.subr.bf16.mxu1 %v4782_v4  ;;  %v2739_v3 = vrot.slane %v2701_v0, %v2706_v20  ;;  %v2747_v4 = vrot.slane %v2701_v0, %v2714_v25  ;;  %v2743_v5 = vrot.slane %v2701_v0, %v2710_v26 }
 0x8e0   : > { %v2751_v8 = vrot.slane %v2701_v0, %v2718_v58 }
 0x8e2   : > { %4344 = vmatpush2.bf16.msra.mxu0 %v4779_v63  ;;  %4385 = vmatpush2.bf16.msra.mxu1 %v4781_v24 }
 0x8e3   : > { %4345 = vmatprep.subr.bf16.mxu0 %v4764_v28  ;;  %4386 = vmatprep.subr.bf16.mxu1 %v4766_v6 }
 0x8e6   : > { %4346 = vmatpush2.bf16.msra.mxu0 %v4763_v23  ;;  %4387 = vmatpush2.bf16.msra.mxu1 %v4765_v15  ;;  %v2763_v15 = vrot.slane %v2701_v0, %v2730_v44 }
 0x8e7   : > { %4347 = vmatprep.subr.bf16.mxu0 %v4748_v17  ;;  %4388 = vmatprep.subr.bf16.mxu1 %v4750_v18 }
 0x8ea   : > { %4348 = vmatpush2.bf16.msra.mxu0 %v4747_v19  ;;  %4389 = vmatpush2.bf16.msra.mxu1 %v4749_v21  ;;  %v2767_v19 = vrot.slane %v2701_v0, %v2734_v45 }
 0x8ed   : > { %v4105_v31 = vpop.f32.mrf.mxu0  ;;  %4350 = vmatmul.mubr.bf16.vlgmr.msra.gmra.mxu0 %v5757_v16  ;;  %v4146_v41 = vpop.f32.mrf.mxu1  ;;  %4391 = vmatmul.mubr.bf16.vlgmr.msra.gmra.mxu1 %v5757_v16  ;;  %v2726_v16 = vsub.s32 5, %v5957_v14  ;;  %v2755_v14 = vrot.slane %v2701_v0, %v2722_v43 }
 0x8ee   : > { %v4106_v42 = vadd.f32 %v4105_v31, %v2707_v27  ;;  %v4147_v33 = vadd.f32 %v4146_v41, %v2715_v29 }
 0x8ef   : > { %v4107_v34 = vpop.f32.mrf.mxu0  ;;  %v4148_v36 = vpop.f32.mrf.mxu1  ;;  %v2727_v62 = vrot.slane %v2700_v22, %v2726_v16  ;;  %v2759_v17 = vrot.slane %v2701_v0, %v2726_v16 }
 0x8f0   : > { %4399 = vst [vmem:[%s5583_s27] sm:$0xff] %v4106_v42  ;;  %v4108_v35 = vadd.f32 %v4107_v34, %v2711_v30  ;;  %4401 = vst [vmem:[%s5583_s27 + $0x10] sm:$0xff] %v4147_v33  ;;  %v4149_v37 = vadd.f32 %v4148_v36, %v2719_v32 }
 0x8f1   : > { %v4109_v38 = vpop.f32.mrf.mxu0  ;;  %v4150_v39 = vpop.f32.mrf.mxu1 }
 0x8f2   : > { %4400 = vst [vmem:[%s5583_s27 + $0x8] sm:$0xff] %v4108_v35  ;;  %4402 = vst [vmem:[%s5583_s27 + $0x18] sm:$0xff] %v4149_v37 }
 0x8f3   : > { %v4110_v47 = vpop.f32.mrf.mxu0  ;;  %v4151_v40 = vpop.f32.mrf.mxu1 }
 0x92d   : > { %v4187_v48 = vpop.f32.mrf.mxu0  ;;  %v4228_v51 = vpop.f32.mrf.mxu1 }
 0x92e   : > { %v4188_v50 = vadd.f32 %v4187_v48, %v2723_v46  ;;  %v4229_v2 = vadd.f32 %v4228_v51, %v2731_v61 }
 0x92f   : > { %v4189_v55 = vpop.f32.mrf.mxu0  ;;  %v4230_v53 = vpop.f32.mrf.mxu1 }
 0x930   : > { %4403 = vst [vmem:[%s5583_s27 + $0x20] sm:$0xff] %v4188_v50  ;;  %v4190_v52 = vadd.f32 %v4189_v55, %v2727_v62  ;;  %4405 = vst [vmem:[%s5583_s27 + $0x30] sm:$0xff] %v4229_v2  ;;  %v4231_v54 = vadd.f32 %v4230_v53, %v2735_v49 }
 0x931   : > { %v4191_v56 = vpop.f32.mrf.mxu0  ;;  %v4232_v57 = vpop.f32.mrf.mxu1 }
 0x932   : > { %4404 = vst [vmem:[%s5583_s27 + $0x28] sm:$0xff] %v4190_v52  ;;  %4406 = vst [vmem:[%s5583_s27 + $0x38] sm:$0xff] %v4231_v54 }
 0x933   : > { %v4192_v59 = vpop.f32.mrf.mxu0  ;;  %v4233_v60 = vpop.f32.mrf.mxu1 }
 0x96d   : > { %v4269_v7 = vpop.f32.mrf.mxu0  ;;  %v4310_v63 = vpop.f32.mrf.mxu1 }
 0x96e   : > { %v4270_v9 = vadd.f32 %v4269_v7, %v2739_v3  ;;  %v4311_v1 = vadd.f32 %v4310_v63, %v2747_v4 }
 0x96f   : > { %v4271_v24 = vpop.f32.mrf.mxu0  ;;  %v4312_v6 = vpop.f32.mrf.mxu1 }
 0x970   : > { %4407 = vst [vmem:[%s5583_s27 + $0x40] sm:$0xff] %v4270_v9  ;;  %v4272_v28 = vadd.f32 %v4271_v24, %v2743_v5  ;;  %4409 = vst [vmem:[%s5583_s27 + $0x50] sm:$0xff] %v4311_v1  ;;  %v4313_v10 = vadd.f32 %v4312_v6, %v2751_v8 }
 0x971   : > { %v4273_v11 = vpop.f32.mrf.mxu0  ;;  %v4314_v12 = vpop.f32.mrf.mxu1 }
 0x972   : > { %4408 = vst [vmem:[%s5583_s27 + $0x48] sm:$0xff] %v4272_v28  ;;  %4410 = vst [vmem:[%s5583_s27 + $0x58] sm:$0xff] %v4313_v10 }
 0x973   : > { %v4274_v13 = vpop.f32.mrf.mxu0  ;;  %v4315_v23 = vpop.f32.mrf.mxu1 }
 0x9ad   : > { %v4351_v18 = vpop.f32.mrf.mxu0  ;;  %v4392_v21 = vpop.f32.mrf.mxu1 }
 0x9ae   : > { %v4352_v20 = vadd.f32 %v4351_v18, %v2755_v14  ;;  %v4393_v22 = vadd.f32 %v4392_v21, %v2763_v15 }
 0x9af   : > { %v4353_v25 = vpop.f32.mrf.mxu0  ;;  %v4394_v58 = vpop.f32.mrf.mxu1 }
 0x9b0   : > { %4411 = vst [vmem:[%s5583_s27 + $0x60] sm:$0xff] %v4352_v20  ;;  %v4354_v26 = vadd.f32 %v4353_v25, %v2759_v17  ;;  %4413 = vst [vmem:[%s5583_s27 + $0x70] sm:$0xff] %v4393_v22  ;;  %v4395_v27 = vadd.f32 %v4394_v58, %v2767_v19 }
 0x9b1   : > { %v4355_v29 = vpop.f32.mrf.mxu0  ;;  %v4396_v30 = vpop.f32.mrf.mxu1 }
 0x9b2   : > { %4412 = vst [vmem:[%s5583_s27 + $0x68] sm:$0xff] %v4354_v26  ;;  %4414 = vst [vmem:[%s5583_s27 + $0x78] sm:$0xff] %v4395_v27 }
 0x9b3   : > { %v4356_v31 = vpop.f32.mrf.mxu0  ;;  %v4397_v32 = vpop.f32.mrf.mxu1 }
 0x9b4 PF: > { %p24_p13 = scmp.ge.s32.totalorder %s5439_s22, 7   ;;  %s6053_s13 = smov %s5276_s14 }
 0x9b5   : > { %s6054_s14 = smov %s5280_s15  ;;  %s6055_s15 = smov %s5450_s30 }
 0x9b6   : > { %s6056_s16 = smov %s5439_s22  ;;  %26 = sbr.rel (!%p24_p13) target bundleno = 13 (0xd), region = 164 }
 0x9bb   :  { %4437 = vsyncpa [#allocation4], 1 }
 0x9bc   :  { %4439 = vsyncpa [#allocation4 + $0x1], 1 }
 0x9bd   :  { %4440 = vsyncpa [#allocation6], 1 }
 0x9be   :  { %4441 = vsyncpa [#allocation9], 1 }
 0x9bf   :  { %4442 = vsyncpa [#allocation12], 1 }
 0x9c0   :  { %4443 = vsyncpa [#allocation15], 1 }
 0x9c1   :  { %4445 = vsyncpa [#allocation15 + $0x1], 1 }

</bundles_post_ra>
